<compile_context>
chip_gen: v6e
topology: v6e:2x2x1
jax: 0.10.0
libtpu: 0.0.40
codegen_flags: <defaults>
</compile_context>

<pallas_src>
import jax
import jax.numpy as jnp
from jax.experimental import pallas as pl
from jax.experimental.pallas import tpu as pltpu

BN_EPS = 1e-5
LANE = 128              # TPU lane width: channel dims padded to 128
DEFAULT_TILE_N = 2048   # rows per grid step (power of two, multiple of 8/256)
MIN_TILE_N = 256
VMEM_BUDGET = 12 << 20  # conservative: fits the 16 MiB default scope on v5e


def _round_up(x, m):
    return (x + m - 1) // m * m


def _choose_tile_n(n, k_pad, c_pad):
    """Largest power-of-two row tile that fits the VMEM budget and keeps at
    least two grid steps (so v7x's two TensorCores both get work)."""
    def step_bytes(t):
        return (2 * t * k_pad * 2      # activations in, double-buffered, bf16
                + 2 * t * c_pad * 2    # y out, double-buffered, bf16
                + 2 * k_pad * c_pad * 2  # weights (grid-invariant, dbl-buffered)
                + 4 * 8 * c_pad * 4)   # stats outputs
    t = DEFAULT_TILE_N
    while t > MIN_TILE_N and step_bytes(t) > VMEM_BUDGET:
        t //= 2
    # keep >= 2 grid steps when the problem allows it, and never exceed n.
    while t > MIN_TILE_N and t * 2 > max(n, MIN_TILE_N):
        t //= 2
    return max(t, MIN_TILE_N)


def _pad_vec(v, c_pad):
    return jnp.zeros((c_pad,), jnp.float32).at[: v.shape[0]].set(v)


# ----------------------------- Pallas kernels --------------------------------


def matmul_stats_kernel(x_ref, w_ref, y_ref, sum_ref, ssq_ref):
    """Pass 1: y = x @ w (bf16 operands, f32 MXU accumulation), plus per-tile
    BatchNorm partial statistics computed from the f32 accumulator.

    x_ref:   (TILE_N, K) bf16   activation tile (streamed)
    w_ref:   (K, C)      bf16   weights (grid-invariant)
    y_ref:   (TILE_N, C) bf16   pre-BN output tile (bf16 storage)
    sum_ref: (1, 1, C)   f32    per-tile column sums
    ssq_ref: (1, 1, C)   f32    per-tile column sums of squares
    """
    y = jnp.dot(x_ref[...], w_ref[...], preferred_element_type=jnp.float32)
    y_ref[...] = y.astype(y_ref.dtype)
    sum_ref[...] = jnp.sum(y, axis=0, keepdims=True)[None]
    ssq_ref[...] = jnp.sum(y * y, axis=0, keepdims=True)[None]


def bn_relu_kernel(y_ref, aff_ref, o_ref):
    """Pass 2: o = relu(y * scale + shift).  Math in f32, storage per o_ref."""
    scale = aff_ref[0:1, :]
    shift = aff_ref[1:2, :]
    y = y_ref[...].astype(jnp.float32)
    o_ref[...] = jnp.maximum(y * scale + shift, 0.0).astype(o_ref.dtype)


def bn_relu_add_kernel(y_ref, xup_ref, aff_ref, o_ref):
    """Pass 2 (skip branch): o = x_up + relu(y * scale + shift).

    x_up arrives at its true channel width (cx <= C); the residual is added
    onto the first cx lanes only (the remaining lanes are zero padding that is
    sliced off in the wrapper)."""
    scale = aff_ref[0:1, :]
    shift = aff_ref[1:2, :]
    y = y_ref[...].astype(jnp.float32)
    o = jnp.maximum(y * scale + shift, 0.0)
    o_ref[...] = o.astype(o_ref.dtype)
    cx = xup_ref.shape[-1]
    res = o[:, :cx] + xup_ref[...].astype(jnp.float32)
    o_ref[:, :cx] = res.astype(o_ref.dtype)   # masked narrow-lane store (VMEM)


# --------------------------- pallas_call wrappers -----------------------------


def _matmul_with_stats(x2d, w2d, tile_n):
    """Tiled (N, K) @ (K, C) -> bf16 y plus per-tile f32 BN partial sums."""
    n_pad, k = x2d.shape
    c = w2d.shape[1]
    num_tiles = n_pad // tile_n
    return pl.pallas_call(
        matmul_stats_kernel,
        out_shape=(
            jax.ShapeDtypeStruct((n_pad, c), jnp.bfloat16),
            jax.ShapeDtypeStruct((num_tiles, 1, c), jnp.float32),
            jax.ShapeDtypeStruct((num_tiles, 1, c), jnp.float32),
        ),
        grid=(num_tiles,),
        in_specs=[
            pl.BlockSpec((tile_n, k), lambda i: (i, 0)),  # activations: stream
            pl.BlockSpec((k, c), lambda i: (0, 0)),       # weights: resident
        ],
        out_specs=(
            pl.BlockSpec((tile_n, c), lambda i: (i, 0)),
            pl.BlockSpec((1, 1, c), lambda i: (i, 0, 0)),
            pl.BlockSpec((1, 1, c), lambda i: (i, 0, 0)),
        ),
        compiler_params=pltpu.CompilerParams(
            dimension_semantics=("parallel",)),
    )(x2d, w2d)


def _bn_affine(sums, ssqs, g, b, n_true):
    """Tiny reduce: fold per-tile partial sums into per-channel scale/shift."""
    col_sum = jnp.sum(sums[:, 0, :], axis=0)
    col_ssq = jnp.sum(ssqs[:, 0, :], axis=0)
    mean = col_sum / n_true
    # TODO(synk): E[y^2]-E[y]^2 can cancel for trained nets with large means;
    # switch to per-tile mean-centred partial stats (Chan combine) if needed.
    var = jnp.maximum(col_ssq / n_true - mean * mean, 0.0)  # biased variance
    inv = jax.lax.rsqrt(var + BN_EPS)
    scale = g * inv
    shift = b - mean * scale
    return jnp.zeros((8, scale.shape[0]), jnp.float32).at[0].set(
        scale).at[1].set(shift)


def _bn_relu(y, aff, tile_n, add=None, out_dtype=jnp.bfloat16):
    """Tiled normalize + ReLU (optionally with the residual add fused in)."""
    n_pad, c = y.shape
    num_tiles = n_pad // tile_n
    y_spec = pl.BlockSpec((tile_n, c), lambda i: (i, 0))
    aff_spec = pl.BlockSpec((8, c), lambda i: (0, 0))
    if add is None:
        kernel, args, in_specs = bn_relu_kernel, (y, aff), [y_spec, aff_spec]
    else:
        cx = add.shape[1]
        kernel, args = bn_relu_add_kernel, (y, add, aff)
        in_specs = [y_spec, pl.BlockSpec((tile_n, cx), lambda i: (i, 0)),
                    aff_spec]
    return pl.pallas_call(
        kernel,
        out_shape=jax.ShapeDtypeStruct((n_pad, c), out_dtype),
        grid=(num_tiles,),
        in_specs=in_specs,
        out_specs=pl.BlockSpec((tile_n, c), lambda i: (i, 0)),
        compiler_params=pltpu.CompilerParams(
            dimension_semantics=("parallel",)),
    )(*args)


# -------------------------------- layer glue ----------------------------------


def upsample_bilinear_x2_align_corners(x):
    """NHWC bilinear upsample x2, align_corners=True (UpsamplingBilinear2d)."""
    b, h, w, c = x.shape
    ho, wo = 2 * h, 2 * w

    def coords(n_in, n_out):
        if n_in == 1:
            z = jnp.zeros((n_out,), jnp.int32)
            return z, z, jnp.zeros((n_out,), jnp.float32)
        cc = jnp.arange(n_out, dtype=jnp.float32) * (n_in - 1) / (n_out - 1)
        i0 = jnp.floor(cc).astype(jnp.int32)
        i1 = jnp.minimum(i0 + 1, n_in - 1)
        return i0, i1, cc - i0.astype(jnp.float32)

    y0, y1, fy = coords(h, ho)
    x0, x1, fx = coords(w, wo)
    fx_ = fx[None, None, :, None]
    fy_ = fy[None, :, None, None]
    r0, r1 = x[:, y0], x[:, y1]
    top = r0[:, :, x0] * (1.0 - fx_) + r0[:, :, x1] * fx_
    bot = r1[:, :, x0] * (1.0 - fx_) + r1[:, :, x1] * fx_
    return top * (1.0 - fy_) + bot * fy_


def conv3x3_bn_relu(x_nhwc, w9, g, b, out_dtype=jnp.bfloat16):
    """3x3 conv (pad=1, no bias) + training-mode BatchNorm + ReLU."""
    bsz, h, w, cin = x_nhwc.shape
    cout = w9.shape[2]
    cout_p = _round_up(cout, LANE)
    n = bsz * h * w

    # im2col in bf16 with the 9 taps folded into the contraction dim.
    xb = x_nhwc.astype(jnp.bfloat16)
    xp = jnp.pad(xb, ((0, 0), (1, 1), (1, 1), (0, 0)))
    cols = [xp[:, dy:dy + h, dx:dx + w, :]
            for dy in range(3) for dx in range(3)]
    patches = jnp.concatenate(cols, axis=-1).reshape(n, 9 * cin)

    wfold = jnp.zeros((9, cin, cout_p), jnp.float32).at[:, :, :cout].set(w9)
    wfold = wfold.reshape(9 * cin, cout_p).astype(jnp.bfloat16)

    k_p = _round_up(9 * cin, LANE)  # lane-dense contraction dim
    if k_p != 9 * cin:
        patches = jnp.pad(patches, ((0, 0), (0, k_p - 9 * cin)))
        wfold = jnp.pad(wfold, ((0, k_p - 9 * cin), (0, 0)))

    tile_n = _choose_tile_n(n, k_p, cout_p)
    n_pad = _round_up(n, tile_n)
    if n_pad != n:
        patches = jnp.pad(patches, ((0, n_pad - n), (0, 0)))

    y, sums, ssqs = _matmul_with_stats(patches, wfold, tile_n)
    aff = _bn_affine(sums, ssqs, _pad_vec(g, cout_p), _pad_vec(b, cout_p), n)
    out = _bn_relu(y, aff, tile_n, out_dtype=out_dtype)
    return out[:n, :cout].reshape(bsz, h, w, cout)


def skip_conv1x1_bn_relu_add(x_up_nhwc, skip_nhwc, w, g, b):
    """x_up + ReLU(BN(1x1 conv(skip))); the add is fused into pass 2.

    Only well-defined when in_channels == out_channels (the PyTorch module
    adds an [out_channels] tensor onto the [in_channels] upsampled x)."""
    bsz, h, ww, cx = x_up_nhwc.shape
    cs = skip_nhwc.shape[-1]
    cout = w.shape[1]
    cout_p = _round_up(cout, LANE)
    n = bsz * h * ww

    s2d = skip_nhwc.reshape(n, cs).astype(jnp.bfloat16)
    x2d = x_up_nhwc.reshape(n, cx).astype(jnp.bfloat16)  # residual, true width

    cs_p = _round_up(cs, LANE)
    wp = jnp.zeros((cs_p, cout_p), jnp.float32).at[:cs, :cout].set(w)
    wp = wp.astype(jnp.bfloat16)
    if cs_p != cs:
        s2d = jnp.pad(s2d, ((0, 0), (0, cs_p - cs)))

    tile_n = _choose_tile_n(n, cs_p, cout_p)
    n_pad = _round_up(n, tile_n)
    if n_pad != n:
        s2d = jnp.pad(s2d, ((0, n_pad - n), (0, 0)))
        x2d = jnp.pad(x2d, ((0, n_pad - n), (0, 0)))

    y, sums, ssqs = _matmul_with_stats(s2d, wp, tile_n)
    aff = _bn_affine(sums, ssqs, _pad_vec(g, cout_p), _pad_vec(b, cout_p), n)
    out = _bn_relu(y, aff, tile_n, add=x2d, out_dtype=jnp.bfloat16)
    return out[:n, :cout].reshape(bsz, h, ww, cout)


@jax.jit
def decoder_block_forward(x_nchw, skip_nchw, params):
    """DecoderBlock.forward.  Inputs/outputs use NCHW (PyTorch convention)."""
    # TODO(synk): accepting NHWC at the boundary (and folding the fixed 2x
    # align_corners upsample into the skip-branch pass 2) would remove 2-3
    # extra full-tensor HBM round trips done outside Pallas.
    x = jnp.transpose(x_nchw, (0, 2, 3, 1))  # -> NHWC
    x = upsample_bilinear_x2_align_corners(x)

    if skip_nchw is not None:
        s = jnp.transpose(skip_nchw, (0, 2, 3, 1))
        # TODO(synk): the F.interpolate spatial-resize and channel
        # pad/truncate branches of the module are not implemented (the demo
        # provides skip matching x spatially with exactly skip_channels chans).
        x = skip_conv1x1_bn_relu_add(x, s, params["skip_w"],
                                     params["skip_g"], params["skip_b"])

    x = conv3x3_bn_relu(x, params["w1"], params["g1"], params["b1"],
                        out_dtype=jnp.bfloat16)
    x = conv3x3_bn_relu(x, params["w2"], params["g2"], params["b2"],
                        out_dtype=jnp.float32)
    return jnp.transpose(x, (0, 3, 1, 2))  # back to NCHW


# ---------------------------- pure-JAX reference -------------------------------


def _bn_relu_ref(y, g, b):
    mean = jnp.mean(y, axis=(0, 1, 2), keepdims=True)
    var = jnp.mean((y - mean) ** 2, axis=(0, 1, 2), keepdims=True)
    y = (y - mean) * jax.lax.rsqrt(var + BN_EPS)
    return jnp.maximum(y * g.reshape(1, 1, 1, -1) + b.reshape(1, 1, 1, -1), 0.0)


def reference_forward(x_nchw, skip_nchw, params, matmul_dtype=jnp.float32):
    """Pure-JAX spec.  matmul_dtype=bfloat16 mirrors the kernels' MXU-operand
    rounding (f32 accumulation everywhere) for a tight structural check."""
    def cast(a):
        return a.astype(matmul_dtype).astype(jnp.float32)

    x = jnp.transpose(x_nchw, (0, 2, 3, 1))
    x = upsample_bilinear_x2_align_corners(x)
    s = jnp.transpose(skip_nchw, (0, 2, 3, 1))
    y = jnp.einsum("bhwc,co->bhwo", cast(s), cast(params["skip_w"]))
    x = x + _bn_relu_ref(y, params["skip_g"], params["skip_b"])
    for wk, gk, bk in (("w1", "g1", "b1"), ("w2", "g2", "b2")):
        w9 = params[wk]
        w = w9.reshape(3, 3, w9.shape[1], w9.shape[2])  # HWIO, dy-major
        y = jax.lax.conv_general_dilated(
            cast(x), cast(w), window_strides=(1, 1), padding="SAME",
            dimension_numbers=("NHWC", "HWIO", "NHWC"))
        x = _bn_relu_ref(y, params[gk], params[bk])
    return jnp.transpose(x, (0, 3, 1, 2))


# ------------------------------------ main -------------------------------------


def make_params(key, in_channels, out_channels, skip_channels):
    ks = jax.random.split(key, 9)
    s1 = 1.0 / jnp.sqrt(9.0 * in_channels)
    s2 = 1.0 / jnp.sqrt(9.0 * out_channels)
    ss = 1.0 / jnp.sqrt(1.0 * skip_channels)

    def bn(kg, kb):
        g = 1.0 + 0.1 * jax.random.normal(kg, (out_channels,), jnp.float32)
        b = 0.1 * jax.random.normal(kb, (out_channels,), jnp.float32)
        return g, b

    g1, b1 = bn(ks[3], ks[4])
    g2, b2 = bn(ks[5], ks[6])
    gs, bs = bn(ks[7], ks[8])
    return {
        # 3x3 conv weights stored as (9, Cin, Cout) (tap-major); BN as (Cout,).
        "w1": jax.random.normal(ks[0], (9, in_channels, out_channels),
                                jnp.float32) * s1,
        "g1": g1, "b1": b1,
        "w2": jax.random.normal(ks[1], (9, out_channels, out_channels),
                                jnp.float32) * s2,
        "g2": g2, "b2": b2,
        "skip_w": jax.random.normal(ks[2], (skip_channels, out_channels),
                                    jnp.float32) * ss,
        "skip_g": gs, "skip_b": bs,
    }


if __name__ == "__main__":
    # A DecoderBlock with a skip connection requires in_channels == out_channels.
    B, Cin, Cout, Cskip, H, W = 2, 8, 8, 4, 16, 16

    key = jax.random.PRNGKey(0)
    kx, ks, kp = jax.random.split(key, 3)
    x = jax.random.normal(kx, (B, Cin, H, W), jnp.float32)            # NCHW
    skip = jax.random.normal(ks, (B, Cskip, 2 * H, 2 * W), jnp.float32)
    params = make_params(kp, Cin, Cout, Cskip)

    out = jax.block_until_ready(decoder_block_forward(x, skip, params))
    assert out.shape == (B, Cout, 2 * H, 2 * W), out.shape
    out = out.astype(jnp.float32)

    # Structural check vs a reference that applies the same bf16 rounding to
    # matmul operands (f32 accumulation); the kernel additionally stores
    # intermediates in bf16, hence the slightly looser bound.
    ref_bf16 = jax.block_until_ready(
        reference_forward(x, skip, params, matmul_dtype=jnp.bfloat16))
    err = float(jnp.max(jnp.abs(out - ref_bf16)))
    assert err < 5e-2, f"max abs error vs bf16-operand reference: {err}"

    # Looser sanity check vs the pure-f32 module spec.
    ref_f32 = jax.block_until_ready(reference_forward(x, skip, params))
    err_f32 = float(jnp.max(jnp.abs(out - ref_f32)))
    assert err_f32 < 1e-1, f"max abs error vs f32 reference: {err_f32}"

    print("KERNEL_OK")
</pallas_src>

<mosaic_0001>
module attributes {stable_mosaic.version = 11 : i64} {
  func.func @matmul_stats_kernel(%arg0: i32, %arg1: memref<1024x128xbf16, #tpu.memory_space<vmem>>, %arg2: memref<128x128xbf16, #tpu.memory_space<vmem>>, %arg3: memref<1024x128xbf16, #tpu.memory_space<vmem>>, %arg4: memref<1x1x128xf32, #tpu.memory_space<vmem>>, %arg5: memref<1x1x128xf32, #tpu.memory_space<vmem>>) attributes {dimension_semantics = [#tpu.dimension_semantics<parallel>], iteration_bounds = array<i64: 2>, scalar_prefetch = 0 : i64, scratch_operands = 0 : i64, tpu.core_type = #tpu.core_type<tc>, window_params = [{transform_indices = @transform_0, window_bounds = array<i64: 1024, 128>}, {pipeline_mode = #tpu.pipeline_mode<synchronous>, transform_indices = @transform_1, window_bounds = array<i64: 128, 128>}, {transform_indices = @transform_2, window_bounds = array<i64: 1024, 128>}, {transform_indices = @transform_3, window_bounds = array<i64: 1, 1, 128>}, {transform_indices = @transform_4, window_bounds = array<i64: 1, 1, 128>}]} {
    %c0 = arith.constant 0 : index
    %c0_0 = arith.constant 0 : index
    %0 = vector.load %arg1[%c0, %c0_0] : memref<1024x128xbf16, #tpu.memory_space<vmem>>, vector<1024x128xbf16>
    %c0_1 = arith.constant 0 : index
    %c0_2 = arith.constant 0 : index
    %1 = vector.load %arg2[%c0_1, %c0_2] : memref<128x128xbf16, #tpu.memory_space<vmem>>, vector<128x128xbf16>
    %cst = arith.constant dense<0.000000e+00> : vector<1024x128xf32>
    %2 = tpu.matmul %0, %1, %cst {dimension_numbers = #tpu.dot_dimension_numbers<[1], [0], [0], [1], [0, 0, 1, 1], [], []>} : vector<1024x128xbf16>, vector<128x128xbf16>, vector<1024x128xf32> -> vector<1024x128xf32>
    %3 = arith.truncf %2 : vector<1024x128xf32> to vector<1024x128xbf16>
    %c0_3 = arith.constant 0 : index
    %c0_4 = arith.constant 0 : index
    %4 = vector.load %arg3[%c0_3, %c0_4] : memref<1024x128xbf16, #tpu.memory_space<vmem>>, vector<1024x128xbf16>
    tpu.vector_store %arg3[%c0_3, %c0_4], %3 {strides = array<i32>} : memref<1024x128xbf16, #tpu.memory_space<vmem>>, vector<1024x128xbf16>,
    %cst_5 = arith.constant dense<0.000000e+00> : vector<128xf32>
    %5 = vector.multi_reduction <add>, %2, %cst_5 [0] : vector<1024x128xf32> to vector<128xf32>
    %6 = vector.shape_cast %5 : vector<128xf32> to vector<1x128xf32>
    %7 = vector.shape_cast %6 : vector<1x128xf32> to vector<1x1x128xf32>
    %c0_6 = arith.constant 0 : index
    %c0_7 = arith.constant 0 : index
    %c0_8 = arith.constant 0 : index
    %8 = vector.load %arg4[%c0_6, %c0_7, %c0_8] : memref<1x1x128xf32, #tpu.memory_space<vmem>>, vector<1x1x128xf32>
    tpu.vector_store %arg4[%c0_6, %c0_7, %c0_8], %7 {strides = array<i32>} : memref<1x1x128xf32, #tpu.memory_space<vmem>>, vector<1x1x128xf32>,
    %9 = arith.mulf %2, %2 : vector<1024x128xf32>
    %cst_9 = arith.constant dense<0.000000e+00> : vector<128xf32>
    %10 = vector.multi_reduction <add>, %9, %cst_9 [0] : vector<1024x128xf32> to vector<128xf32>
    %11 = vector.shape_cast %10 : vector<128xf32> to vector<1x128xf32>
    %12 = vector.shape_cast %11 : vector<1x128xf32> to vector<1x1x128xf32>
    %c0_10 = arith.constant 0 : index
    %c0_11 = arith.constant 0 : index
    %c0_12 = arith.constant 0 : index
    %13 = vector.load %arg5[%c0_10, %c0_11, %c0_12] : memref<1x1x128xf32, #tpu.memory_space<vmem>>, vector<1x1x128xf32>
    tpu.vector_store %arg5[%c0_10, %c0_11, %c0_12], %12 {strides = array<i32>} : memref<1x1x128xf32, #tpu.memory_space<vmem>>, vector<1x1x128xf32>,
    return
  }
  func.func @transform_0(%arg0: i32) -> (i32, i32) {
    %c0_i32 = arith.constant 0 : i32
    %c0_i32_0 = arith.constant 0 : i32
    return %arg0, %c0_i32 : i32, i32
  }
  func.func @transform_1(%arg0: i32) -> (i32, i32) {
    %c0_i32 = arith.constant 0 : i32
    %c0_i32_0 = arith.constant 0 : i32
    %c0_i32_1 = arith.constant 0 : i32
    return %c0_i32, %c0_i32_0 : i32, i32
  }
  func.func @transform_2(%arg0: i32) -> (i32, i32) {
    %c0_i32 = arith.constant 0 : i32
    %c0_i32_0 = arith.constant 0 : i32
    return %arg0, %c0_i32 : i32, i32
  }
  func.func @transform_3(%arg0: i32) -> (i32, i32, i32) {
    %c0_i32 = arith.constant 0 : i32
    %c0_i32_0 = arith.constant 0 : i32
    %c0_i32_1 = arith.constant 0 : i32
    return %arg0, %c0_i32, %c0_i32_0 : i32, i32, i32
  }
  func.func @transform_4(%arg0: i32) -> (i32, i32, i32) {
    %c0_i32 = arith.constant 0 : i32
    %c0_i32_0 = arith.constant 0 : i32
    %c0_i32_1 = arith.constant 0 : i32
    return %arg0, %c0_i32, %c0_i32_0 : i32, i32, i32
  }
}

module attributes {stable_mosaic.version = 11 : i64} {
  func.func @bn_relu_add_kernel(%arg0: i32, %arg1: memref<1024x128xbf16, #tpu.memory_space<vmem>>, %arg2: memref<1024x8xbf16, #tpu.memory_space<vmem>>, %arg3: memref<8x128xf32, #tpu.memory_space<vmem>>, %arg4: memref<1024x128xbf16, #tpu.memory_space<vmem>>) attributes {dimension_semantics = [#tpu.dimension_semantics<parallel>], iteration_bounds = array<i64: 2>, scalar_prefetch = 0 : i64, scratch_operands = 0 : i64, tpu.core_type = #tpu.core_type<tc>, window_params = [{transform_indices = @transform_0, window_bounds = array<i64: 1024, 128>}, {transform_indices = @transform_1, window_bounds = array<i64: 1024, 8>}, {pipeline_mode = #tpu.pipeline_mode<synchronous>, transform_indices = @transform_2, window_bounds = array<i64: 8, 128>}, {transform_indices = @transform_3, window_bounds = array<i64: 1024, 128>}]} {
    %c0 = arith.constant 0 : index
    %c0_0 = arith.constant 0 : index
    %0 = vector.load %arg3[%c0, %c0_0] : memref<8x128xf32, #tpu.memory_space<vmem>>, vector<1x128xf32>
    %c1 = arith.constant 1 : index
    %c0_1 = arith.constant 0 : index
    %1 = vector.load %arg3[%c1, %c0_1] : memref<8x128xf32, #tpu.memory_space<vmem>>, vector<1x128xf32>
    %c0_2 = arith.constant 0 : index
    %c0_3 = arith.constant 0 : index
    %2 = vector.load %arg1[%c0_2, %c0_3] : memref<1024x128xbf16, #tpu.memory_space<vmem>>, vector<1024x128xbf16>
    %3 = arith.extf %2 : vector<1024x128xbf16> to vector<1024x128xf32>
    %4 = vector.broadcast %0 : vector<1x128xf32> to vector<1024x128xf32>
    %5 = arith.mulf %3, %4 : vector<1024x128xf32>
    %6 = vector.broadcast %1 : vector<1x128xf32> to vector<1024x128xf32>
    %7 = arith.addf %5, %6 : vector<1024x128xf32>
    %cst = arith.constant 0.000000e+00 : f32
    %8 = vector.broadcast %cst : f32 to vector<1024x128xf32>
    %9 = arith.maximumf %7, %8 : vector<1024x128xf32>
    %10 = arith.truncf %9 : vector<1024x128xf32> to vector<1024x128xbf16>
    %c0_4 = arith.constant 0 : index
    %c0_5 = arith.constant 0 : index
    %11 = vector.load %arg4[%c0_4, %c0_5] : memref<1024x128xbf16, #tpu.memory_space<vmem>>, vector<1024x128xbf16>
    tpu.vector_store %arg4[%c0_4, %c0_5], %10 {strides = array<i32>} : memref<1024x128xbf16, #tpu.memory_space<vmem>>, vector<1024x128xbf16>,
    %12 = vector.extract_strided_slice %9 {offsets = [0, 0], sizes = [1024, 8], strides = [1, 1]} : vector<1024x128xf32> to vector<1024x8xf32>
    %c0_6 = arith.constant 0 : index
    %c0_7 = arith.constant 0 : index
    %13 = vector.load %arg2[%c0_6, %c0_7] : memref<1024x8xbf16, #tpu.memory_space<vmem>>, vector<1024x8xbf16>
    %14 = arith.extf %13 : vector<1024x8xbf16> to vector<1024x8xf32>
    %15 = arith.addf %12, %14 : vector<1024x8xf32>
    %16 = arith.truncf %15 : vector<1024x8xf32> to vector<1024x8xbf16>
    %c0_8 = arith.constant 0 : index
    %c0_9 = arith.constant 0 : index
    %17 = vector.load %arg4[%c0_8, %c0_9] : memref<1024x128xbf16, #tpu.memory_space<vmem>>, vector<1024x8xbf16>
    tpu.vector_store %arg4[%c0_8, %c0_9], %16 {strides = array<i32>} : memref<1024x128xbf16, #tpu.memory_space<vmem>>, vector<1024x8xbf16>,
    return
  }
  func.func @transform_0(%arg0: i32) -> (i32, i32) {
    %c0_i32 = arith.constant 0 : i32
    %c0_i32_0 = arith.constant 0 : i32
    return %arg0, %c0_i32 : i32, i32
  }
  func.func @transform_1(%arg0: i32) -> (i32, i32) {
    %c0_i32 = arith.constant 0 : i32
    %c0_i32_0 = arith.constant 0 : i32
    return %arg0, %c0_i32 : i32, i32
  }
  func.func @transform_2(%arg0: i32) -> (i32, i32) {
    %c0_i32 = arith.constant 0 : i32
    %c0_i32_0 = arith.constant 0 : i32
    %c0_i32_1 = arith.constant 0 : i32
    return %c0_i32, %c0_i32_0 : i32, i32
  }
  func.func @transform_3(%arg0: i32) -> (i32, i32) {
    %c0_i32 = arith.constant 0 : i32
    %c0_i32_0 = arith.constant 0 : i32
    return %arg0, %c0_i32 : i32, i32
  }
}

module attributes {stable_mosaic.version = 11 : i64} {
  func.func @bn_relu_kernel(%arg0: i32, %arg1: memref<1024x128xbf16, #tpu.memory_space<vmem>>, %arg2: memref<8x128xf32, #tpu.memory_space<vmem>>, %arg3: memref<1024x128xbf16, #tpu.memory_space<vmem>>) attributes {dimension_semantics = [#tpu.dimension_semantics<parallel>], iteration_bounds = array<i64: 2>, scalar_prefetch = 0 : i64, scratch_operands = 0 : i64, tpu.core_type = #tpu.core_type<tc>, window_params = [{transform_indices = @transform_0, window_bounds = array<i64: 1024, 128>}, {pipeline_mode = #tpu.pipeline_mode<synchronous>, transform_indices = @transform_1, window_bounds = array<i64: 8, 128>}, {transform_indices = @transform_2, window_bounds = array<i64: 1024, 128>}]} {
    %c0 = arith.constant 0 : index
    %c0_0 = arith.constant 0 : index
    %0 = vector.load %arg2[%c0, %c0_0] : memref<8x128xf32, #tpu.memory_space<vmem>>, vector<1x128xf32>
    %c1 = arith.constant 1 : index
    %c0_1 = arith.constant 0 : index
    %1 = vector.load %arg2[%c1, %c0_1] : memref<8x128xf32, #tpu.memory_space<vmem>>, vector<1x128xf32>
    %c0_2 = arith.constant 0 : index
    %c0_3 = arith.constant 0 : index
    %2 = vector.load %arg1[%c0_2, %c0_3] : memref<1024x128xbf16, #tpu.memory_space<vmem>>, vector<1024x128xbf16>
    %3 = arith.extf %2 : vector<1024x128xbf16> to vector<1024x128xf32>
    %4 = vector.broadcast %0 : vector<1x128xf32> to vector<1024x128xf32>
    %5 = arith.mulf %3, %4 : vector<1024x128xf32>
    %6 = vector.broadcast %1 : vector<1x128xf32> to vector<1024x128xf32>
    %7 = arith.addf %5, %6 : vector<1024x128xf32>
    %cst = arith.constant 0.000000e+00 : f32
    %8 = vector.broadcast %cst : f32 to vector<1024x128xf32>
    %9 = arith.maximumf %7, %8 : vector<1024x128xf32>
    %10 = arith.truncf %9 : vector<1024x128xf32> to vector<1024x128xbf16>
    %c0_4 = arith.constant 0 : index
    %c0_5 = arith.constant 0 : index
    %11 = vector.load %arg3[%c0_4, %c0_5] : memref<1024x128xbf16, #tpu.memory_space<vmem>>, vector<1024x128xbf16>
    tpu.vector_store %arg3[%c0_4, %c0_5], %10 {strides = array<i32>} : memref<1024x128xbf16, #tpu.memory_space<vmem>>, vector<1024x128xbf16>,
    return
  }
  func.func @transform_0(%arg0: i32) -> (i32, i32) {
    %c0_i32 = arith.constant 0 : i32
    %c0_i32_0 = arith.constant 0 : i32
    return %arg0, %c0_i32 : i32, i32
  }
  func.func @transform_1(%arg0: i32) -> (i32, i32) {
    %c0_i32 = arith.constant 0 : i32
    %c0_i32_0 = arith.constant 0 : i32
    %c0_i32_1 = arith.constant 0 : i32
    return %c0_i32, %c0_i32_0 : i32, i32
  }
  func.func @transform_2(%arg0: i32) -> (i32, i32) {
    %c0_i32 = arith.constant 0 : i32
    %c0_i32_0 = arith.constant 0 : i32
    return %arg0, %c0_i32 : i32, i32
  }
}

module attributes {stable_mosaic.version = 11 : i64} {
  func.func @bn_relu_kernel(%arg0: i32, %arg1: memref<1024x128xbf16, #tpu.memory_space<vmem>>, %arg2: memref<8x128xf32, #tpu.memory_space<vmem>>, %arg3: memref<1024x128xf32, #tpu.memory_space<vmem>>) attributes {dimension_semantics = [#tpu.dimension_semantics<parallel>], iteration_bounds = array<i64: 2>, scalar_prefetch = 0 : i64, scratch_operands = 0 : i64, tpu.core_type = #tpu.core_type<tc>, window_params = [{transform_indices = @transform_0, window_bounds = array<i64: 1024, 128>}, {pipeline_mode = #tpu.pipeline_mode<synchronous>, transform_indices = @transform_1, window_bounds = array<i64: 8, 128>}, {transform_indices = @transform_2, window_bounds = array<i64: 1024, 128>}]} {
    %c0 = arith.constant 0 : index
    %c0_0 = arith.constant 0 : index
    %0 = vector.load %arg2[%c0, %c0_0] : memref<8x128xf32, #tpu.memory_space<vmem>>, vector<1x128xf32>
    %c1 = arith.constant 1 : index
    %c0_1 = arith.constant 0 : index
    %1 = vector.load %arg2[%c1, %c0_1] : memref<8x128xf32, #tpu.memory_space<vmem>>, vector<1x128xf32>
    %c0_2 = arith.constant 0 : index
    %c0_3 = arith.constant 0 : index
    %2 = vector.load %arg1[%c0_2, %c0_3] : memref<1024x128xbf16, #tpu.memory_space<vmem>>, vector<1024x128xbf16>
    %3 = arith.extf %2 : vector<1024x128xbf16> to vector<1024x128xf32>
    %4 = vector.broadcast %0 : vector<1x128xf32> to vector<1024x128xf32>
    %5 = arith.mulf %3, %4 : vector<1024x128xf32>
    %6 = vector.broadcast %1 : vector<1x128xf32> to vector<1024x128xf32>
    %7 = arith.addf %5, %6 : vector<1024x128xf32>
    %cst = arith.constant 0.000000e+00 : f32
    %8 = vector.broadcast %cst : f32 to vector<1024x128xf32>
    %9 = arith.maximumf %7, %8 : vector<1024x128xf32>
    %c0_4 = arith.constant 0 : index
    %c0_5 = arith.constant 0 : index
    %10 = vector.load %arg3[%c0_4, %c0_5] : memref<1024x128xf32, #tpu.memory_space<vmem>>, vector<1024x128xf32>
    tpu.vector_store %arg3[%c0_4, %c0_5], %9 {strides = array<i32>} : memref<1024x128xf32, #tpu.memory_space<vmem>>, vector<1024x128xf32>,
    return
  }
  func.func @transform_0(%arg0: i32) -> (i32, i32) {
    %c0_i32 = arith.constant 0 : i32
    %c0_i32_0 = arith.constant 0 : i32
    return %arg0, %c0_i32 : i32, i32
  }
  func.func @transform_1(%arg0: i32) -> (i32, i32) {
    %c0_i32 = arith.constant 0 : i32
    %c0_i32_0 = arith.constant 0 : i32
    %c0_i32_1 = arith.constant 0 : i32
    return %c0_i32, %c0_i32_0 : i32, i32
  }
  func.func @transform_2(%arg0: i32) -> (i32, i32) {
    %c0_i32 = arith.constant 0 : i32
    %c0_i32_0 = arith.constant 0 : i32
    return %arg0, %c0_i32 : i32, i32
  }
}

</mosaic_0001>

<bundles_post_ra>
// kernel: decoder_block_forward.6
= control target key start
LH: loop header
LB: loop body
LE: loop exit
PB: predicated region body
PF: predicated region fallthrough
CT: control target
= control target key end

     0   :  { %s3549_s15 = smov 0   ;;  %s4124_s0 = inlined_call_operand.vmem [shape: bf16[2048,128], index: 0, kind: input, shape index: {}]   ;;  %s4125_s1 = inlined_call_operand.vmem [shape: bf16[128,128], index: 1, kind: input, shape index: {}]   ;;  %s4126_s2 = inlined_call_operand.vmem [shape: bf16[2048,128], index: 2, kind: output, shape index: {0}]   ;;  %s4127_s3 = inlined_call_operand.vmem [shape: f32[2,1,128], index: 3, kind: output, shape index: {1}]   ;;  %s4128_s4 = inlined_call_operand.vmem [shape: f32[2,1,128], index: 4, kind: output, shape index: {2}]  }
   0x1 LB: > { %s3555_s16 = sadd.s32 4294967295, %s3522_s15   ;;  %p2486_p0 = scmp.ge.s32.totalorder %s3522_s15, 1  ;;  %s3522_s15 = sphi %s3549_s15, %s15_s15  }
   0x2   : > { %p168_p1 = scmp.lt.s32.totalorder %s3522_s15, 3 }
   0x4   : > { %p169_p2 = pnand %p2486_p0, %p168_p1 }
   0x6   : > { %172 = sbr.rel (%p169_p2) target bundleno = 512 (0x200), region = 28 }
   0xb   : > { %v3444_v0 = vld [vmem:[%s4125_s1 + $0x38] sm:$0xff]   ;;  %s2487_s19 = sshll.u32 %s3555_s16, 7  ;;  %v3445_v1 = vld [vmem:[%s4125_s1 + $0x30] sm:$0xff]   ;;  %v3446_v2 = vld [vmem:[%s4125_s1 + $0x28] sm:$0xff]   ;;  %p212_p4 = scmp.lt.s32.totalorder %s3555_s16, 1 }
   0xc   : > { %p201_p3 = scmp.lt.s32.totalorder %s2487_s19, 255  ;;  %3276 = vmatprep.subr.bf16.mxu0 %v3444_v0  ;;  %3420 = vmatprep.subr.bf16.mxu1 %v3444_v0  ;;  %v3447_v3 = vld [vmem:[%s4125_s1 + $0x20] sm:$0xff]   ;;  %v3448_v5 = vld [vmem:[%s4125_s1 + $0x18] sm:$0xff]   ;;  %v3449_v6 = vld [vmem:[%s4125_s1 + $0x10] sm:$0xff]  }
   0xd   : > { %3277 = vmatpush3.bf16.msra.mxu0 %v3444_v0  ;;  %3428 = vmatpush3.bf16.msra.mxu1 %v3444_v0  ;;  %v3450_v7 = vld [vmem:[%s4125_s1 + $0x8] sm:$0xff]   ;;  %v3451_v8 = vld [vmem:[%s4125_s1] sm:$0xff]   ;;  %s4192_s16 = smov (!%p212_p4, %s3555_s16), 1 }
   0xe   : > { %s4190_s19 = smov (!%p201_p3, %s2487_s19), 255  ;;  %3278 = vmatprep.subr.bf16.mxu0 %v3445_v1  ;;  %3421 = vmatprep.subr.bf16.mxu1 %v3445_v1  ;;  %s217_s22 = scalar_lea.vmem %s4128_s4, %s4192_s16 }
   0xf   : > { %s2488_s24 = sshll.u32 %s4190_s19, 2  ;;  %s214_s19 = scalar_lea.vmem %s4127_s3, %s4192_s16 }
  0x10   : > { %s3577_s27 = scalar_lea.vmem %s4124_s0, %s2488_s24  ;;  %s3663_s14 = scalar_lea.vmem %s4126_s2, %s2488_s24 }
  0x11   : > { %3279 = vmatpush3.bf16.msra.mxu0 %v3445_v1  ;;  %3429 = vmatpush3.bf16.msra.mxu1 %v3445_v1  ;;  %v3452_v4 = vld [vmem:[%s3577_s27] sm:$0xff]   ;;  %v3453_v9 = vld [vmem:[%s3577_s27 + $0x8] sm:$0xff]   ;;  %v3454_v10 = vld [vmem:[%s3577_s27 + $0x10] sm:$0xff]  }
  0x12   : > { %3280 = vmatprep.subr.bf16.mxu0 %v3446_v2  ;;  %3422 = vmatprep.subr.bf16.mxu1 %v3446_v2  ;;  %v3455_v11 = vld [vmem:[%s3577_s27 + $0x18] sm:$0xff]   ;;  %v3456_v12 = vld [vmem:[%s3577_s27 + $0x20] sm:$0xff]   ;;  %v3485_v14 = vld [vmem:[%s3577_s27 + $0x108] sm:$0xff]  }
  0x13   : > { %3292 = vmatprep.mubr.bf16.mxu0 %v3452_v4  ;;  %v3484_v13 = vld [vmem:[%s3577_s27 + $0x100] sm:$0xff]   ;;  %v3486_v15 = vld [vmem:[%s3577_s27 + $0x110] sm:$0xff]   ;;  %v3457_v16 = vld [vmem:[%s3577_s27 + $0x28] sm:$0xff]  }
  0x14   : > { %3356 = vmatprep.mubr.bf16.mxu1 %v3484_v13  ;;  %v3458_v17 = vld [vmem:[%s3577_s27 + $0x30] sm:$0xff]   ;;  %v3487_v18 = vld [vmem:[%s3577_s27 + $0x118] sm:$0xff]   ;;  %v3488_v19 = vld [vmem:[%s3577_s27 + $0x120] sm:$0xff]  }
  0x15   : > { %3281 = vmatpush3.bf16.msra.mxu0 %v3446_v2  ;;  %3430 = vmatpush3.bf16.msra.mxu1 %v3446_v2  ;;  %v3459_v20 = vld [vmem:[%s3577_s27 + $0x38] sm:$0xff]   ;;  %v3460_v21 = vld [vmem:[%s3577_s27 + $0x40] sm:$0xff]   ;;  %v3489_v22 = vld [vmem:[%s3577_s27 + $0x128] sm:$0xff]  }
  0x16   : > { %3282 = vmatprep.subr.bf16.mxu0 %v3447_v3  ;;  %3423 = vmatprep.subr.bf16.mxu1 %v3447_v3  ;;  %v3490_v23 = vld [vmem:[%s3577_s27 + $0x130] sm:$0xff]   ;;  %v3461_v24 = vld [vmem:[%s3577_s27 + $0x48] sm:$0xff]   ;;  %v3491_v26 = vld [vmem:[%s3577_s27 + $0x138] sm:$0xff]  }
  0x17   : > { %v3462_v25 = vld [vmem:[%s3577_s27 + $0x50] sm:$0xff]   ;;  %v3492_v27 = vld [vmem:[%s3577_s27 + $0x140] sm:$0xff]   ;;  %v3463_v28 = vld [vmem:[%s3577_s27 + $0x58] sm:$0xff]  }
  0x18   : > { %v3464_v29 = vld [vmem:[%s3577_s27 + $0x60] sm:$0xff]   ;;  %v3493_v30 = vld [vmem:[%s3577_s27 + $0x148] sm:$0xff]   ;;  %v3494_v31 = vld [vmem:[%s3577_s27 + $0x150] sm:$0xff]  }
  0x19   : > { %3283 = vmatpush3.bf16.msra.mxu0 %v3447_v3  ;;  %3431 = vmatpush3.bf16.msra.mxu1 %v3447_v3  ;;  %v3465_v32 = vld [vmem:[%s3577_s27 + $0x68] sm:$0xff]   ;;  %v3466_v33 = vld [vmem:[%s3577_s27 + $0x70] sm:$0xff]   ;;  %v3495_v34 = vld [vmem:[%s3577_s27 + $0x158] sm:$0xff]  }
  0x1a   : > { %3284 = vmatprep.subr.bf16.mxu0 %v3448_v5  ;;  %3424 = vmatprep.subr.bf16.mxu1 %v3448_v5  ;;  %v3496_v35 = vld [vmem:[%s3577_s27 + $0x160] sm:$0xff]   ;;  %v3467_v36 = vld [vmem:[%s3577_s27 + $0x78] sm:$0xff]   ;;  %v3497_v38 = vld [vmem:[%s3577_s27 + $0x168] sm:$0xff]  }
  0x1b   : > { %v3468_v37 = vld [vmem:[%s3577_s27 + $0x80] sm:$0xff]   ;;  %v3498_v39 = vld [vmem:[%s3577_s27 + $0x170] sm:$0xff]   ;;  %v3469_v40 = vld [vmem:[%s3577_s27 + $0x88] sm:$0xff]  }
  0x1c   : > { %v3470_v41 = vld [vmem:[%s3577_s27 + $0x90] sm:$0xff]   ;;  %v3499_v42 = vld [vmem:[%s3577_s27 + $0x178] sm:$0xff]   ;;  %v3500_v43 = vld [vmem:[%s3577_s27 + $0x180] sm:$0xff]  }
  0x1d   : > { %3285 = vmatpush3.bf16.msra.mxu0 %v3448_v5  ;;  %3432 = vmatpush3.bf16.msra.mxu1 %v3448_v5  ;;  %v3471_v44 = vld [vmem:[%s3577_s27 + $0x98] sm:$0xff]   ;;  %v3472_v45 = vld [vmem:[%s3577_s27 + $0xa0] sm:$0xff]   ;;  %v3501_v46 = vld [vmem:[%s3577_s27 + $0x188] sm:$0xff]  }
  0x1e   : > { %3286 = vmatprep.subr.bf16.mxu0 %v3449_v6  ;;  %3425 = vmatprep.subr.bf16.mxu1 %v3449_v6  ;;  %v3502_v47 = vld [vmem:[%s3577_s27 + $0x190] sm:$0xff]   ;;  %v3473_v48 = vld [vmem:[%s3577_s27 + $0xa8] sm:$0xff]   ;;  %v3503_v50 = vld [vmem:[%s3577_s27 + $0x198] sm:$0xff]  }
  0x1f   : > { %v3474_v49 = vld [vmem:[%s3577_s27 + $0xb0] sm:$0xff]   ;;  %v3504_v51 = vld [vmem:[%s3577_s27 + $0x1a0] sm:$0xff]   ;;  %v3475_v52 = vld [vmem:[%s3577_s27 + $0xb8] sm:$0xff]  }
  0x20   : > { %v3476_v53 = vld [vmem:[%s3577_s27 + $0xc0] sm:$0xff]   ;;  %v3505_v54 = vld [vmem:[%s3577_s27 + $0x1a8] sm:$0xff]   ;;  %v3506_v55 = vld [vmem:[%s3577_s27 + $0x1b0] sm:$0xff]  }
  0x21   : > { %3287 = vmatpush3.bf16.msra.mxu0 %v3449_v6  ;;  %3433 = vmatpush3.bf16.msra.mxu1 %v3449_v6  ;;  %v3477_v56 = vld [vmem:[%s3577_s27 + $0xc8] sm:$0xff]   ;;  %v3478_v57 = vld [vmem:[%s3577_s27 + $0xd0] sm:$0xff]   ;;  %v3507_v58 = vld [vmem:[%s3577_s27 + $0x1b8] sm:$0xff]  }
  0x22   : > { %3288 = vmatprep.subr.bf16.mxu0 %v3450_v7  ;;  %3426 = vmatprep.subr.bf16.mxu1 %v3450_v7  ;;  %v3508_v59 = vld [vmem:[%s3577_s27 + $0x1c0] sm:$0xff]   ;;  %v3479_v60 = vld [vmem:[%s3577_s27 + $0xd8] sm:$0xff]   ;;  %v3509_v62 = vld [vmem:[%s3577_s27 + $0x1c8] sm:$0xff]  }
  0x23   : > { %v3480_v61 = vld [vmem:[%s3577_s27 + $0xe0] sm:$0xff]   ;;  %v3510_v63 = vld [vmem:[%s3577_s27 + $0x1d0] sm:$0xff]   ;;  %v3481_v0 = vld [vmem:[%s3577_s27 + $0xe8] sm:$0xff]  }
  0x24   : > { %v3482_v1 = vld [vmem:[%s3577_s27 + $0xf0] sm:$0xff]   ;;  %v3511_v2 = vld [vmem:[%s3577_s27 + $0x1d8] sm:$0xff]   ;;  %v3512_v3 = vld [vmem:[%s3577_s27 + $0x1e0] sm:$0xff]  }
  0x25   : > { %3289 = vmatpush3.bf16.msra.mxu0 %v3450_v7  ;;  %3434 = vmatpush3.bf16.msra.mxu1 %v3450_v7  ;;  %v3483_v4 = vld [vmem:[%s3577_s27 + $0xf8] sm:$0xff]   ;;  %v3513_v5 = vld [vmem:[%s3577_s27 + $0x1e8] sm:$0xff]   ;;  %v3514_v6 = vld [vmem:[%s3577_s27 + $0x1f0] sm:$0xff]  }
  0x26   : > { %3290 = vmatprep.subr.bf16.mxu0 %v3451_v8  ;;  %3427 = vmatprep.subr.bf16.mxu1 %v3451_v8  ;;  %v3515_v7 = vld [vmem:[%s3577_s27 + $0x1f8] sm:$0xff]  }
  0x29   : > { %3291 = vmatpush3.bf16.msra.mxu0 %v3451_v8  ;;  %3435 = vmatpush3.bf16.msra.mxu1 %v3451_v8 }
  0x2c   : > { %3293 = vmatmul.mubr.bf16.vlgmr.msra.gmra.mxu0 %v3453_v9  ;;  %3357 = vmatmul.mubr.bf16.vlgmr.msra.gmra.mxu1 %v3485_v14 }
  0x2d   : > { %3296 = vmatprep.mubr.bf16.mxu0 %v3454_v10  ;;  %3360 = vmatprep.mubr.bf16.mxu1 %v3486_v15 }
  0x34   : > { %3297 = vmatmul.mubr.bf16.gmra.mxu0 %v3455_v11  ;;  %3361 = vmatmul.mubr.bf16.gmra.mxu1 %v3487_v18 }
  0x35   : > { %3300 = vmatprep.mubr.bf16.mxu0 %v3456_v12  ;;  %3364 = vmatprep.mubr.bf16.mxu1 %v3488_v19 }
  0x3c   : > { %3301 = vmatmul.mubr.bf16.gmra.mxu0 %v3457_v16  ;;  %3365 = vmatmul.mubr.bf16.gmra.mxu1 %v3489_v22 }
  0x3d   : > { %3304 = vmatprep.mubr.bf16.mxu0 %v3458_v17  ;;  %3368 = vmatprep.mubr.bf16.mxu1 %v3490_v23 }
  0x44   : > { %3305 = vmatmul.mubr.bf16.gmra.mxu0 %v3459_v20  ;;  %3369 = vmatmul.mubr.bf16.gmra.mxu1 %v3491_v26 }
  0x45   : > { %3308 = vmatprep.mubr.bf16.mxu0 %v3460_v21  ;;  %3372 = vmatprep.mubr.bf16.mxu1 %v3492_v27 }
  0x4c   : > { %3309 = vmatmul.mubr.bf16.gmra.mxu0 %v3461_v24  ;;  %3373 = vmatmul.mubr.bf16.gmra.mxu1 %v3493_v30 }
  0x4d   : > { %3312 = vmatprep.mubr.bf16.mxu0 %v3462_v25  ;;  %3376 = vmatprep.mubr.bf16.mxu1 %v3494_v31 }
  0x54   : > { %3313 = vmatmul.mubr.bf16.gmra.mxu0 %v3463_v28  ;;  %3377 = vmatmul.mubr.bf16.gmra.mxu1 %v3495_v34 }
  0x55   : > { %3316 = vmatprep.mubr.bf16.mxu0 %v3464_v29  ;;  %3380 = vmatprep.mubr.bf16.mxu1 %v3496_v35 }
  0x5c   : > { %3317 = vmatmul.mubr.bf16.gmra.mxu0 %v3465_v32  ;;  %3381 = vmatmul.mubr.bf16.gmra.mxu1 %v3497_v38 }
  0x5d   : > { %3320 = vmatprep.mubr.bf16.mxu0 %v3466_v33  ;;  %3384 = vmatprep.mubr.bf16.mxu1 %v3498_v39 }
  0x64   : > { %3321 = vmatmul.mubr.bf16.gmra.mxu0 %v3467_v36  ;;  %3385 = vmatmul.mubr.bf16.gmra.mxu1 %v3499_v42 }
  0x65   : > { %3324 = vmatprep.mubr.bf16.mxu0 %v3468_v37  ;;  %3388 = vmatprep.mubr.bf16.mxu1 %v3500_v43 }
  0x6c   : > { %3325 = vmatmul.mubr.bf16.gmra.mxu0 %v3469_v40  ;;  %3389 = vmatmul.mubr.bf16.gmra.mxu1 %v3501_v46 }
  0x6d   : > { %3328 = vmatprep.mubr.bf16.mxu0 %v3470_v41  ;;  %3392 = vmatprep.mubr.bf16.mxu1 %v3502_v47 }
  0x74   : > { %3329 = vmatmul.mubr.bf16.gmra.mxu0 %v3471_v44  ;;  %3393 = vmatmul.mubr.bf16.gmra.mxu1 %v3503_v50 }
  0x75   : > { %3332 = vmatprep.mubr.bf16.mxu0 %v3472_v45  ;;  %3396 = vmatprep.mubr.bf16.mxu1 %v3504_v51 }
  0x7c   : > { %3333 = vmatmul.mubr.bf16.gmra.mxu0 %v3473_v48  ;;  %3397 = vmatmul.mubr.bf16.gmra.mxu1 %v3505_v54 }
  0x7d   : > { %3336 = vmatprep.mubr.bf16.mxu0 %v3474_v49  ;;  %3400 = vmatprep.mubr.bf16.mxu1 %v3506_v55 }
  0x84   : > { %3337 = vmatmul.mubr.bf16.gmra.mxu0 %v3475_v52  ;;  %3401 = vmatmul.mubr.bf16.gmra.mxu1 %v3507_v58 }
  0x85   : > { %3340 = vmatprep.mubr.bf16.mxu0 %v3476_v53  ;;  %3404 = vmatprep.mubr.bf16.mxu1 %v3508_v59 }
  0x8c   : > { %3341 = vmatmul.mubr.bf16.gmra.mxu0 %v3477_v56  ;;  %3405 = vmatmul.mubr.bf16.gmra.mxu1 %v3509_v62 }
  0x8d   : > { %3344 = vmatprep.mubr.bf16.mxu0 %v3478_v57  ;;  %3408 = vmatprep.mubr.bf16.mxu1 %v3510_v63 }
  0x94   : > { %3345 = vmatmul.mubr.bf16.gmra.mxu0 %v3479_v60  ;;  %3409 = vmatmul.mubr.bf16.gmra.mxu1 %v3511_v2 }
  0x95   : > { %3348 = vmatprep.mubr.bf16.mxu0 %v3480_v61  ;;  %3412 = vmatprep.mubr.bf16.mxu1 %v3512_v3 }
  0x9c   : > { %3349 = vmatmul.mubr.bf16.gmra.mxu0 %v3481_v0  ;;  %3413 = vmatmul.mubr.bf16.gmra.mxu1 %v3513_v5 }
  0x9d   : > { %3352 = vmatprep.mubr.bf16.mxu0 %v3482_v1  ;;  %3416 = vmatprep.mubr.bf16.mxu1 %v3514_v6 }
  0xa4   : > { %3353 = vmatmul.mubr.bf16.gmra.mxu0 %v3483_v4  ;;  %3417 = vmatmul.mubr.bf16.gmra.mxu1 %v3515_v7 }
  0xec   : > { %v3294_v8 = vpop.f32.mrf.mxu0  ;;  %v3667_v21 = vpop.f32.mrf.mxu1 }
  0xed   : > { %v2116_v18 = vmul.f32 %v3294_v8, %v3294_v8 }
  0xee   : > { %v829_v9 = vpop.f32.mrf.mxu0  ;;  %v3669_v26 = vpop.f32.mrf.mxu1 }
  0xef   : > { %v2114_v13 = vmul.f32 %v829_v9, %v829_v9 }
  0xf0   : > { %v3295_v10 = vpop.f32.mrf.mxu0  ;;  %v3671_v32 = vpop.f32.mrf.mxu1 }
  0xf1   : > { %v2829_v11 = vpack.c.bf16 %v3295_v10, %v3294_v8  ;;  %v2117_v23 = vmul.f32 %v3295_v10, %v3295_v10  ;;  %v2989_v34 = vpack.c.bf16 %v3671_v32, %v3667_v21 }
  0xf2   : > { %v832_v12 = vpop.f32.mrf.mxu0  ;;  %v3676_v39 = vpop.f32.mrf.mxu1 }
  0xf3   : > { %3141 = vst [vmem:[%s3663_s14 + $0x8] sm:$0xff] %v2829_v11   ;;  %v2824_v14 = vpack.c.bf16 %v832_v12, %v829_v9  ;;  %v1980_v15 = vadd.f32 %v832_v12, %v829_v9  ;;  %v2115_v16 = vmul.f32 %v832_v12, %v832_v12  ;;  %3173 = vst [vmem:[%s3663_s14 + $0x108] sm:$0xff] %v2989_v34  }
  0xf4   : > { %v3298_v17 = vpop.f32.mrf.mxu0  ;;  %v2984_v41 = vpack.c.bf16 %v3676_v39, %v3669_v26  ;;  %v3682_v45 = vpop.f32.mrf.mxu1 }
  0xf5   : > { %2825 = vst [vmem:[%s3663_s14] sm:$0xff] %v2824_v14   ;;  %v1981_v19 = vadd.f32 %v3294_v8, %v1980_v15  ;;  %v2242_v20 = vadd.f32 %v2115_v16, %v2114_v13  ;;  %v2120_v42 = vmul.f32 %v3298_v17, %v3298_v17 }
  0xf6   : > { %v845_v22 = vpop.f32.mrf.mxu0  ;;  %3172 = vst [vmem:[%s3663_s14 + $0x100] sm:$0xff] %v2984_v41   ;;  %v3685_v50 = vpop.f32.mrf.mxu1 }
  0xf7   : > { %v2243_v24 = vadd.f32 %v2242_v20, %v2116_v18  ;;  %v1982_v25 = vadd.f32 %v3295_v10, %v1981_v19  ;;  %v2118_v29 = vmul.f32 %v845_v22, %v845_v22 }
  0xf8   : > { %v3299_v27 = vpop.f32.mrf.mxu0  ;;  %v3687_v56 = vpop.f32.mrf.mxu1 }
  0xf9   : > { %v1983_v28 = vadd.f32 %v1982_v25, %v845_v22  ;;  %v2244_v30 = vadd.f32 %v2243_v24, %v2117_v23  ;;  %v2839_v31 = vpack.c.bf16 %v3299_v27, %v3298_v17  ;;  %v2121_v47 = vmul.f32 %v3299_v27, %v3299_v27 }
  0xfa   : > { %v848_v33 = vpop.f32.mrf.mxu0  ;;  %v2999_v58 = vpack.c.bf16 %v3687_v56, %v3682_v45  ;;  %v3692_v63 = vpop.f32.mrf.mxu1 }
  0xfb   : > { %v2245_v35 = vadd.f32 %v2244_v30, %v2118_v29  ;;  %3143 = vst [vmem:[%s3663_s14 + $0x18] sm:$0xff] %v2839_v31   ;;  %v2834_v36 = vpack.c.bf16 %v848_v33, %v845_v22  ;;  %v1984_v37 = vadd.f32 %v1983_v28, %v848_v33  ;;  %v2119_v38 = vmul.f32 %v848_v33, %v848_v33 }
  0xfc   : > { %v3302_v40 = vpop.f32.mrf.mxu0  ;;  %3175 = vst [vmem:[%s3663_s14 + $0x118] sm:$0xff] %v2999_v58   ;;  %v2994_v1 = vpack.c.bf16 %v3692_v63, %v3685_v50  ;;  %v3698_v5 = vpop.f32.mrf.mxu1 }
  0xfd   : > { %3142 = vst [vmem:[%s3663_s14 + $0x10] sm:$0xff] %v2834_v36   ;;  %v1985_v43 = vadd.f32 %v3298_v17, %v1984_v37  ;;  %v2246_v44 = vadd.f32 %v2245_v35, %v2119_v38  ;;  %v2124_v2 = vmul.f32 %v3302_v40, %v3302_v40 }
  0xfe   : > { %v861_v46 = vpop.f32.mrf.mxu0  ;;  %3174 = vst [vmem:[%s3663_s14 + $0x110] sm:$0xff] %v2994_v1   ;;  %v3701_v10 = vpop.f32.mrf.mxu1 }
  0xff   : > { %v2247_v48 = vadd.f32 %v2246_v44, %v2120_v42  ;;  %v1986_v49 = vadd.f32 %v3299_v27, %v1985_v43  ;;  %v2122_v53 = vmul.f32 %v861_v46, %v861_v46 }
 0x100   : > { %v3303_v51 = vpop.f32.mrf.mxu0  ;;  %v3703_v16 = vpop.f32.mrf.mxu1 }
 0x101   : > { %v1987_v52 = vadd.f32 %v1986_v49, %v861_v46  ;;  %v2248_v54 = vadd.f32 %v2247_v48, %v2121_v47  ;;  %v2849_v55 = vpack.c.bf16 %v3303_v51, %v3302_v40  ;;  %v2125_v7 = vmul.f32 %v3303_v51, %v3303_v51 }
 0x102   : > { %v864_v57 = vpop.f32.mrf.mxu0  ;;  %v3009_v18 = vpack.c.bf16 %v3703_v16, %v3698_v5  ;;  %v3708_v24 = vpop.f32.mrf.mxu1 }
 0x103   : > { %v2249_v59 = vadd.f32 %v2248_v54, %v2122_v53  ;;  %3145 = vst [vmem:[%s3663_s14 + $0x28] sm:$0xff] %v2849_v55   ;;  %v2844_v60 = vpack.c.bf16 %v864_v57, %v861_v46  ;;  %v1988_v61 = vadd.f32 %v1987_v52, %v864_v57  ;;  %v2123_v62 = vmul.f32 %v864_v57, %v864_v57 }
 0x104   : > { %v3306_v0 = vpop.f32.mrf.mxu0  ;;  %3177 = vst [vmem:[%s3663_s14 + $0x128] sm:$0xff] %v3009_v18   ;;  %v3004_v27 = vpack.c.bf16 %v3708_v24, %v3701_v10  ;;  %v3714_v31 = vpop.f32.mrf.mxu1 }
 0x105   : > { %3144 = vst [vmem:[%s3663_s14 + $0x20] sm:$0xff] %v2844_v60   ;;  %v1989_v3 = vadd.f32 %v3302_v40, %v1988_v61  ;;  %v2250_v4 = vadd.f32 %v2249_v59, %v2123_v62  ;;  %v2128_v28 = vmul.f32 %v3306_v0, %v3306_v0 }
 0x106   : > { %v877_v6 = vpop.f32.mrf.mxu0  ;;  %3176 = vst [vmem:[%s3663_s14 + $0x120] sm:$0xff] %v3004_v27   ;;  %v3717_v37 = vpop.f32.mrf.mxu1 }
 0x107   : > { %v2251_v8 = vadd.f32 %v2250_v4, %v2124_v2  ;;  %v1990_v9 = vadd.f32 %v3303_v51, %v1989_v3  ;;  %v2126_v13 = vmul.f32 %v877_v6, %v877_v6 }
 0x108   : > { %v3307_v11 = vpop.f32.mrf.mxu0  ;;  %v3719_v44 = vpop.f32.mrf.mxu1 }
 0x109   : > { %v1991_v12 = vadd.f32 %v1990_v9, %v877_v6  ;;  %v2252_v14 = vadd.f32 %v2251_v8, %v2125_v7  ;;  %v2859_v15 = vpack.c.bf16 %v3307_v11, %v3306_v0  ;;  %v2129_v34 = vmul.f32 %v3307_v11, %v3307_v11 }
 0x10a   : > { %v880_v17 = vpop.f32.mrf.mxu0  ;;  %v3019_v47 = vpack.c.bf16 %v3719_v44, %v3714_v31  ;;  %v3724_v53 = vpop.f32.mrf.mxu1 }
 0x10b   : > { %v2253_v19 = vadd.f32 %v2252_v14, %v2126_v13  ;;  %3147 = vst [vmem:[%s3663_s14 + $0x38] sm:$0xff] %v2859_v15   ;;  %v2854_v20 = vpack.c.bf16 %v880_v17, %v877_v6  ;;  %v1992_v22 = vadd.f32 %v1991_v12, %v880_v17  ;;  %v2127_v23 = vmul.f32 %v880_v17, %v880_v17 }
 0x10c   : > { %v3310_v25 = vpop.f32.mrf.mxu0  ;;  %3179 = vst [vmem:[%s3663_s14 + $0x138] sm:$0xff] %v3019_v47   ;;  %v3014_v55 = vpack.c.bf16 %v3724_v53, %v3717_v37  ;;  %v3730_v60 = vpop.f32.mrf.mxu1 }
 0x10d   : > { %3146 = vst [vmem:[%s3663_s14 + $0x30] sm:$0xff] %v2854_v20   ;;  %v1993_v29 = vadd.f32 %v3306_v0, %v1992_v22  ;;  %v2254_v30 = vadd.f32 %v2253_v19, %v2127_v23  ;;  %v2132_v57 = vmul.f32 %v3310_v25, %v3310_v25 }
 0x10e   : > { %v893_v33 = vpop.f32.mrf.mxu0  ;;  %3178 = vst [vmem:[%s3663_s14 + $0x130] sm:$0xff] %v3014_v55   ;;  %v3733_v2 = vpop.f32.mrf.mxu1 }
 0x10f   : > { %v2255_v35 = vadd.f32 %v2254_v30, %v2128_v28  ;;  %v1994_v36 = vadd.f32 %v3307_v11, %v1993_v29  ;;  %v2130_v41 = vmul.f32 %v893_v33, %v893_v33 }
 0x110   : > { %v3311_v38 = vpop.f32.mrf.mxu0  ;;  %v3735_v9 = vpop.f32.mrf.mxu1 }
 0x111   : > { %v1995_v40 = vadd.f32 %v1994_v36, %v893_v33  ;;  %v2256_v42 = vadd.f32 %v2255_v35, %v2129_v34  ;;  %v2869_v43 = vpack.c.bf16 %v3311_v38, %v3310_v25  ;;  %v2133_v62 = vmul.f32 %v3311_v38, %v3311_v38 }
 0x112   : > { %v896_v46 = vpop.f32.mrf.mxu0  ;;  %v3029_v12 = vpack.c.bf16 %v3735_v9, %v3730_v60  ;;  %v3740_v18 = vpop.f32.mrf.mxu1 }
 0x113   : > { %v2257_v48 = vadd.f32 %v2256_v42, %v2130_v41  ;;  %3149 = vst [vmem:[%s3663_s14 + $0x48] sm:$0xff] %v2869_v43   ;;  %v2864_v49 = vpack.c.bf16 %v896_v46, %v893_v33  ;;  %v1996_v51 = vadd.f32 %v1995_v40, %v896_v46  ;;  %v2131_v52 = vmul.f32 %v896_v46, %v896_v46 }
 0x114   : > { %v3314_v54 = vpop.f32.mrf.mxu0  ;;  %3181 = vst [vmem:[%s3663_s14 + $0x148] sm:$0xff] %v3029_v12   ;;  %v3024_v20 = vpack.c.bf16 %v3740_v18, %v3733_v2  ;;  %v3746_v27 = vpop.f32.mrf.mxu1 }
 0x115   : > { %3148 = vst [vmem:[%s3663_s14 + $0x40] sm:$0xff] %v2864_v49   ;;  %v1997_v58 = vadd.f32 %v3310_v25, %v1996_v51  ;;  %v2258_v59 = vadd.f32 %v2257_v48, %v2131_v52  ;;  %v2136_v22 = vmul.f32 %v3314_v54, %v3314_v54 }
 0x116   : > { %v909_v61 = vpop.f32.mrf.mxu0  ;;  %3180 = vst [vmem:[%s3663_s14 + $0x140] sm:$0xff] %v3024_v20   ;;  %v3749_v34 = vpop.f32.mrf.mxu1 }
 0x117   : > { %v2259_v0 = vadd.f32 %v2258_v59, %v2132_v57  ;;  %v1998_v1 = vadd.f32 %v3311_v38, %v1997_v58  ;;  %v2134_v6 = vmul.f32 %v909_v61, %v909_v61 }
 0x118   : > { %v3315_v3 = vpop.f32.mrf.mxu0  ;;  %v3751_v42 = vpop.f32.mrf.mxu1 }
 0x119   : > { %v1999_v4 = vadd.f32 %v1998_v1, %v909_v61  ;;  %v2260_v7 = vadd.f32 %v2259_v0, %v2133_v62  ;;  %v2879_v8 = vpack.c.bf16 %v3315_v3, %v3314_v54  ;;  %v2137_v29 = vmul.f32 %v3315_v3, %v3315_v3 }
 0x11a   : > { %v912_v11 = vpop.f32.mrf.mxu0  ;;  %v3039_v46 = vpack.c.bf16 %v3751_v42, %v3746_v27  ;;  %v3756_v52 = vpop.f32.mrf.mxu1 }
 0x11b   : > { %v2261_v13 = vadd.f32 %v2260_v7, %v2134_v6  ;;  %3151 = vst [vmem:[%s3663_s14 + $0x58] sm:$0xff] %v2879_v8   ;;  %v2874_v14 = vpack.c.bf16 %v912_v11, %v909_v61  ;;  %v2000_v15 = vadd.f32 %v1999_v4, %v912_v11  ;;  %v2135_v17 = vmul.f32 %v912_v11, %v912_v11 }
 0x11c   : > { %v3318_v19 = vpop.f32.mrf.mxu0  ;;  %3183 = vst [vmem:[%s3663_s14 + $0x158] sm:$0xff] %v3039_v46   ;;  %v3034_v55 = vpack.c.bf16 %v3756_v52, %v3749_v34  ;;  %v3762_v61 = vpop.f32.mrf.mxu1 }
 0x11d   : > { %3150 = vst [vmem:[%s3663_s14 + $0x50] sm:$0xff] %v2874_v14   ;;  %v2001_v23 = vadd.f32 %v3314_v54, %v2000_v15  ;;  %v2262_v25 = vadd.f32 %v2261_v13, %v2135_v17  ;;  %v2140_v57 = vmul.f32 %v3318_v19, %v3318_v19 }
 0x11e   : > { %v925_v28 = vpop.f32.mrf.mxu0  ;;  %3182 = vst [vmem:[%s3663_s14 + $0x150] sm:$0xff] %v3034_v55   ;;  %v3765_v4 = vpop.f32.mrf.mxu1 }
 0x11f   : > { %v2263_v30 = vadd.f32 %v2262_v25, %v2136_v22  ;;  %v2002_v33 = vadd.f32 %v3315_v3, %v2001_v23  ;;  %v2138_v38 = vmul.f32 %v925_v28, %v925_v28 }
 0x120   : > { %v3319_v35 = vpop.f32.mrf.mxu0  ;;  %v3767_v13 = vpop.f32.mrf.mxu1 }
 0x121   : > { %v2003_v36 = vadd.f32 %v2002_v33, %v925_v28  ;;  %v2264_v40 = vadd.f32 %v2263_v30, %v2137_v29  ;;  %v2889_v41 = vpack.c.bf16 %v3319_v35, %v3318_v19  ;;  %v2141_v0 = vmul.f32 %v3319_v35, %v3319_v35 }
 0x122   : > { %v928_v43 = vpop.f32.mrf.mxu0  ;;  %v3049_v15 = vpack.c.bf16 %v3767_v13, %v3762_v61  ;;  %v3772_v23 = vpop.f32.mrf.mxu1 }
 0x123   : > { %v2265_v47 = vadd.f32 %v2264_v40, %v2138_v38  ;;  %3153 = vst [vmem:[%s3663_s14 + $0x68] sm:$0xff] %v2889_v41   ;;  %v2884_v48 = vpack.c.bf16 %v928_v43, %v925_v28  ;;  %v2004_v49 = vadd.f32 %v2003_v36, %v928_v43  ;;  %v2139_v51 = vmul.f32 %v928_v43, %v928_v43 }
 0x124   : > { %v3322_v54 = vpop.f32.mrf.mxu0  ;;  %3185 = vst [vmem:[%s3663_s14 + $0x168] sm:$0xff] %v3049_v15   ;;  %v3044_v28 = vpack.c.bf16 %v3772_v23, %v3765_v4 }
 0x125   : > { %3152 = vst [vmem:[%s3663_s14 + $0x60] sm:$0xff] %v2884_v48   ;;  %v2005_v58 = vadd.f32 %v3318_v19, %v2004_v49  ;;  %v2266_v59 = vadd.f32 %v2265_v47, %v2139_v51  ;;  %v2144_v29 = vmul.f32 %v3322_v54, %v3322_v54 }
 0x126   : > { %v941_v62 = vpop.f32.mrf.mxu0  ;;  %3184 = vst [vmem:[%s3663_s14 + $0x160] sm:$0xff] %v3044_v28  }
 0x127   : > { %v2267_v1 = vadd.f32 %v2266_v59, %v2140_v57  ;;  %v2006_v3 = vadd.f32 %v3319_v35, %v2005_v58  ;;  %v2142_v8 = vmul.f32 %v941_v62, %v941_v62  ;;  %v3778_v35 = vpop.f32.mrf.mxu1 }
 0x128   : > { %v3323_v6 = vpop.f32.mrf.mxu0 }
 0x129   : > { %v2007_v7 = vadd.f32 %v2006_v3, %v941_v62  ;;  %v2268_v11 = vadd.f32 %v2267_v1, %v2141_v0  ;;  %v2899_v12 = vpack.c.bf16 %v3323_v6, %v3322_v54  ;;  %v2145_v38 = vmul.f32 %v3323_v6, %v3323_v6  ;;  %v3781_v43 = vpop.f32.mrf.mxu1 }
 0x12a   : > { %v944_v14 = vpop.f32.mrf.mxu0 }
 0x12b   : > { %v2269_v17 = vadd.f32 %v2268_v11, %v2142_v8  ;;  %3155 = vst [vmem:[%s3663_s14 + $0x78] sm:$0xff] %v2899_v12   ;;  %v2894_v19 = vpack.c.bf16 %v944_v14, %v941_v62  ;;  %v2008_v20 = vadd.f32 %v2007_v7, %v944_v14  ;;  %v2143_v22 = vmul.f32 %v944_v14, %v944_v14  ;;  %v3783_v55 = vpop.f32.mrf.mxu1 }
 0x12c   : > { %v3326_v25 = vpop.f32.mrf.mxu0  ;;  %v3059_v57 = vpack.c.bf16 %v3783_v55, %v3778_v35 }
 0x12d   : > { %3154 = vst [vmem:[%s3663_s14 + $0x70] sm:$0xff] %v2894_v19   ;;  %v2009_v30 = vadd.f32 %v3322_v54, %v2008_v20  ;;  %v2270_v33 = vadd.f32 %v2269_v17, %v2143_v22  ;;  %v3788_v1 = vpop.f32.mrf.mxu1  ;;  %v2148_v7 = vmul.f32 %v3326_v25, %v3326_v25 }
 0x12e   : > { %v957_v36 = vpop.f32.mrf.mxu0  ;;  %3187 = vst [vmem:[%s3663_s14 + $0x178] sm:$0xff] %v3059_v57  }
 0x12f   : > { %v2271_v40 = vadd.f32 %v2270_v33, %v2144_v29  ;;  %v2010_v41 = vadd.f32 %v3323_v6, %v2009_v30  ;;  %v2146_v48 = vmul.f32 %v957_v36, %v957_v36  ;;  %v3054_v6 = vpack.c.bf16 %v3788_v1, %v3781_v43  ;;  %v3794_v12 = vpop.f32.mrf.mxu1 }
 0x130   : > { %v3327_v46 = vpop.f32.mrf.mxu0 }
 0x131   : > { %v2011_v47 = vadd.f32 %v2010_v41, %v957_v36  ;;  %v2272_v49 = vadd.f32 %v2271_v40, %v2145_v38  ;;  %v2909_v51 = vpack.c.bf16 %v3327_v46, %v3326_v25  ;;  %3186 = vst [vmem:[%s3663_s14 + $0x170] sm:$0xff] %v3054_v6   ;;  %v2149_v15 = vmul.f32 %v3327_v46, %v3327_v46  ;;  %v3797_v20 = vpop.f32.mrf.mxu1 }
 0x132   : > { %v960_v54 = vpop.f32.mrf.mxu0 }
 0x133   : > { %v2273_v58 = vadd.f32 %v2272_v49, %v2146_v48  ;;  %3157 = vst [vmem:[%s3663_s14 + $0x88] sm:$0xff] %v2909_v51   ;;  %v2904_v59 = vpack.c.bf16 %v960_v54, %v957_v36  ;;  %v2012_v62 = vadd.f32 %v2011_v47, %v960_v54  ;;  %v2147_v0 = vmul.f32 %v960_v54, %v960_v54  ;;  %v3799_v36 = vpop.f32.mrf.mxu1 }
 0x134   : > { %v3330_v3 = vpop.f32.mrf.mxu0  ;;  %v3069_v38 = vpack.c.bf16 %v3799_v36, %v3794_v12 }
 0x135   : > { %3156 = vst [vmem:[%s3663_s14 + $0x80] sm:$0xff] %v2904_v59   ;;  %v2013_v8 = vadd.f32 %v3326_v25, %v2012_v62  ;;  %v2274_v11 = vadd.f32 %v2273_v58, %v2147_v0  ;;  %v3804_v48 = vpop.f32.mrf.mxu1  ;;  %v2152_v54 = vmul.f32 %v3330_v3, %v3330_v3 }
 0x136   : > { %v973_v14 = vpop.f32.mrf.mxu0  ;;  %3189 = vst [vmem:[%s3663_s14 + $0x188] sm:$0xff] %v3069_v38   ;;  %v3064_v51 = vpack.c.bf16 %v3804_v48, %v3797_v20 }
 0x137   : > { %v2275_v17 = vadd.f32 %v2274_v11, %v2148_v7  ;;  %v2014_v19 = vadd.f32 %v3327_v46, %v2013_v8  ;;  %v2150_v29 = vmul.f32 %v973_v14, %v973_v14  ;;  %v3810_v59 = vpop.f32.mrf.mxu1 }
 0x138   : > { %v3331_v22 = vpop.f32.mrf.mxu0  ;;  %3188 = vst [vmem:[%s3663_s14 + $0x180] sm:$0xff] %v3064_v51  }
 0x139   : > { %v2015_v28 = vadd.f32 %v2014_v19, %v973_v14  ;;  %v2276_v30 = vadd.f32 %v2275_v17, %v2149_v15  ;;  %v2919_v33 = vpack.c.bf16 %v3331_v22, %v3330_v3  ;;  %v2153_v0 = vmul.f32 %v3331_v22, %v3331_v22  ;;  %v3813_v8 = vpop.f32.mrf.mxu1 }
 0x13a   : > { %v976_v25 = vpop.f32.mrf.mxu0 }
 0x13b   : > { %v2277_v40 = vadd.f32 %v2276_v30, %v2150_v29  ;;  %3159 = vst [vmem:[%s3663_s14 + $0x98] sm:$0xff] %v2919_v33   ;;  %v2914_v41 = vpack.c.bf16 %v976_v25, %v973_v14  ;;  %v2016_v46 = vadd.f32 %v2015_v28, %v976_v25  ;;  %v2151_v47 = vmul.f32 %v976_v25, %v976_v25  ;;  %v3815_v28 = vpop.f32.mrf.mxu1 }
 0x13c   : > { %v3334_v49 = vpop.f32.mrf.mxu0  ;;  %v3079_v29 = vpack.c.bf16 %v3815_v28, %v3810_v59 }
 0x13d   : > { %3158 = vst [vmem:[%s3663_s14 + $0x90] sm:$0xff] %v2914_v41   ;;  %v2017_v57 = vadd.f32 %v3330_v3, %v2016_v46  ;;  %v2278_v58 = vadd.f32 %v2277_v40, %v2151_v47  ;;  %v3820_v38 = vpop.f32.mrf.mxu1  ;;  %v2156_v46 = vmul.f32 %v3334_v49, %v3334_v49 }
 0x13e   : > { %v989_v62 = vpop.f32.mrf.mxu0  ;;  %3191 = vst [vmem:[%s3663_s14 + $0x198] sm:$0xff] %v3079_v29   ;;  %v3074_v41 = vpack.c.bf16 %v3820_v38, %v3813_v8 }
 0x13f   : > { %v2279_v6 = vadd.f32 %v2278_v58, %v2152_v54  ;;  %v2018_v7 = vadd.f32 %v3331_v22, %v2017_v57  ;;  %v2154_v15 = vmul.f32 %v989_v62, %v989_v62  ;;  %v3826_v54 = vpop.f32.mrf.mxu1 }
 0x140   : > { %v3335_v11 = vpop.f32.mrf.mxu0  ;;  %4159 = vst [vmem:[#allocation2_spill] sm:$0xff] %v3826_v54  ;;  %3190 = vst [vmem:[%s3663_s14 + $0x190] sm:$0xff] %v3074_v41  }
 0x141   : > { %v2019_v14 = vadd.f32 %v2018_v7, %v989_v62  ;;  %v2280_v17 = vadd.f32 %v2279_v6, %v2153_v0  ;;  %v2929_v19 = vpack.c.bf16 %v3335_v11, %v3334_v49  ;;  %v2157_v58 = vmul.f32 %v3335_v11, %v3335_v11  ;;  %v3829_v6 = vpop.f32.mrf.mxu1 }
 0x142   : > { %v992_v3 = vpop.f32.mrf.mxu0 }
 0x143   : > { %v2281_v30 = vadd.f32 %v2280_v17, %v2154_v15  ;;  %3161 = vst [vmem:[%s3663_s14 + $0xa8] sm:$0xff] %v2929_v19   ;;  %v2924_v33 = vpack.c.bf16 %v992_v3, %v989_v62  ;;  %v2020_v22 = vadd.f32 %v2019_v14, %v992_v3  ;;  %v2155_v25 = vmul.f32 %v992_v3, %v992_v3  ;;  %v3831_v3 = vpop.f32.mrf.mxu1 }
 0x144   : > { %v3338_v40 = vpop.f32.mrf.mxu0  ;;  %4160 = vst [vmem:[#allocation3_spill] sm:$0xff] %v3831_v3  ;;  %v3089_v29 = vpack.c.bf16 %v3831_v3, %v3826_v54 }
 0x145   : > { %3160 = vst [vmem:[%s3663_s14 + $0xa0] sm:$0xff] %v2924_v33   ;;  %v2021_v47 = vadd.f32 %v3334_v49, %v2020_v22  ;;  %v2282_v51 = vadd.f32 %v2281_v30, %v2155_v25  ;;  %v3836_v25 = vpop.f32.mrf.mxu1 }
 0x146   : > { %v1005_v57 = vpop.f32.mrf.mxu0  ;;  %4161 = vst [vmem:[#allocation4_spill] sm:$0xff] %v3836_v25  ;;  %3193 = vst [vmem:[%s3663_s14 + $0x1a8] sm:$0xff] %v3089_v29  }
 0x147   : > { %v2283_v62 = vadd.f32 %v2282_v51, %v2156_v46  ;;  %v2022_v0 = vadd.f32 %v3335_v11, %v2021_v47  ;;  %v2158_v15 = vmul.f32 %v1005_v57, %v1005_v57  ;;  %v3084_v46 = vpack.c.bf16 %v3836_v25, %v3829_v6 }
 0x148   : > { %v3339_v7 = vpop.f32.mrf.mxu0  ;;  %v2160_v47 = vmul.f32 %v3338_v40, %v3338_v40 }
 0x149   : > { %v2023_v14 = vadd.f32 %v2022_v0, %v1005_v57  ;;  %v2284_v17 = vadd.f32 %v2283_v62, %v2157_v58  ;;  %v2939_v19 = vpack.c.bf16 %v3339_v7, %v3338_v40  ;;  %v3842_v62 = vpop.f32.mrf.mxu1  ;;  %3192 = vst [vmem:[%s3663_s14 + $0x1a0] sm:$0xff] %v3084_v46  }
 0x14a   : > { %v1008_v49 = vpop.f32.mrf.mxu0  ;;  %4162 = vst [vmem:[#allocation5_spill] sm:$0xff] %v3842_v62 }
 0x14b   : > { %v2285_v30 = vadd.f32 %v2284_v17, %v2158_v15  ;;  %3163 = vst [vmem:[%s3663_s14 + $0xb8] sm:$0xff] %v2939_v19   ;;  %v2934_v33 = vpack.c.bf16 %v1008_v49, %v1005_v57  ;;  %v2024_v11 = vadd.f32 %v2023_v14, %v1008_v49  ;;  %v2159_v22 = vmul.f32 %v1008_v49, %v1008_v49  ;;  %v3845_v17 = vpop.f32.mrf.mxu1 }
 0x14c   : > { %v3342_v41 = vpop.f32.mrf.mxu0  ;;  %v2161_v15 = vmul.f32 %v3339_v7, %v3339_v7  ;;  %4163 = vst [vmem:[#allocation6_spill] sm:$0xff] %v3845_v17 }
 0x14d   : > { %3162 = vst [vmem:[%s3663_s14 + $0xb0] sm:$0xff] %v2934_v33   ;;  %v2025_v51 = vadd.f32 %v3338_v40, %v2024_v11  ;;  %v2286_v58 = vadd.f32 %v2285_v30, %v2159_v22  ;;  %v3847_v33 = vpop.f32.mrf.mxu1 }
 0x14e   : > { %v1021_v0 = vpop.f32.mrf.mxu0  ;;  %4164 = vst [vmem:[#allocation7_spill] sm:$0xff] %v3847_v33  ;;  %v3099_v30 = vpack.c.bf16 %v3847_v33, %v3842_v62 }
 0x14f   : > { %v2287_v57 = vadd.f32 %v2286_v58, %v2160_v47  ;;  %v2026_v14 = vadd.f32 %v3339_v7, %v2025_v51  ;;  %v2162_v29 = vmul.f32 %v1021_v0, %v1021_v0  ;;  %v3852_v47 = vpop.f32.mrf.mxu1 }
 0x150   : > { %v3343_v19 = vpop.f32.mrf.mxu0  ;;  %4165 = vst [vmem:[#allocation8_spill] sm:$0xff] %v3852_v47  ;;  %3195 = vst [vmem:[%s3663_s14 + $0x1b8] sm:$0xff] %v3099_v30   ;;  %v3094_v58 = vpack.c.bf16 %v3852_v47, %v3845_v17 }
 0x151   : > { %v2027_v49 = vadd.f32 %v2026_v14, %v1021_v0  ;;  %v2288_v3 = vadd.f32 %v2287_v57, %v2161_v15  ;;  %v2949_v54 = vpack.c.bf16 %v3343_v19, %v3342_v41  ;;  %v2164_v15 = vmul.f32 %v3342_v41, %v3342_v41  ;;  %v3858_v25 = vpop.f32.mrf.mxu1 }
 0x152   : > { %v1024_v40 = vpop.f32.mrf.mxu0  ;;  %4166 = vst [vmem:[#allocation9_spill] sm:$0xff] %v3858_v25  ;;  %3194 = vst [vmem:[%s3663_s14 + $0x1b0] sm:$0xff] %v3094_v58  }
 0x153   : > { %v2289_v11 = vadd.f32 %v2288_v3, %v2162_v29  ;;  %3165 = vst [vmem:[%s3663_s14 + $0xc8] sm:$0xff] %v2949_v54   ;;  %v2944_v22 = vpack.c.bf16 %v1024_v40, %v1021_v0  ;;  %v2028_v7 = vadd.f32 %v2027_v49, %v1024_v40  ;;  %v2163_v46 = vmul.f32 %v1024_v40, %v1024_v40  ;;  %v3861_v49 = vpop.f32.mrf.mxu1 }
 0x154   : > { %v3346_v51 = vpop.f32.mrf.mxu0  ;;  %v2165_v54 = vmul.f32 %v3343_v19, %v3343_v19  ;;  %4167 = vst [vmem:[#allocation10_spill] sm:$0xff] %v3861_v49 }
 0x155   : > { %3164 = vst [vmem:[%s3663_s14 + $0xc0] sm:$0xff] %v2944_v22   ;;  %v2029_v57 = vadd.f32 %v3342_v41, %v2028_v7  ;;  %v2290_v14 = vadd.f32 %v2289_v11, %v2163_v46  ;;  %v3863_v22 = vpop.f32.mrf.mxu1 }
 0x156   : > { %v1037_v33 = vpop.f32.mrf.mxu0  ;;  %4168 = vst [vmem:[#allocation11_spill] sm:$0xff] %v3863_v22  ;;  %v3109_v11 = vpack.c.bf16 %v3863_v22, %v3858_v25 }
 0x157   : > { %v2291_v3 = vadd.f32 %v2290_v14, %v2164_v15  ;;  %v2030_v0 = vadd.f32 %v3343_v19, %v2029_v57  ;;  %v2166_v30 = vmul.f32 %v1037_v33, %v1037_v33  ;;  %v3868_v15 = vpop.f32.mrf.mxu1 }
 0x158   : > { %v3347_v29 = vpop.f32.mrf.mxu0  ;;  %4169 = vst [vmem:[#allocation12_spill] sm:$0xff] %v3868_v15  ;;  %3197 = vst [vmem:[%s3663_s14 + $0x1c8] sm:$0xff] %v3109_v11   ;;  %v3104_v14 = vpack.c.bf16 %v3868_v15, %v3861_v49 }
 0x159   : > { %v2031_v40 = vadd.f32 %v2030_v0, %v1037_v33  ;;  %v2292_v62 = vadd.f32 %v2291_v3, %v2165_v54  ;;  %v2959_v47 = vpack.c.bf16 %v3347_v29, %v3346_v51  ;;  %v2168_v54 = vmul.f32 %v3346_v51, %v3346_v51  ;;  %v3874_v17 = vpop.f32.mrf.mxu1 }
 0x15a   : > { %v1040_v41 = vpop.f32.mrf.mxu0  ;;  %4170 = vst [vmem:[#allocation13_spill] sm:$0xff] %v3874_v17  ;;  %3196 = vst [vmem:[%s3663_s14 + $0x1c0] sm:$0xff] %v3104_v14  }
 0x15b   : > { %v2293_v7 = vadd.f32 %v2292_v62, %v2166_v30  ;;  %3167 = vst [vmem:[%s3663_s14 + $0xd8] sm:$0xff] %v2959_v47   ;;  %v2954_v46 = vpack.c.bf16 %v1040_v41, %v1037_v33  ;;  %v2032_v19 = vadd.f32 %v2031_v40, %v1040_v41  ;;  %v2167_v58 = vmul.f32 %v1040_v41, %v1040_v41  ;;  %v3877_v40 = vpop.f32.mrf.mxu1 }
 0x15c   : > { %v3350_v57 = vpop.f32.mrf.mxu0  ;;  %v2169_v62 = vmul.f32 %v3347_v29, %v3347_v29 }
 0x15d   : > { %3166 = vst [vmem:[%s3663_s14 + $0xd0] sm:$0xff] %v2954_v46   ;;  %v2033_v3 = vadd.f32 %v3346_v51, %v2032_v19  ;;  %v2294_v0 = vadd.f32 %v2293_v7, %v2167_v58  ;;  %v3879_v46 = vpop.f32.mrf.mxu1 }
 0x15e   : > { %v1053_v22 = vpop.f32.mrf.mxu0  ;;  %4171 = vst [vmem:[#allocation14_spill] sm:$0xff] %v3879_v46  ;;  %v3119_v7 = vpack.c.bf16 %v3879_v46, %v3874_v17 }
 0x15f   : > { %v2295_v33 = vadd.f32 %v2294_v0, %v2168_v54  ;;  %v2034_v47 = vadd.f32 %v3347_v29, %v2033_v3  ;;  %v2170_v11 = vmul.f32 %v1053_v22, %v1053_v22  ;;  %v3884_v54 = vpop.f32.mrf.mxu1 }
 0x160   : > { %v3351_v30 = vpop.f32.mrf.mxu0  ;;  %4172 = vst [vmem:[#allocation15_spill] sm:$0xff] %v3884_v54  ;;  %3199 = vst [vmem:[%s3663_s14 + $0x1d8] sm:$0xff] %v3119_v7   ;;  %v3114_v0 = vpack.c.bf16 %v3884_v54, %v3877_v40 }
 0x161   : > { %v2035_v41 = vadd.f32 %v2034_v47, %v1053_v22  ;;  %v2296_v25 = vadd.f32 %v2295_v33, %v2169_v62  ;;  %v2969_v15 = vpack.c.bf16 %v3351_v30, %v3350_v57  ;;  %v2172_v62 = vmul.f32 %v3350_v57, %v3350_v57  ;;  %v3890_v49 = vpop.f32.mrf.mxu1 }
 0x162   : > { %v1056_v51 = vpop.f32.mrf.mxu0  ;;  %3198 = vst [vmem:[%s3663_s14 + $0x1d0] sm:$0xff] %v3114_v0  }
 0x163   : > { %v2297_v19 = vadd.f32 %v2296_v25, %v2170_v11  ;;  %3169 = vst [vmem:[%s3663_s14 + $0xe8] sm:$0xff] %v2969_v15   ;;  %v2964_v58 = vpack.c.bf16 %v1056_v51, %v1053_v22  ;;  %v2036_v29 = vadd.f32 %v2035_v41, %v1056_v51  ;;  %v2171_v14 = vmul.f32 %v1056_v51, %v1056_v51  ;;  %v3893_v41 = vpop.f32.mrf.mxu1 }
 0x164   : > { %v3354_v3 = vpop.f32.mrf.mxu0  ;;  %v2173_v25 = vmul.f32 %v3351_v30, %v3351_v30 }
 0x165   : > { %3168 = vst [vmem:[%s3663_s14 + $0xe0] sm:$0xff] %v2964_v58   ;;  %v2037_v33 = vadd.f32 %v3350_v57, %v2036_v29  ;;  %v2298_v47 = vadd.f32 %v2297_v19, %v2171_v14  ;;  %v3895_v58 = vpop.f32.mrf.mxu1 }
 0x166   : > { %v1069_v46 = vpop.f32.mrf.mxu0  ;;  %4173 = vst [vmem:[#allocation16_spill] sm:$0xff] %v3895_v58  ;;  %v3129_v19 = vpack.c.bf16 %v3895_v58, %v3890_v49 }
 0x167   : > { %v2299_v22 = vadd.f32 %v2298_v47, %v2172_v62  ;;  %v2038_v15 = vadd.f32 %v3351_v30, %v2037_v33  ;;  %v2174_v7 = vmul.f32 %v1069_v46, %v1069_v46  ;;  %v3900_v62 = vpop.f32.mrf.mxu1  ;;  %v2176_v47 = vmul.f32 %v3354_v3, %v3354_v3 }
 0x168   : > { %v3355_v11 = vpop.f32.mrf.mxu0  ;;  %3201 = vst [vmem:[%s3663_s14 + $0x1e8] sm:$0xff] %v3129_v19   ;;  %v3124_v33 = vpack.c.bf16 %v3900_v62, %v3893_v41 }
 0x169   : > { %v2039_v51 = vadd.f32 %v2038_v15, %v1069_v46  ;;  %v2300_v17 = vadd.f32 %v2299_v22, %v2173_v25  ;;  %v2979_v54 = vpack.c.bf16 %v3355_v11, %v3354_v3  ;;  %v3906_v15 = vpop.f32.mrf.mxu1  ;;  %v2177_v58 = vmul.f32 %v3355_v11, %v3355_v11 }
 0x16a   : > { %v1072_v57 = vpop.f32.mrf.mxu0  ;;  %3200 = vst [vmem:[%s3663_s14 + $0x1e0] sm:$0xff] %v3124_v33  }
 0x16b   : > { %v2301_v29 = vadd.f32 %v2300_v17, %v2174_v7  ;;  %3171 = vst [vmem:[%s3663_s14 + $0xf8] sm:$0xff] %v2979_v54   ;;  %v2974_v14 = vpack.c.bf16 %v1072_v57, %v1069_v46  ;;  %v2040_v30 = vadd.f32 %v2039_v51, %v1072_v57  ;;  %v2175_v0 = vmul.f32 %v1072_v57, %v1072_v57  ;;  %v3909_v46 = vpop.f32.mrf.mxu1 }
 0x16c   : > { %v2178_v51 = vmul.f32 %v3669_v26, %v3669_v26 }
 0x16d   : > { %3170 = vst [vmem:[%s3663_s14 + $0xf0] sm:$0xff] %v2974_v14   ;;  %v2041_v25 = vadd.f32 %v3354_v3, %v2040_v30  ;;  %v2302_v22 = vadd.f32 %v2301_v29, %v2175_v0  ;;  %v3914_v19 = vpop.f32.mrf.mxu1 }
 0x16e   : > { %v3139_v3 = vpack.c.bf16 %v3914_v19, %v3906_v15 }
 0x16f   : > { %v2042_v17 = vadd.f32 %v3355_v11, %v2041_v25  ;;  %v2303_v54 = vadd.f32 %v2302_v22, %v2176_v47  ;;  %v2179_v11 = vmul.f32 %v3676_v39, %v3676_v39  ;;  %v3921_v30 = vpop.f32.mrf.mxu1  ;;  %v2181_v47 = vmul.f32 %v3671_v32, %v3671_v32 }
 0x170   : > { %3203 = vst [vmem:[%s3663_s14 + $0x1f8] sm:$0xff] %v3139_v3   ;;  %v3134_v0 = vpack.c.bf16 %v3921_v30, %v3909_v46 }
 0x171   : > { %v2043_v7 = vadd.f32 %v2042_v17, %v3669_v26  ;;  %v2304_v57 = vadd.f32 %v2303_v54, %v2177_v58  ;;  %v2180_v26 = vmul.f32 %v3667_v21, %v3667_v21  ;;  %v2182_v17 = vmul.f32 %v3685_v50, %v3685_v50 }
 0x172   : > { %3202 = vst [vmem:[%s3663_s14 + $0x1f0] sm:$0xff] %v3134_v0   ;;  %v2186_v0 = vmul.f32 %v3701_v10, %v3701_v10 }
 0x173   : > { %v2305_v29 = vadd.f32 %v2304_v57, %v2178_v51  ;;  %v2044_v14 = vadd.f32 %v2043_v7, %v3676_v39  ;;  %v2184_v57 = vmul.f32 %v3682_v45, %v3682_v45 }
 0x175   : > { %v2045_v58 = vadd.f32 %v3667_v21, %v2044_v14  ;;  %v2306_v33 = vadd.f32 %v2305_v29, %v2179_v11  ;;  %v2183_v21 = vmul.f32 %v3692_v63, %v3692_v63 }
 0x177   : > { %v2307_v25 = vadd.f32 %v2306_v33, %v2180_v26  ;;  %v2046_v22 = vadd.f32 %v3671_v32, %v2045_v58  ;;  %v2185_v32 = vmul.f32 %v3687_v56, %v3687_v56  ;;  %v2187_v33 = vmul.f32 %v3708_v24, %v3708_v24 }
 0x179   : > { %v2047_v39 = vadd.f32 %v2046_v22, %v3685_v50  ;;  %v2308_v54 = vadd.f32 %v2307_v25, %v2181_v47 }
 0x17b   : > { %v2309_v51 = vadd.f32 %v2308_v54, %v2182_v17  ;;  %v2048_v7 = vadd.f32 %v2047_v39, %v3692_v63  ;;  %v2190_v17 = vmul.f32 %v3717_v37, %v3717_v37 }
 0x17d   : > { %v2049_v3 = vadd.f32 %v3682_v45, %v2048_v7  ;;  %v2310_v29 = vadd.f32 %v2309_v51, %v2183_v21  ;;  %v2188_v45 = vmul.f32 %v3698_v5, %v3698_v5  ;;  %v2191_v7 = vmul.f32 %v3724_v53, %v3724_v53 }
 0x17f   : > { %v2311_v14 = vadd.f32 %v2310_v29, %v2184_v57  ;;  %v2050_v11 = vadd.f32 %v3687_v56, %v2049_v3  ;;  %v2189_v56 = vmul.f32 %v3703_v16, %v3703_v16 }
 0x181   : > { %v2051_v50 = vadd.f32 %v2050_v11, %v3701_v10  ;;  %v2312_v26 = vadd.f32 %v2311_v14, %v2185_v32  ;;  %v2194_v32 = vmul.f32 %v3733_v2, %v3733_v2 }
 0x183   : > { %v2313_v58 = vadd.f32 %v2312_v26, %v2186_v0  ;;  %v2052_v63 = vadd.f32 %v2051_v50, %v3708_v24  ;;  %v2195_v50 = vmul.f32 %v3740_v18, %v3740_v18 }
 0x185   : > { %v2053_v47 = vadd.f32 %v3698_v5, %v2052_v63  ;;  %v2314_v25 = vadd.f32 %v2313_v58, %v2187_v33  ;;  %v2192_v5 = vmul.f32 %v3714_v31, %v3714_v31  ;;  %v2198_v33 = vmul.f32 %v3749_v34, %v3749_v34 }
 0x187   : > { %v2315_v22 = vadd.f32 %v2314_v25, %v2188_v45  ;;  %v2054_v39 = vadd.f32 %v3703_v16, %v2053_v47  ;;  %v2193_v16 = vmul.f32 %v3719_v44, %v3719_v44  ;;  %v2199_v25 = vmul.f32 %v3756_v52, %v3756_v52 }
 0x189   : > { %v2055_v10 = vadd.f32 %v2054_v39, %v3717_v37  ;;  %v2316_v54 = vadd.f32 %v2315_v22, %v2189_v56 }
 0x18b   : > { %v2317_v51 = vadd.f32 %v2316_v54, %v2190_v17  ;;  %v2056_v24 = vadd.f32 %v2055_v10, %v3724_v53  ;;  %v2202_v17 = vmul.f32 %v3765_v4, %v3765_v4 }
 0x18d   : > { %v2057_v21 = vadd.f32 %v3714_v31, %v2056_v24  ;;  %v2318_v57 = vadd.f32 %v2317_v51, %v2191_v7  ;;  %v2196_v31 = vmul.f32 %v3730_v60, %v3730_v60  ;;  %v2203_v24 = vmul.f32 %v3772_v23, %v3772_v23 }
 0x18f   : > { %v2319_v3 = vadd.f32 %v2318_v57, %v2192_v5  ;;  %v2058_v29 = vadd.f32 %v3719_v44, %v2057_v21  ;;  %v2197_v44 = vmul.f32 %v3735_v9, %v3735_v9 }
 0x191   : > { %v2059_v37 = vadd.f32 %v2058_v29, %v3733_v2  ;;  %v2320_v14 = vadd.f32 %v2319_v3, %v2193_v16  ;;  %v2206_v16 = vmul.f32 %v3781_v43, %v3781_v43 }
 0x193   : > { %v2321_v11 = vadd.f32 %v2320_v14, %v2194_v32  ;;  %v2060_v53 = vadd.f32 %v2059_v37, %v3740_v18  ;;  %v2207_v37 = vmul.f32 %v3788_v1, %v3788_v1 }
 0x195   : > { %v2061_v0 = vadd.f32 %v3730_v60, %v2060_v53  ;;  %v2322_v26 = vadd.f32 %v2321_v11, %v2195_v50  ;;  %v2200_v60 = vmul.f32 %v3746_v27, %v3746_v27  ;;  %v2210_v50 = vmul.f32 %v3797_v20, %v3797_v20 }
 0x197   : > { %v2323_v58 = vadd.f32 %v2322_v26, %v2196_v31  ;;  %v2062_v63 = vadd.f32 %v3735_v9, %v2061_v0  ;;  %v2201_v9 = vmul.f32 %v3751_v42, %v3751_v42  ;;  %v2211_v26 = vmul.f32 %v3804_v48, %v3804_v48 }
 0x199   : > { %v2063_v2 = vadd.f32 %v2062_v63, %v3749_v34  ;;  %v2324_v45 = vadd.f32 %v2323_v58, %v2197_v44 }
 0x19b   : > { %v2325_v47 = vadd.f32 %v2324_v45, %v2198_v33  ;;  %v2064_v18 = vadd.f32 %v2063_v2, %v3756_v52  ;;  %v2214_v33 = vmul.f32 %v3813_v8, %v3813_v8 }
 0x19d   : > { %v2065_v56 = vadd.f32 %v3746_v27, %v2064_v18  ;;  %v2326_v22 = vadd.f32 %v2325_v47, %v2199_v25  ;;  %v2204_v27 = vmul.f32 %v3762_v61, %v3762_v61  ;;  %v2215_v18 = vmul.f32 %v3820_v38, %v3820_v38 }
 0x19f   : > { %v2327_v39 = vadd.f32 %v2326_v22, %v2200_v60  ;;  %v2066_v10 = vadd.f32 %v3751_v42, %v2065_v56  ;;  %v2205_v42 = vmul.f32 %v3767_v13, %v3767_v13 }
 0x1a1   : > { %v2067_v34 = vadd.f32 %v2066_v10, %v3765_v4  ;;  %v2328_v54 = vadd.f32 %v2327_v39, %v2201_v9  ;;  %v2218_v9 = vmul.f32 %v3829_v6, %v3829_v6 }
 0x1a3   : > { %v2329_v51 = vadd.f32 %v2328_v54, %v2202_v17  ;;  %v2068_v52 = vadd.f32 %v2067_v34, %v3772_v23 }
 0x1a5   : > { %v2069_v7 = vadd.f32 %v3762_v61, %v2068_v52  ;;  %v2330_v5 = vadd.f32 %v2329_v51, %v2203_v24  ;;  %v2208_v61 = vmul.f32 %v3778_v35, %v3778_v35  ;;  %v4176_v24 = vld [vmem:[#allocation3_spill] sm:$0xff] }
 0x1a7   : > { %v2331_v21 = vadd.f32 %v2330_v5, %v2204_v27  ;;  %v2070_v57 = vadd.f32 %v3767_v13, %v2069_v7  ;;  %v2209_v13 = vmul.f32 %v3783_v55, %v3783_v55 }
 0x1a9   : > { %v2071_v4 = vadd.f32 %v2070_v57, %v3781_v43  ;;  %v2332_v3 = vadd.f32 %v2331_v21, %v2205_v42 }
 0x1ab   : > { %v2333_v29 = vadd.f32 %v2332_v3, %v2206_v16  ;;  %v2072_v23 = vadd.f32 %v2071_v4, %v3788_v1  ;;  %v4178_v4 = vld [vmem:[#allocation8_spill] sm:$0xff] }
 0x1ac   : > { %v2223_v3 = vmul.f32 %v4178_v4, %v4178_v4 }
 0x1ad   : > { %v2073_v32 = vadd.f32 %v3778_v35, %v2072_v23  ;;  %v2334_v14 = vadd.f32 %v2333_v29, %v2207_v37  ;;  %v2212_v35 = vmul.f32 %v3794_v12, %v3794_v12  ;;  %v4179_v29 = vld [vmem:[#allocation5_spill] sm:$0xff] }
 0x1ae   : > { %v2224_v23 = vmul.f32 %v4179_v29, %v4179_v29 }
 0x1af   : > { %v2335_v11 = vadd.f32 %v2334_v14, %v2208_v61  ;;  %v2074_v53 = vadd.f32 %v3783_v55, %v2073_v32  ;;  %v2213_v55 = vmul.f32 %v3799_v36, %v3799_v36  ;;  %v4180_v32 = vld [vmem:[#allocation7_spill] sm:$0xff] }
 0x1b0   : > { %v2225_v14 = vmul.f32 %v4180_v32, %v4180_v32 }
 0x1b1   : > { %v2075_v43 = vadd.f32 %v2074_v53, %v3797_v20  ;;  %v2336_v31 = vadd.f32 %v2335_v11, %v2209_v13  ;;  %v4181_v53 = vld [vmem:[#allocation10_spill] sm:$0xff] }
 0x1b3   : > { %v2337_v0 = vadd.f32 %v2336_v31, %v2210_v50  ;;  %v2076_v1 = vadd.f32 %v2075_v43, %v3804_v48  ;;  %v2226_v50 = vmul.f32 %v4181_v53, %v4181_v53 }
 0x1b5   : > { %v2077_v44 = vadd.f32 %v3794_v12, %v2076_v1  ;;  %v2338_v58 = vadd.f32 %v2337_v0, %v2211_v26  ;;  %v2216_v12 = vmul.f32 %v3810_v59, %v3810_v59  ;;  %v4182_v1 = vld [vmem:[#allocation12_spill] sm:$0xff] }
 0x1b7   : > { %v2339_v63 = vadd.f32 %v2338_v58, %v2212_v35  ;;  %v2078_v2 = vadd.f32 %v3799_v36, %v2077_v44  ;;  %v2217_v36 = vmul.f32 %v3815_v28, %v3815_v28  ;;  %v2227_v35 = vmul.f32 %v4182_v1, %v4182_v1  ;;  %v4183_v44 = vld [vmem:[#allocation9_spill] sm:$0xff] }
 0x1b8   : > { %v2228_v58 = vmul.f32 %v4183_v44, %v4183_v44 }
 0x1b9   : > { %v2079_v20 = vadd.f32 %v2078_v2, %v3813_v8  ;;  %v2340_v45 = vadd.f32 %v2339_v63, %v2213_v55  ;;  %v4184_v2 = vld [vmem:[#allocation11_spill] sm:$0xff] }
 0x1bb   : > { %v2341_v47 = vadd.f32 %v2340_v45, %v2214_v33  ;;  %v2080_v48 = vadd.f32 %v2079_v20, %v3820_v38  ;;  %v4174_v38 = vld [vmem:[#allocation4_spill] sm:$0xff]  ;;  %v2229_v20 = vmul.f32 %v4184_v2, %v4184_v2 }
 0x1bc   : > { %v2219_v17 = vmul.f32 %v4174_v38, %v4174_v38 }
 0x1bd   : > { %v2081_v25 = vadd.f32 %v3810_v59, %v2080_v48  ;;  %v2342_v60 = vadd.f32 %v2341_v47, %v2215_v18  ;;  %v4175_v59 = vld [vmem:[#allocation2_spill] sm:$0xff]  ;;  %v2230_v48 = vmul.f32 %v3877_v40, %v3877_v40 }
 0x1be   : > { %v2220_v54 = vmul.f32 %v4175_v59, %v4175_v59 }
 0x1bf   : > { %v2343_v56 = vadd.f32 %v2342_v60, %v2216_v12  ;;  %v2082_v22 = vadd.f32 %v3815_v28, %v2081_v25  ;;  %v2221_v28 = vmul.f32 %v4176_v24, %v4176_v24  ;;  %v4185_v25 = vld [vmem:[#allocation15_spill] sm:$0xff] }
 0x1c1   : > { %v2083_v8 = vadd.f32 %v2082_v22, %v3829_v6  ;;  %v2344_v39 = vadd.f32 %v2343_v56, %v2217_v36  ;;  %v4177_v6 = vld [vmem:[#allocation6_spill] sm:$0xff]  ;;  %v2231_v36 = vmul.f32 %v4185_v25, %v4185_v25  ;;  %v4186_v56 = vld [vmem:[#allocation13_spill] sm:$0xff] }
 0x1c2   : > { %v2222_v42 = vmul.f32 %v4177_v6, %v4177_v6  ;;  %v2232_v22 = vmul.f32 %v4186_v56, %v4186_v56 }
 0x1c3   : > { %v2345_v10 = vadd.f32 %v2344_v39, %v2218_v9  ;;  %v2084_v34 = vadd.f32 %v2083_v8, %v4174_v38  ;;  %v4187_v39 = vld [vmem:[#allocation14_spill] sm:$0xff] }
 0x1c5   : > { %v2085_v51 = vadd.f32 %v4175_v59, %v2084_v34  ;;  %v2346_v52 = vadd.f32 %v2345_v10, %v2219_v17  ;;  %v2233_v10 = vmul.f32 %v4187_v39, %v4187_v39  ;;  %v2234_v17 = vmul.f32 %v3893_v41, %v3893_v41 }
 0x1c7   : > { %v2347_v27 = vadd.f32 %v2346_v52, %v2220_v54  ;;  %v2086_v7 = vadd.f32 %v4176_v24, %v2085_v51  ;;  %v2235_v52 = vmul.f32 %v3900_v62, %v3900_v62  ;;  %v2236_v24 = vmul.f32 %v3890_v49, %v3890_v49 }
 0x1c9   : > { %v2087_v5 = vadd.f32 %v2086_v7, %v4177_v6  ;;  %v2348_v21 = vadd.f32 %v2347_v27, %v2221_v28  ;;  %v4188_v7 = vld [vmem:[#allocation16_spill] sm:$0xff] }
 0x1ca   : > { %v2237_v6 = vmul.f32 %v4188_v7, %v4188_v7 }
 0x1cb   : > { %v2349_v57 = vadd.f32 %v2348_v21, %v2222_v42  ;;  %v2088_v16 = vadd.f32 %v2087_v5, %v4178_v4  ;;  %v2238_v21 = vmul.f32 %v3909_v46, %v3909_v46 }
 0x1cd   : > { %v2089_v37 = vadd.f32 %v4179_v29, %v2088_v16  ;;  %v2350_v61 = vadd.f32 %v2349_v57, %v2223_v3  ;;  %v2240_v16 = vmul.f32 %v3906_v15, %v3906_v15 }
 0x1cf   : > { %v2351_v13 = vadd.f32 %v2350_v61, %v2224_v23  ;;  %v2090_v11 = vadd.f32 %v4180_v32, %v2089_v37  ;;  %v2241_v23 = vmul.f32 %v3914_v19, %v3914_v19 }
 0x1d1   : > { %v2091_v43 = vadd.f32 %v2090_v11, %v4181_v53  ;;  %v2352_v31 = vadd.f32 %v2351_v13, %v2225_v14 }
 0x1d3   : > { %v2353_v0 = vadd.f32 %v2352_v31, %v2226_v50  ;;  %v2092_v26 = vadd.f32 %v2091_v43, %v4182_v1 }
 0x1d5   : > { %v2093_v55 = vadd.f32 %v4183_v44, %v2092_v26  ;;  %v2354_v63 = vadd.f32 %v2353_v0, %v2227_v35 }
 0x1d7   : > { %v2355_v33 = vadd.f32 %v2354_v63, %v2228_v58  ;;  %v2094_v45 = vadd.f32 %v4184_v2, %v2093_v55 }
 0x1d9   : > { %v2095_v47 = vadd.f32 %v2094_v45, %v3877_v40  ;;  %v2356_v18 = vadd.f32 %v2355_v33, %v2229_v20 }
 0x1db   : > { %v2357_v12 = vadd.f32 %v2356_v18, %v2230_v48  ;;  %v2096_v60 = vadd.f32 %v2095_v47, %v4185_v25 }
 0x1dd   : > { %v2097_v8 = vadd.f32 %v4186_v56, %v2096_v60  ;;  %v2358_v9 = vadd.f32 %v2357_v12, %v2231_v36 }
 0x1df   : > { %v2359_v38 = vadd.f32 %v2358_v9, %v2232_v22  ;;  %v2098_v34 = vadd.f32 %v4187_v39, %v2097_v8 }
 0x1e1   : > { %v2099_v40 = vadd.f32 %v2098_v34, %v3893_v41  ;;  %v2360_v59 = vadd.f32 %v2359_v38, %v2233_v10 }
 0x1e3   : > { %v2361_v54 = vadd.f32 %v2360_v59, %v2234_v17  ;;  %v2100_v51 = vadd.f32 %v2099_v40, %v3900_v62 }
 0x1e5   : > { %v2101_v28 = vadd.f32 %v3890_v49, %v2100_v51  ;;  %v2362_v27 = vadd.f32 %v2361_v54, %v2235_v52  ;;  %v2239_v49 = vmul.f32 %v3921_v30, %v3921_v30 }
 0x1e7   : > { %v2363_v5 = vadd.f32 %v2362_v27, %v2236_v24  ;;  %v2102_v41 = vadd.f32 %v4188_v7, %v2101_v28 }
 0x1e9   : > { %v2103_v42 = vadd.f32 %v2102_v41, %v3909_v46  ;;  %v2364_v57 = vadd.f32 %v2363_v5, %v2237_v6 }
 0x1eb   : > { %v2365_v62 = vadd.f32 %v2364_v57, %v2238_v21  ;;  %v2104_v4 = vadd.f32 %v2103_v42, %v3921_v30 }
 0x1ed   : > { %v2105_v3 = vadd.f32 %v3906_v15, %v2104_v4  ;;  %v2366_v29 = vadd.f32 %v2365_v62, %v2239_v49 }
 0x1ef   : > { %v2106_v37 = vadd.f32 %v3914_v19, %v2105_v3  ;;  %v2367_v46 = vadd.f32 %v2366_v29, %v2240_v16 }
 0x1f1   : > { %v2107_v61 = vrot.slane %v2106_v37, 4  ;;  %v2368_v32 = vadd.f32 %v2367_v46, %v2241_v23 }
 0x1f3   : > { %v2108_v14 = vadd.f32 %v2107_v61, %v2106_v37  ;;  %v2369_v13 = vrot.slane %v2368_v32, 4 }
 0x1f5   : > { %v2109_v11 = vrot.slane %v2108_v14, 2  ;;  %v2370_v53 = vadd.f32 %v2369_v13, %v2368_v32 }
 0x1f7   : > { %v2110_v30 = vadd.f32 %v2109_v11, %v2108_v14  ;;  %v2371_v43 = vrot.slane %v2370_v53, 2 }
 0x1f9   : > { %v2111_v50 = vrot.slane %v2110_v30, 1  ;;  %v2372_v31 = vadd.f32 %v2371_v43, %v2370_v53 }
 0x1fb   : > { %v2112_v15 = vadd.f32 %v2111_v50, %v2110_v30  ;;  %v2373_v0 = vrot.slane %v2372_v31, 1 }
 0x1fd   : > { %2113 = vst [vmem:[%s214_s19] sm:$0x1] %v2112_v15  ;;  %v2374_v19 = vadd.f32 %v2373_v0, %v2372_v31 }
 0x1ff   : > { %2375 = vst [vmem:[%s217_s22] sm:$0x1] %v2374_v19 }
 0x200 PF: > { %s15_s15 = sadd.s32 1, %s3522_s15  }
 0x201   : > { %p12_p5 = scmp.ge.s32.totalorder %s15_s15, 4  }
 0x203   :  { %14 = sbr.rel (!%p12_p5) target bundleno = 1 (0x1), region = 82 }

// kernel: decoder_block_forward.7
= control target key start
LH: loop header
LB: loop body
LE: loop exit
PB: predicated region body
PF: predicated region fallthrough
CT: control target
= control target key end

     0   :  { %s4167_s12 = smov 0   ;;  %s5834_s0 = inlined_call_operand.vmem [shape: bf16[2048,128], index: 0, kind: input, shape index: {}]   ;;  %s5835_s1 = inlined_call_operand.vmem [shape: bf16[2048,8], index: 1, kind: input, shape index: {}]   ;;  %s5836_s2 = inlined_call_operand.vmem [shape: f32[8,128], index: 2, kind: input, shape index: {}]   ;;  %s5837_s3 = inlined_call_operand.vmem [shape: bf16[2048,128], index: 3, kind: output, shape index: {}]  }
   0x1 LB: > { %s2579_s13 = sadd.s32 4294967295, %s4145_s12   ;;  %p2583_p0 = scmp.ge.s32.totalorder %s4145_s12, 1  ;;  %s4145_s12 = sphi %s4167_s12, %s13_s12  }
   0x2   : > { %p149_p1 = scmp.lt.s32.totalorder %s4145_s12, 3 }
   0x4   : > { %p150_p2 = pnand %p2583_p0, %p149_p1 }
   0x6   : > { %153 = sbr.rel (%p150_p2) target bundleno = 293 (0x125), region = 32 }
   0xb   : > { %s2584_s14 = sshll.u32 %s2579_s13, 7  ;;  %v4192_v0 = vld [vmem:[%s5836_s2] ss:$0 sm:$0xff]  ;;  %v4203_v11 = vld [vmem:[%s5836_s2 + $0x1] ss:$0 sm:$0xff]  ;;  %vm2382_vm0 = vcmask 60416  }
   0xc   : > { %p179_p3 = scmp.lt.s32.totalorder %s2584_s14, 255 }
   0xe   : > { %s6281_s14 = smov (!%p179_p3, %s2584_s14), 255 }
   0xf   : > { %s4175_s15 = sshll.u32 %s6281_s14, 2 }
  0x10   : > { %s4181_s18 = scalar_lea.vmem %s5834_s0, %s4175_s15  ;;  %s4187_s21 = scalar_lea.vmem %s5835_s1, %s4175_s15 }
  0x11   : > { %v3107_v1 = vld [vmem:[%s4181_s18] sm:$0xff]   ;;  %v3938_v3 = vld [vmem:[%s4181_s18 + $0x8] sm:$0xff]   ;;  %v3939_v9 = vld [vmem:[%s4181_s18 + $0x10] sm:$0xff]   ;;  %s4222_s28 = scalar_lea.vmem %s5837_s3, %s4175_s15 }
  0x12   : > { %v3683_v2 = vld [vmem:[%s4187_s21] sm:$0xff]   ;;  %v3108_v4 = vunpack.c.l.bf16 %v3107_v1  ;;  %v3109_v5 = vunpack.c.h.bf16 %v3107_v1  ;;  %v4064_v8 = vld [vmem:[%s4187_s21 + $0x8] sm:$0xff]   ;;  %v4065_v10 = vld [vmem:[%s4187_s21 + $0x10] sm:$0xff]   ;;  %v3112_v12 = vunpack.c.l.bf16 %v3938_v3  ;;  %v3113_v13 = vunpack.c.h.bf16 %v3938_v3 }
  0x13   : > { %v3684_v6 = vunpack.c.l.bf16 %v3683_v2  ;;  %v3685_v7 = vunpack.c.h.bf16 %v3683_v2  ;;  %v3688_v14 = vunpack.c.l.bf16 %v4064_v8  ;;  %v3689_v15 = vunpack.c.h.bf16 %v4064_v8  ;;  %v3940_v20 = vld [vmem:[%s4181_s18 + $0x18] sm:$0xff]   ;;  %v3941_v53 = vld [vmem:[%s4181_s18 + $0x20] sm:$0xff]   ;;  %v3942_v63 = vld [vmem:[%s4181_s18 + $0x28] sm:$0xff]  }
  0x14   : > { %v458_v16 = vmul.f32 %v3108_v4, %v4192_v0  ;;  %v459_v17 = vmul.f32 %v3109_v5, %v4192_v0  ;;  %v3116_v18 = vunpack.c.l.bf16 %v3939_v9  ;;  %v3117_v19 = vunpack.c.h.bf16 %v3939_v9  ;;  %v4066_v49 = vld [vmem:[%s4187_s21 + $0x18] sm:$0xff]   ;;  %v4067_v58 = vld [vmem:[%s4187_s21 + $0x20] sm:$0xff]   ;;  %v4084_v1 = vld [vmem:[%s4187_s21 + $0xa8] sm:$0xff]  }
  0x15   : > { %v460_v21 = vmul.f32 %v3112_v12, %v4192_v0  ;;  %v461_v22 = vmul.f32 %v3113_v13, %v4192_v0  ;;  %v3692_v23 = vunpack.c.l.bf16 %v4065_v10  ;;  %v3693_v24 = vunpack.c.h.bf16 %v4065_v10 }
  0x16   : > { %v590_v25 = vadd.f32 %v4203_v11, %v458_v16  ;;  %v591_v26 = vadd.f32 %v4203_v11, %v459_v17  ;;  %v462_v27 = vmul.f32 %v3116_v18, %v4192_v0  ;;  %v463_v28 = vmul.f32 %v3117_v19, %v4192_v0 }
  0x17   : > { %v592_v29 = vadd.f32 %v4203_v11, %v460_v21  ;;  %v593_v30 = vadd.f32 %v4203_v11, %v461_v22  ;;  %v3120_v31 = vunpack.c.l.bf16 %v3940_v20  ;;  %v3121_v32 = vunpack.c.h.bf16 %v3940_v20 }
  0x18   : > { %v718_v33 = vmax.f32 %v590_v25, 0.0  ;;  %v719_v34 = vmax.f32 %v591_v26, 0.0  ;;  %v594_v35 = vadd.f32 %v4203_v11, %v462_v27  ;;  %v595_v36 = vadd.f32 %v4203_v11, %v463_v28 }
  0x19   : > { %v720_v37 = vmax.f32 %v592_v29, 0.0  ;;  %v721_v38 = vmax.f32 %v593_v30, 0.0  ;;  %v464_v39 = vmul.f32 %v3120_v31, %v4192_v0  ;;  %v465_v40 = vmul.f32 %v3121_v32, %v4192_v0 }
  0x1a   : > { %v3365_v41 = vpack.c.bf16 %v719_v34, %v718_v33  ;;  %v4226_v42 = vadd.f32 %v3684_v6, %v718_v33  ;;  %v4228_v43 = vadd.f32 %v3685_v7, %v719_v34  ;;  %v722_v44 = vmax.f32 %v594_v35, 0.0  ;;  %v3944_v33 = vld [vmem:[%s4181_s18 + $0x38] sm:$0xff]  }
  0x1b   : > { %v3370_v45 = vpack.c.bf16 %v721_v38, %v720_v37  ;;  %v4230_v46 = vadd.f32 %v3688_v14, %v720_v37  ;;  %v4232_v47 = vadd.f32 %v3689_v15, %v721_v38  ;;  %v723_v48 = vmax.f32 %v595_v36, 0.0  ;;  %v4068_v14 = vld [vmem:[%s4187_s21 + $0x28] sm:$0xff]   ;;  %v3943_v15 = vld [vmem:[%s4181_s18 + $0x30] sm:$0xff]  }
  0x1c   : > { %3366 = vst [vmem:[%s4222_s28] sm:$0xff] %v3365_v41   ;;  %v4238_v51 = vadd.f32 %v3692_v23, %v722_v44  ;;  %v596_v52 = vadd.f32 %v4203_v11, %v464_v39  ;;  %v597_v60 = vadd.f32 %v4203_v11, %v465_v40  ;;  %v3696_v62 = vunpack.c.l.bf16 %v4066_v49 }
  0x1d   : > { %4001 = vst [vmem:[%s4222_s28 + $0x8] sm:$0xff] %v3370_v45   ;;  %v3375_v56 = vpack.c.bf16 %v723_v48, %v722_v44  ;;  %v4247_v57 = vadd.f32 %v3693_v24, %v723_v48  ;;  %v3697_v2 = vunpack.c.h.bf16 %v4066_v49  ;;  %v3124_v3 = vunpack.c.l.bf16 %v3941_v53  ;;  %v4069_v24 = vld [vmem:[%s4187_s21 + $0x30] sm:$0xff]  }
  0x1e   : > { %v724_v61 = vmax.f32 %v596_v52, 0.0  ;;  %v3125_v4 = vunpack.c.h.bf16 %v3941_v53  ;;  %v725_v6 = vmax.f32 %v597_v60, 0.0  ;;  %v3700_v8 = vunpack.c.l.bf16 %v4067_v58  ;;  %v4070_v60 = vld [vmem:[%s4187_s21 + $0x38] sm:$0xff]  }
  0x1f   : > { %4002 = vst [vmem:[%s4222_s28 + $0x10] sm:$0xff] %v3375_v56   ;;  %v466_v9 = vmul.f32 %v3124_v3, %v4192_v0  ;;  %v3128_v12 = vunpack.c.l.bf16 %v3942_v63  ;;  %v3129_v13 = vunpack.c.h.bf16 %v3942_v63  ;;  %v3701_v19 = vunpack.c.h.bf16 %v4067_v58  ;;  %v3945_v3 = vld [vmem:[%s4181_s18 + $0x40] sm:$0xff]   ;;  %v4082_v52 = vld [vmem:[%s4187_s21 + $0x98] sm:$0xff]  }
  0x20   : > { %v4259_v7 = vadd.f32 %v3696_v62, %v724_v61  ;;  %v467_v10 = vmul.f32 %v3125_v4, %v4192_v0  ;;  %v3380_v16 = vpack.c.bf16 %v725_v6, %v724_v61  ;;  %v4265_v17 = vadd.f32 %v3697_v2, %v725_v6 }
  0x21   : > { %v598_v20 = vadd.f32 %v4203_v11, %v466_v9  ;;  %v468_v22 = vmul.f32 %v3128_v12, %v4192_v0  ;;  %v469_v23 = vmul.f32 %v3129_v13, %v4192_v0  ;;  %v3704_v25 = vunpack.c.l.bf16 %v4068_v14 }
  0x22   : > { %v599_v21 = vadd.f32 %v4203_v11, %v467_v10  ;;  %4003 = vst [vmem:[%s4222_s28 + $0x18] sm:$0xff] %v3380_v16   ;;  %v3705_v26 = vunpack.c.h.bf16 %v4068_v14  ;;  %v3132_v27 = vunpack.c.l.bf16 %v3943_v15  ;;  %v3133_v28 = vunpack.c.h.bf16 %v3943_v15  ;;  %v4071_v15 = vld [vmem:[%s4187_s21 + $0x40] sm:$0xff]  }
  0x23   : > { %v726_v29 = vmax.f32 %v598_v20, 0.0  ;;  %v600_v31 = vadd.f32 %v4203_v11, %v468_v22  ;;  %v601_v32 = vadd.f32 %v4203_v11, %v469_v23  ;;  %v3708_v36 = vunpack.c.l.bf16 %v4069_v24  ;;  %v3946_v22 = vld [vmem:[%s4181_s18 + $0x48] sm:$0xff]  }
  0x24   : > { %v727_v30 = vmax.f32 %v599_v21, 0.0  ;;  %v470_v34 = vmul.f32 %v3132_v27, %v4192_v0  ;;  %v471_v35 = vmul.f32 %v3133_v28, %v4192_v0  ;;  %v3709_v37 = vunpack.c.h.bf16 %v4069_v24 }
  0x25   : > { %v4280_v39 = vadd.f32 %v3700_v8, %v726_v29  ;;  %v728_v41 = vmax.f32 %v600_v31, 0.0  ;;  %v729_v44 = vmax.f32 %v601_v32, 0.0  ;;  %v3136_v49 = vunpack.c.l.bf16 %v3944_v33  ;;  %v4072_v31 = vld [vmem:[%s4187_s21 + $0x48] sm:$0xff]  }
  0x26   : > { %v3385_v38 = vpack.c.bf16 %v727_v30, %v726_v29  ;;  %v4282_v40 = vadd.f32 %v3701_v19, %v727_v30  ;;  %v602_v45 = vadd.f32 %v4203_v11, %v470_v34  ;;  %v603_v48 = vadd.f32 %v4203_v11, %v471_v35 }
  0x27   : > { %v4291_v56 = vadd.f32 %v3704_v25, %v728_v41  ;;  %v3137_v58 = vunpack.c.h.bf16 %v3944_v33  ;;  %v3390_v61 = vpack.c.bf16 %v729_v44, %v728_v41  ;;  %v4294_v62 = vadd.f32 %v3705_v26, %v729_v44  ;;  %v3954_v25 = vld [vmem:[%s4181_s18 + $0x88] sm:$0xff]  }
  0x28   : > { %4004 = vst [vmem:[%s4222_s28 + $0x20] sm:$0xff] %v3385_v38   ;;  %v730_v63 = vmax.f32 %v602_v45, 0.0  ;;  %v731_v2 = vmax.f32 %v603_v48, 0.0  ;;  %v472_v8 = vmul.f32 %v3136_v49, %v4192_v0  ;;  %v3712_v14 = vunpack.c.l.bf16 %v4070_v60 }
  0x29   : > { %v473_v9 = vmul.f32 %v3137_v58, %v4192_v0  ;;  %4005 = vst [vmem:[%s4222_s28 + $0x28] sm:$0xff] %v3390_v61   ;;  %v3713_v20 = vunpack.c.h.bf16 %v4070_v60  ;;  %v3140_v21 = vunpack.c.l.bf16 %v3945_v3  ;;  %v3141_v26 = vunpack.c.h.bf16 %v3945_v3  ;;  %v4073_v60 = vld [vmem:[%s4187_s21 + $0x50] sm:$0xff]   ;;  %v4079_v61 = vld [vmem:[%s4187_s21 + $0x80] sm:$0xff]  }
  0x2a   : > { %v3395_v10 = vpack.c.bf16 %v731_v2, %v730_v63  ;;  %v4304_v12 = vadd.f32 %v3708_v36, %v730_v63  ;;  %v4306_v13 = vadd.f32 %v3709_v37, %v731_v2  ;;  %v604_v16 = vadd.f32 %v4203_v11, %v472_v8  ;;  %v3947_v36 = vld [vmem:[%s4181_s18 + $0x50] sm:$0xff]  }
  0x2b   : > { %v605_v19 = vadd.f32 %v4203_v11, %v473_v9  ;;  %v474_v29 = vmul.f32 %v3140_v21, %v4192_v0  ;;  %v3716_v30 = vunpack.c.l.bf16 %v4071_v15  ;;  %v475_v32 = vmul.f32 %v3141_v26, %v4192_v0 }
  0x2c   : > { %4006 = vst [vmem:[%s4222_s28 + $0x30] sm:$0xff] %v3395_v10   ;;  %v732_v27 = vmax.f32 %v604_v16, 0.0  ;;  %v3717_v33 = vunpack.c.h.bf16 %v4071_v15  ;;  %v3144_v34 = vunpack.c.l.bf16 %v3946_v22  ;;  %v3145_v35 = vunpack.c.h.bf16 %v3946_v22  ;;  %v3948_v15 = vld [vmem:[%s4181_s18 + $0x58] sm:$0xff]  }
  0x2d   : > { %v733_v28 = vmax.f32 %v605_v19, 0.0  ;;  %v606_v44 = vadd.f32 %v4203_v11, %v474_v29  ;;  %v607_v45 = vadd.f32 %v4203_v11, %v475_v32  ;;  %v3720_v58 = vunpack.c.l.bf16 %v4072_v31 }
  0x2e   : > { %v4323_v38 = vadd.f32 %v3712_v14, %v732_v27  ;;  %v476_v48 = vmul.f32 %v3144_v34, %v4192_v0  ;;  %v477_v49 = vmul.f32 %v3145_v35, %v4192_v0  ;;  %v3721_v2 = vunpack.c.h.bf16 %v4072_v31  ;;  %v4074_v35 = vld [vmem:[%s4187_s21 + $0x58] sm:$0xff]  }
  0x2f   : > { %v3400_v37 = vpack.c.bf16 %v733_v28, %v732_v27  ;;  %v4325_v41 = vadd.f32 %v3713_v20, %v733_v28  ;;  %v734_v63 = vmax.f32 %v606_v44, 0.0  ;;  %v3148_v3 = vunpack.c.l.bf16 %v3947_v36 }
  0x30   : > { %v735_v8 = vmax.f32 %v607_v45, 0.0  ;;  %v608_v9 = vadd.f32 %v4203_v11, %v476_v48  ;;  %v609_v10 = vadd.f32 %v4203_v11, %v477_v49  ;;  %v3149_v14 = vunpack.c.h.bf16 %v3947_v36 }
  0x31   : > { %4007 = vst [vmem:[%s4222_s28 + $0x38] sm:$0xff] %v3400_v37   ;;  %v4340_v19 = vadd.f32 %v3716_v30, %v734_v63  ;;  %v478_v20 = vmul.f32 %v3148_v3, %v4192_v0  ;;  %v3724_v21 = vunpack.c.l.bf16 %v4073_v60  ;;  %v3725_v32 = vunpack.c.h.bf16 %v4073_v60  ;;  %v4075_v60 = vld [vmem:[%s4187_s21 + $0x60] sm:$0xff]   ;;  %v4076_v3 = vld [vmem:[%s4187_s21 + $0x68] sm:$0xff]  }
  0x32   : > { %v3405_v22 = vpack.c.bf16 %v735_v8, %v734_v63  ;;  %v4343_v26 = vadd.f32 %v3717_v33, %v735_v8  ;;  %v736_v27 = vmax.f32 %v608_v9, 0.0  ;;  %v737_v28 = vmax.f32 %v609_v10, 0.0  ;;  %v3949_v63 = vld [vmem:[%s4181_s18 + $0x60] sm:$0xff]  }
  0x33   : > { %v479_v29 = vmul.f32 %v3149_v14, %v4192_v0  ;;  %v610_v31 = vadd.f32 %v4203_v11, %v478_v20  ;;  %v3152_v34 = vunpack.c.l.bf16 %v3948_v15  ;;  %v3153_v48 = vunpack.c.h.bf16 %v3948_v15  ;;  %v3950_v20 = vld [vmem:[%s4181_s18 + $0x68] sm:$0xff]  }
  0x34   : > { %4008 = vst [vmem:[%s4222_s28 + $0x40] sm:$0xff] %v3405_v22   ;;  %v3410_v36 = vpack.c.bf16 %v737_v28, %v736_v27  ;;  %v4351_v37 = vadd.f32 %v3720_v58, %v736_v27  ;;  %v4353_v33 = vadd.f32 %v3721_v2, %v737_v28  ;;  %v3728_v2 = vunpack.c.l.bf16 %v4074_v35 }
  0x35   : > { %v611_v44 = vadd.f32 %v4203_v11, %v479_v29  ;;  %v738_v45 = vmax.f32 %v610_v31, 0.0  ;;  %v480_v49 = vmul.f32 %v3152_v34, %v4192_v0  ;;  %v481_v14 = vmul.f32 %v3153_v48, %v4192_v0 }
  0x36   : > { %4009 = vst [vmem:[%s4222_s28 + $0x48] sm:$0xff] %v3410_v36   ;;  %v3729_v22 = vunpack.c.h.bf16 %v4074_v35  ;;  %v3156_v27 = vunpack.c.l.bf16 %v3949_v63  ;;  %v3157_v28 = vunpack.c.h.bf16 %v3949_v63  ;;  %v3732_v29 = vunpack.c.l.bf16 %v4075_v60 }
  0x37   : > { %v739_v9 = vmax.f32 %v611_v44, 0.0  ;;  %v4366_v10 = vadd.f32 %v3724_v21, %v738_v45  ;;  %v612_v15 = vadd.f32 %v4203_v11, %v480_v49  ;;  %v613_v36 = vadd.f32 %v4203_v11, %v481_v14 }
  0x38   : > { %v3733_v44 = vunpack.c.h.bf16 %v4075_v60  ;;  %v482_v58 = vmul.f32 %v3156_v27, %v4192_v0  ;;  %v483_v48 = vmul.f32 %v3157_v28, %v4192_v0  ;;  %v3160_v8 = vunpack.c.l.bf16 %v3950_v20 }
  0x39   : > { %v3415_v31 = vpack.c.bf16 %v739_v9, %v738_v45  ;;  %v4371_v34 = vadd.f32 %v3725_v32, %v739_v9  ;;  %v740_v21 = vmax.f32 %v612_v15, 0.0  ;;  %v741_v32 = vmax.f32 %v613_v36, 0.0  ;;  %v3951_v15 = vld [vmem:[%s4181_s18 + $0x70] sm:$0xff]  }
  0x3a   : > { %v3161_v49 = vunpack.c.h.bf16 %v3950_v20  ;;  %v614_v60 = vadd.f32 %v4203_v11, %v482_v58  ;;  %v615_v9 = vadd.f32 %v4203_v11, %v483_v48  ;;  %v484_v14 = vmul.f32 %v3160_v8, %v4192_v0 }
  0x3b   : > { %4010 = vst [vmem:[%s4222_s28 + $0x50] sm:$0xff] %v3415_v31   ;;  %v4382_v63 = vadd.f32 %v3728_v2, %v740_v21  ;;  %v3420_v27 = vpack.c.bf16 %v741_v32, %v740_v21  ;;  %v4388_v28 = vadd.f32 %v3729_v22, %v741_v32  ;;  %v3736_v35 = vunpack.c.l.bf16 %v4076_v3  ;;  %v4077_v22 = vld [vmem:[%s4187_s21 + $0x70] sm:$0xff]  }
  0x3c   : > { %v485_v31 = vmul.f32 %v3161_v49, %v4192_v0  ;;  %v742_v45 = vmax.f32 %v614_v60, 0.0  ;;  %v743_v30 = vmax.f32 %v615_v9, 0.0  ;;  %v616_v20 = vadd.f32 %v4203_v11, %v484_v14 }
  0x3d   : > { %v3737_v2 = vunpack.c.h.bf16 %v4076_v3  ;;  %4011 = vst [vmem:[%s4222_s28 + $0x58] sm:$0xff] %v3420_v27   ;;  %v3164_v36 = vunpack.c.l.bf16 %v3951_v15  ;;  %v3165_v21 = vunpack.c.h.bf16 %v3951_v15  ;;  %v3749_v23 = vunpack.c.h.bf16 %v4079_v61 }
  0x3e   : > { %v617_v8 = vadd.f32 %v4203_v11, %v485_v31  ;;  %v3425_v48 = vpack.c.bf16 %v743_v30, %v742_v45  ;;  %v4397_v32 = vadd.f32 %v3732_v29, %v742_v45  ;;  %v4399_v49 = vadd.f32 %v3733_v44, %v743_v30  ;;  %v3952_v31 = vld [vmem:[%s4181_s18 + $0x78] sm:$0xff]  }
  0x3f   : > { %v744_v60 = vmax.f32 %v616_v20, 0.0  ;;  %v486_v14 = vmul.f32 %v3164_v36, %v4192_v0  ;;  %v487_v27 = vmul.f32 %v3165_v21, %v4192_v0  ;;  %v3740_v30 = vunpack.c.l.bf16 %v4077_v22  ;;  %v4078_v45 = vld [vmem:[%s4187_s21 + $0x78] sm:$0xff]   ;;  %v3953_v21 = vld [vmem:[%s4181_s18 + $0x80] sm:$0xff]  }
  0x40   : > { %v745_v9 = vmax.f32 %v617_v8, 0.0  ;;  %4012 = vst [vmem:[%s4222_s28 + $0x60] sm:$0xff] %v3425_v48   ;;  %v3741_v44 = vunpack.c.h.bf16 %v4077_v22  ;;  %v3168_v15 = vunpack.c.l.bf16 %v3952_v31  ;;  %v3169_v3 = vunpack.c.h.bf16 %v3952_v31 }
  0x41   : > { %v4409_v29 = vadd.f32 %v3736_v35, %v744_v60  ;;  %v618_v8 = vadd.f32 %v4203_v11, %v486_v14  ;;  %v619_v36 = vadd.f32 %v4203_v11, %v487_v27  ;;  %v3172_v16 = vunpack.c.l.bf16 %v3953_v21 }
  0x42   : > { %v3430_v20 = vpack.c.bf16 %v745_v9, %v744_v60  ;;  %v4412_v58 = vadd.f32 %v3737_v2, %v745_v9  ;;  %v3744_v9 = vunpack.c.l.bf16 %v4078_v45  ;;  %v488_v14 = vmul.f32 %v3168_v15, %v4192_v0 }
  0x43   : > { %v746_v22 = vmax.f32 %v618_v8, 0.0  ;;  %v747_v60 = vmax.f32 %v619_v36, 0.0  ;;  %v489_v27 = vmul.f32 %v3169_v3, %v4192_v0  ;;  %v3173_v48 = vunpack.c.h.bf16 %v3953_v21  ;;  %v4080_v3 = vld [vmem:[%s4187_s21 + $0x88] sm:$0xff]  }
  0x44   : > { %4013 = vst [vmem:[%s4222_s28 + $0x68] sm:$0xff] %v3430_v20   ;;  %v3745_v20 = vunpack.c.h.bf16 %v4078_v45  ;;  %v620_v8 = vadd.f32 %v4203_v11, %v488_v14  ;;  %v490_v2 = vmul.f32 %v3172_v16, %v4192_v0  ;;  %v3955_v16 = vld [vmem:[%s4181_s18 + $0x90] sm:$0xff]   ;;  %v3752_v6 = vunpack.c.l.bf16 %v4080_v3 }
  0x45   : > { %v3435_v35 = vpack.c.bf16 %v747_v60, %v746_v22  ;;  %v4428_v24 = vadd.f32 %v3740_v30, %v746_v22  ;;  %v4430_v31 = vadd.f32 %v3741_v44, %v747_v60  ;;  %v621_v36 = vadd.f32 %v4203_v11, %v489_v27 }
  0x46   : > { %v491_v15 = vmul.f32 %v3173_v48, %v4192_v0  ;;  %v3748_v44 = vunpack.c.l.bf16 %v4079_v61  ;;  %v3176_v22 = vunpack.c.l.bf16 %v3954_v25  ;;  %v748_v60 = vmax.f32 %v620_v8, 0.0 }
  0x47   : > { %4014 = vst [vmem:[%s4222_s28 + $0x70] sm:$0xff] %v3435_v35   ;;  %v749_v45 = vmax.f32 %v621_v36, 0.0  ;;  %v622_v14 = vadd.f32 %v4203_v11, %v490_v2  ;;  %v3177_v48 = vunpack.c.h.bf16 %v3954_v25  ;;  %v3768_v55 = vunpack.c.l.bf16 %v4084_v1 }
  0x48   : > { %v623_v27 = vadd.f32 %v4203_v11, %v491_v15  ;;  %v492_v35 = vmul.f32 %v3176_v22, %v4192_v0  ;;  %v4446_v4 = vadd.f32 %v3744_v9, %v748_v60  ;;  %v3180_v15 = vunpack.c.l.bf16 %v3955_v16 }
  0x49   : > { %v3440_v21 = vpack.c.bf16 %v749_v45, %v748_v60  ;;  %v4448_v30 = vadd.f32 %v3745_v20, %v749_v45  ;;  %v750_v8 = vmax.f32 %v622_v14, 0.0  ;;  %v493_v53 = vmul.f32 %v3177_v48, %v4192_v0  ;;  %v4081_v60 = vld [vmem:[%s4187_s21 + $0x90] sm:$0xff]   ;;  %v3956_v48 = vld [vmem:[%s4181_s18 + $0x98] sm:$0xff]  }
  0x4a   : > { %v751_v36 = vmax.f32 %v623_v27, 0.0  ;;  %v624_v2 = vadd.f32 %v4203_v11, %v492_v35  ;;  %v3753_v22 = vunpack.c.h.bf16 %v4080_v3  ;;  %v3181_v9 = vunpack.c.h.bf16 %v3955_v16  ;;  %v3957_v35 = vld [vmem:[%s4181_s18 + $0xa0] sm:$0xff]  }
  0x4b   : > { %4015 = vst [vmem:[%s4222_s28 + $0x78] sm:$0xff] %v3440_v21   ;;  %v4455_v61 = vadd.f32 %v3748_v44, %v750_v8  ;;  %v625_v14 = vadd.f32 %v4203_v11, %v493_v53  ;;  %v494_v44 = vmul.f32 %v3180_v15, %v4192_v0  ;;  %v3757_v53 = vunpack.c.h.bf16 %v4081_v60 }
  0x4c   : > { %v3445_v20 = vpack.c.bf16 %v751_v36, %v750_v8  ;;  %v4458_v45 = vadd.f32 %v3749_v23, %v751_v36  ;;  %v752_v27 = vmax.f32 %v624_v2, 0.0  ;;  %v495_v3 = vmul.f32 %v3181_v9, %v4192_v0 }
  0x4d   : > { %v753_v16 = vmax.f32 %v625_v14, 0.0  ;;  %v3756_v8 = vunpack.c.l.bf16 %v4081_v60  ;;  %v626_v36 = vadd.f32 %v4203_v11, %v494_v44  ;;  %v3184_v25 = vunpack.c.l.bf16 %v3956_v48 }
  0x4e   : > { %4016 = vst [vmem:[%s4222_s28 + $0x80] sm:$0xff] %v3445_v20   ;;  %v4469_v23 = vadd.f32 %v3752_v6, %v752_v27  ;;  %v627_v2 = vadd.f32 %v4203_v11, %v495_v3  ;;  %v3185_v21 = vunpack.c.h.bf16 %v3956_v48  ;;  %v3760_v15 = vunpack.c.l.bf16 %v4082_v52 }
  0x4f   : > { %v3450_v9 = vpack.c.bf16 %v753_v16, %v752_v27  ;;  %v4477_v20 = vadd.f32 %v3753_v22, %v753_v16  ;;  %v754_v60 = vmax.f32 %v626_v36, 0.0  ;;  %v496_v44 = vmul.f32 %v3184_v25, %v4192_v0  ;;  %v4083_v16 = vld [vmem:[%s4187_s21 + $0xa0] sm:$0xff]   ;;  %v3958_v25 = vld [vmem:[%s4181_s18 + $0xa8] sm:$0xff]  }
  0x50   : > { %v755_v14 = vmax.f32 %v627_v2, 0.0  ;;  %v497_v3 = vmul.f32 %v3185_v21, %v4192_v0  ;;  %v3188_v27 = vunpack.c.l.bf16 %v3957_v35  ;;  %v3189_v22 = vunpack.c.h.bf16 %v3957_v35 }
  0x51   : > { %4017 = vst [vmem:[%s4222_s28 + $0x88] sm:$0xff] %v3450_v9   ;;  %v4487_v5 = vadd.f32 %v3756_v8, %v754_v60  ;;  %v628_v36 = vadd.f32 %v4203_v11, %v496_v44  ;;  %v3761_v2 = vunpack.c.h.bf16 %v4082_v52  ;;  %v3192_v52 = vunpack.c.l.bf16 %v3958_v25 }
  0x52   : > { %v3455_v18 = vpack.c.bf16 %v755_v14, %v754_v60  ;;  %v4489_v6 = vadd.f32 %v3757_v53, %v755_v14  ;;  %v629_v21 = vadd.f32 %v4203_v11, %v497_v3  ;;  %v498_v9 = vmul.f32 %v3188_v27, %v4192_v0  ;;  %v3959_v3 = vld [vmem:[%s4181_s18 + $0xb0] sm:$0xff]  }
  0x53   : > { %5998 = vst [vmem:[#allocation2_spill] sm:$0xff] %v4487_v5  ;;  %v499_v48 = vmul.f32 %v3189_v22, %v4192_v0  ;;  %v756_v8 = vmax.f32 %v628_v36, 0.0  ;;  %v3764_v60 = vunpack.c.l.bf16 %v4083_v16  ;;  %v3765_v53 = vunpack.c.h.bf16 %v4083_v16  ;;  %v4085_v5 = vld [vmem:[%s4187_s21 + $0xb0] sm:$0xff]  }
  0x54   : > { %5999 = vst [vmem:[#allocation3_spill] sm:$0xff] %v4489_v6  ;;  %4018 = vst [vmem:[%s4222_s28 + $0x90] sm:$0xff] %v3455_v18   ;;  %v757_v14 = vmax.f32 %v629_v21, 0.0  ;;  %v630_v44 = vadd.f32 %v4203_v11, %v498_v9  ;;  %v3193_v18 = vunpack.c.h.bf16 %v3958_v25  ;;  %v500_v9 = vmul.f32 %v3192_v52, %v4192_v0  ;;  %v4099_v6 = vld [vmem:[%s4187_s21 + $0x120] sm:$0xff]  }
  0x55   : > { %v631_v59 = vadd.f32 %v4203_v11, %v499_v48  ;;  %v4505_v22 = vadd.f32 %v3760_v15, %v756_v8  ;;  %v3769_v54 = vunpack.c.h.bf16 %v4084_v1  ;;  %v3196_v50 = vunpack.c.l.bf16 %v3959_v3  ;;  %v3960_v1 = vld [vmem:[%s4181_s18 + $0xb8] sm:$0xff]  }
  0x56   : > { %v3460_v35 = vpack.c.bf16 %v757_v14, %v756_v8  ;;  %v4507_v36 = vadd.f32 %v3761_v2, %v757_v14  ;;  %v758_v16 = vmax.f32 %v630_v44, 0.0  ;;  %v501_v48 = vmul.f32 %v3193_v18, %v4192_v0  ;;  %v4086_v18 = vld [vmem:[%s4187_s21 + $0xb8] sm:$0xff]  }
  0x57   : > { %6000 = vst [vmem:[#allocation4_spill] sm:$0xff] %v4505_v22  ;;  %v759_v21 = vmax.f32 %v631_v59, 0.0  ;;  %v632_v59 = vadd.f32 %v4203_v11, %v500_v9  ;;  %v3197_v44 = vunpack.c.h.bf16 %v3959_v3  ;;  %v502_v52 = vmul.f32 %v3196_v50, %v4192_v0 }
  0x58   : > { %6001 = vst [vmem:[#allocation5_spill] sm:$0xff] %v4507_v36  ;;  %4019 = vst [vmem:[%s4222_s28 + $0x98] sm:$0xff] %v3460_v35   ;;  %v4515_v8 = vadd.f32 %v3764_v60, %v758_v16  ;;  %v633_v14 = vadd.f32 %v4203_v11, %v501_v48  ;;  %v3961_v48 = vld [vmem:[%s4181_s18 + $0xc0] sm:$0xff]   ;;  %v3773_v15 = vunpack.c.h.bf16 %v4085_v5  ;;  %v3200_v27 = vunpack.c.l.bf16 %v3960_v1 }
  0x59   : > { %v3465_v25 = vpack.c.bf16 %v759_v21, %v758_v16  ;;  %v4517_v2 = vadd.f32 %v3765_v53, %v759_v21  ;;  %v3772_v16 = vunpack.c.l.bf16 %v4085_v5  ;;  %v760_v21 = vmax.f32 %v632_v59, 0.0 }
  0x5a   : > { %6002 = vst [vmem:[#allocation6_spill] sm:$0xff] %v4515_v8  ;;  %v761_v9 = vmax.f32 %v633_v14, 0.0  ;;  %v503_v3 = vmul.f32 %v3197_v44, %v4192_v0  ;;  %v634_v50 = vadd.f32 %v4203_v11, %v502_v52  ;;  %v3201_v35 = vunpack.c.h.bf16 %v3960_v1 }
  0x5b   : > { %6003 = vst [vmem:[#allocation7_spill] sm:$0xff] %v4517_v2  ;;  %4020 = vst [vmem:[%s4222_s28 + $0xa0] sm:$0xff] %v3465_v25   ;;  %v3776_v25 = vunpack.c.l.bf16 %v4086_v18  ;;  %v4534_v22 = vadd.f32 %v3768_v55, %v760_v21  ;;  %v504_v53 = vmul.f32 %v3200_v27, %v4192_v0  ;;  %v3204_v52 = vunpack.c.l.bf16 %v3961_v48 }
  0x5c   : > { %v3470_v36 = vpack.c.bf16 %v761_v9, %v760_v21  ;;  %v4536_v60 = vadd.f32 %v3769_v54, %v761_v9  ;;  %v635_v59 = vadd.f32 %v4203_v11, %v503_v3  ;;  %v762_v14 = vmax.f32 %v634_v50, 0.0  ;;  %v4087_v21 = vld [vmem:[%s4187_s21 + $0xc0] sm:$0xff]  }
  0x5d   : > { %6004 = vst [vmem:[#allocation8_spill] sm:$0xff] %v4534_v22  ;;  %v505_v44 = vmul.f32 %v3201_v35, %v4192_v0  ;;  %v3777_v2 = vunpack.c.h.bf16 %v4086_v18  ;;  %v3205_v55 = vunpack.c.h.bf16 %v3961_v48  ;;  %v636_v9 = vadd.f32 %v4203_v11, %v504_v53  ;;  %v3962_v35 = vld [vmem:[%s4181_s18 + $0xc8] sm:$0xff]  }
  0x5e   : > { %6005 = vst [vmem:[#allocation9_spill] sm:$0xff] %v4536_v60  ;;  %4021 = vst [vmem:[%s4222_s28 + $0xa8] sm:$0xff] %v3470_v36   ;;  %v763_v1 = vmax.f32 %v635_v59, 0.0  ;;  %v4545_v54 = vadd.f32 %v3772_v16, %v762_v14  ;;  %v506_v27 = vmul.f32 %v3204_v52, %v4192_v0  ;;  %v3780_v53 = vunpack.c.l.bf16 %v4087_v21  ;;  %v3965_v60 = vld [vmem:[%s4181_s18 + $0xe0] sm:$0xff]  }
  0x5f   : > { %v637_v3 = vadd.f32 %v4203_v11, %v505_v44  ;;  %v507_v18 = vmul.f32 %v3205_v55, %v4192_v0  ;;  %v764_v48 = vmax.f32 %v636_v9, 0.0  ;;  %v3781_v22 = vunpack.c.h.bf16 %v4087_v21 }
  0x60   : > { %6006 = vst [vmem:[#allocation10_spill] sm:$0xff] %v4545_v54  ;;  %v3475_v50 = vpack.c.bf16 %v763_v1, %v762_v14  ;;  %v4553_v5 = vadd.f32 %v3773_v15, %v763_v1  ;;  %v638_v16 = vadd.f32 %v4203_v11, %v506_v27  ;;  %v3208_v36 = vunpack.c.l.bf16 %v3962_v35  ;;  %v4088_v15 = vld [vmem:[%s4187_s21 + $0xc8] sm:$0xff]   ;;  %v3963_v54 = vld [vmem:[%s4181_s18 + $0xd0] sm:$0xff]  }
  0x61   : > { %v765_v59 = vmax.f32 %v637_v3, 0.0  ;;  %v639_v52 = vadd.f32 %v4203_v11, %v507_v18  ;;  %v4562_v1 = vadd.f32 %v3776_v25, %v764_v48  ;;  %v3784_v18 = vunpack.c.l.bf16 %v4088_v15 }
  0x62   : > { %6007 = vst [vmem:[#allocation11_spill] sm:$0xff] %v4553_v5  ;;  %4022 = vst [vmem:[%s4222_s28 + $0xb0] sm:$0xff] %v3475_v50   ;;  %v766_v9 = vmax.f32 %v638_v16, 0.0  ;;  %v3209_v50 = vunpack.c.h.bf16 %v3962_v35  ;;  %v508_v44 = vmul.f32 %v3208_v36, %v4192_v0  ;;  %v3785_v21 = vunpack.c.h.bf16 %v4088_v15 }
  0x63   : > { %v3480_v14 = vpack.c.bf16 %v765_v59, %v764_v48  ;;  %6008 = vst [vmem:[#allocation12_spill] sm:$0xff] %v4562_v1  ;;  %v4564_v55 = vadd.f32 %v3777_v2, %v765_v59  ;;  %v767_v27 = vmax.f32 %v639_v52, 0.0  ;;  %v4089_v48 = vld [vmem:[%s4187_s21 + $0xd0] sm:$0xff]   ;;  %v3964_v52 = vld [vmem:[%s4181_s18 + $0xd8] sm:$0xff]   ;;  %v3212_v3 = vunpack.c.l.bf16 %v3963_v54 }
  0x64   : > { %v4575_v25 = vadd.f32 %v3780_v53, %v766_v9  ;;  %v509_v35 = vmul.f32 %v3209_v50, %v4192_v0  ;;  %v640_v36 = vadd.f32 %v4203_v11, %v508_v44  ;;  %v3213_v1 = vunpack.c.h.bf16 %v3963_v54  ;;  %v4090_v2 = vld [vmem:[%s4187_s21 + $0xd8] sm:$0xff]  }
  0x65   : > { %6009 = vst [vmem:[#allocation13_spill] sm:$0xff] %v4564_v55  ;;  %4023 = vst [vmem:[%s4222_s28 + $0xb8] sm:$0xff] %v3480_v14   ;;  %v3485_v59 = vpack.c.bf16 %v767_v27, %v766_v9  ;;  %v4578_v16 = vadd.f32 %v3781_v22, %v767_v27  ;;  %v3788_v27 = vunpack.c.l.bf16 %v4089_v48  ;;  %v510_v50 = vmul.f32 %v3212_v3, %v4192_v0 }
  0x66   : > { %6010 = vst [vmem:[#allocation14_spill] sm:$0xff] %v4575_v25  ;;  %v641_v22 = vadd.f32 %v4203_v11, %v509_v35  ;;  %v768_v9 = vmax.f32 %v640_v36, 0.0  ;;  %v511_v44 = vmul.f32 %v3213_v1, %v4192_v0  ;;  %v3216_v55 = vunpack.c.l.bf16 %v3964_v52 }
  0x67   : > { %6011 = vst [vmem:[#allocation15_spill] sm:$0xff] %v4578_v16  ;;  %4024 = vst [vmem:[%s4222_s28 + $0xc0] sm:$0xff] %v3485_v59   ;;  %v3217_v5 = vunpack.c.h.bf16 %v3964_v52  ;;  %v3789_v54 = vunpack.c.h.bf16 %v4089_v48  ;;  %v3792_v59 = vunpack.c.l.bf16 %v4090_v2  ;;  %v642_v53 = vadd.f32 %v4203_v11, %v510_v50  ;;  %v4091_v50 = vld [vmem:[%s4187_s21 + $0xe0] sm:$0xff]  }
  0x68   : > { %v769_v14 = vmax.f32 %v641_v22, 0.0  ;;  %v4593_v15 = vadd.f32 %v3784_v18, %v768_v9  ;;  %v643_v35 = vadd.f32 %v4203_v11, %v511_v44  ;;  %v512_v36 = vmul.f32 %v3216_v55, %v4192_v0 }
  0x69   : > { %v513_v3 = vmul.f32 %v3217_v5, %v4192_v0  ;;  %v3793_v52 = vunpack.c.h.bf16 %v4090_v2  ;;  %v3220_v22 = vunpack.c.l.bf16 %v3965_v60  ;;  %v770_v25 = vmax.f32 %v642_v53, 0.0  ;;  %v3966_v2 = vld [vmem:[%s4181_s18 + $0xe8] sm:$0xff]  }
  0x6a   : > { %6012 = vst [vmem:[#allocation16_spill] sm:$0xff] %v4593_v15  ;;  %v3490_v1 = vpack.c.bf16 %v769_v14, %v768_v9  ;;  %v4599_v16 = vadd.f32 %v3785_v21, %v769_v14  ;;  %v771_v18 = vmax.f32 %v643_v35, 0.0  ;;  %v644_v8 = vadd.f32 %v4203_v11, %v512_v36 }
  0x6b   : > { %v645_v48 = vadd.f32 %v4203_v11, %v513_v3  ;;  %v3221_v9 = vunpack.c.h.bf16 %v3965_v60  ;;  %v514_v21 = vmul.f32 %v3220_v22, %v4192_v0  ;;  %v4611_v53 = vadd.f32 %v3788_v27, %v770_v25  ;;  %v4092_v27 = vld [vmem:[%s4187_s21 + $0xe8] sm:$0xff]  }
  0x6c   : > { %6013 = vst [vmem:[#allocation17_spill] sm:$0xff] %v4599_v16  ;;  %4025 = vst [vmem:[%s4222_s28 + $0xc8] sm:$0xff] %v3490_v1   ;;  %v3495_v14 = vpack.c.bf16 %v771_v18, %v770_v25  ;;  %v4613_v44 = vadd.f32 %v3789_v54, %v771_v18  ;;  %v772_v35 = vmax.f32 %v644_v8, 0.0  ;;  %v3796_v55 = vunpack.c.l.bf16 %v4091_v50 }
  0x6d   : > { %6014 = vst [vmem:[#allocation18_spill] sm:$0xff] %v4611_v53  ;;  %v773_v36 = vmax.f32 %v645_v48, 0.0  ;;  %v515_v3 = vmul.f32 %v3221_v9, %v4192_v0  ;;  %v646_v1 = vadd.f32 %v4203_v11, %v514_v21  ;;  %v3797_v5 = vunpack.c.h.bf16 %v4091_v50  ;;  %v3967_v0 = vld [vmem:[%s4181_s18 + $0xf0] sm:$0xff]   ;;  %v4634_v50 = vld [vmem:[%s5836_s2] ss:$0 sm:$0xff]  ;;  %v3968_v9 = vld [vmem:[%s4181_s18 + $0xf8] sm:$0xff]  }
  0x6e   : > { %6015 = vst [vmem:[#allocation19_spill] sm:$0xff] %v4613_v44  ;;  %4026 = vst [vmem:[%s4222_s28 + $0xd0] sm:$0xff] %v3495_v14   ;;  %v4620_v22 = vadd.f32 %v3792_v59, %v772_v35  ;;  %v3224_v25 = vunpack.c.l.bf16 %v3966_v2  ;;  %v3225_v59 = vunpack.c.h.bf16 %v3966_v2  ;;  %v4646_v2 = vld [vmem:[%s5836_s2 + $0x1] ss:$0 sm:$0xff]  ;;  %v4093_v21 = vld [vmem:[%s4187_s21 + $0xf0] sm:$0xff]  }
  0x6f   : > { %v3500_v54 = vpack.c.bf16 %v773_v36, %v772_v35  ;;  %v4623_v18 = vadd.f32 %v3793_v52, %v773_v36  ;;  %v647_v8 = vadd.f32 %v4203_v11, %v515_v3  ;;  %v774_v48 = vmax.f32 %v646_v1, 0.0 }
  0x70   : > { %6016 = vst [vmem:[#allocation20_spill] sm:$0xff] %v4620_v22  ;;  %v516_v52 = vmul.f32 %v4634_v50, %v3224_v25  ;;  %v3800_v36 = vunpack.c.l.bf16 %v4092_v27  ;;  %v517_v3 = vmul.f32 %v4634_v50, %v3225_v59  ;;  %v3228_v25 = vunpack.c.l.bf16 %v3967_v0 }
  0x71   : > { %6017 = vst [vmem:[#allocation21_spill] sm:$0xff] %v4623_v18  ;;  %4027 = vst [vmem:[%s4222_s28 + $0xd8] sm:$0xff] %v3500_v54   ;;  %v775_v14 = vmax.f32 %v647_v8, 0.0  ;;  %v4640_v35 = vadd.f32 %v3796_v55, %v774_v48  ;;  %v3229_v54 = vunpack.c.h.bf16 %v3967_v0  ;;  %v3801_v59 = vunpack.c.h.bf16 %v4092_v27 }
  0x72   : > { %v648_v1 = vadd.f32 %v4646_v2, %v516_v52  ;;  %v649_v60 = vadd.f32 %v4646_v2, %v517_v3  ;;  %v518_v22 = vmul.f32 %v4634_v50, %v3228_v25  ;;  %v4094_v52 = vld [vmem:[%s4187_s21 + $0xf8] sm:$0xff]   ;;  %v3805_v25 = vunpack.c.h.bf16 %v4093_v21 }
  0x73   : > { %6018 = vst [vmem:[#allocation22_spill] sm:$0xff] %v4640_v35  ;;  %v3505_v11 = vpack.c.bf16 %v775_v14, %v774_v48  ;;  %v4651_v8 = vadd.f32 %v3797_v5, %v775_v14  ;;  %v519_v44 = vmul.f32 %v4634_v50, %v3229_v54  ;;  %v3804_v48 = vunpack.c.l.bf16 %v4093_v21 }
  0x74   : > { %v776_v18 = vmax.f32 %v648_v1, 0.0  ;;  %v3232_v5 = vunpack.c.l.bf16 %v3968_v9  ;;  %v3233_v14 = vunpack.c.h.bf16 %v3968_v9  ;;  %v777_v53 = vmax.f32 %v649_v60, 0.0  ;;  %v3969_v1 = vld [vmem:[%s4181_s18 + $0x100] sm:$0xff]  }
  0x75   : > { %6019 = vst [vmem:[#allocation23_spill] sm:$0xff] %v4651_v8  ;;  %4028 = vst [vmem:[%s4222_s28 + $0xe0] sm:$0xff] %v3505_v11   ;;  %v650_v27 = vadd.f32 %v4646_v2, %v518_v22  ;;  %v651_v3 = vadd.f32 %v4646_v2, %v519_v44  ;;  %v3808_v55 = vunpack.c.l.bf16 %v4094_v52  ;;  %v3809_v60 = vunpack.c.h.bf16 %v4094_v52  ;;  %v4095_v44 = vld [vmem:[%s4187_s21 + $0x100] sm:$0xff]  }
  0x76   : > { %v4662_v16 = vadd.f32 %v3800_v36, %v776_v18  ;;  %v520_v54 = vmul.f32 %v4634_v50, %v3232_v5  ;;  %v521_v11 = vmul.f32 %v4634_v50, %v3233_v14  ;;  %v3510_v0 = vpack.c.bf16 %v777_v53, %v776_v18 }
  0x77   : > { %v4669_v8 = vadd.f32 %v3801_v59, %v777_v53  ;;  %v778_v9 = vmax.f32 %v650_v27, 0.0  ;;  %v779_v36 = vmax.f32 %v651_v3, 0.0  ;;  %v3236_v15 = vunpack.c.l.bf16 %v3969_v1  ;;  %v3970_v3 = vld [vmem:[%s4181_s18 + $0x108] sm:$0xff]  }
  0x78   : > { %6020 = vst [vmem:[#allocation24_spill] sm:$0xff] %v4662_v16  ;;  %v652_v35 = vadd.f32 %v4646_v2, %v520_v54  ;;  %v653_v22 = vadd.f32 %v4646_v2, %v521_v11  ;;  %4029 = vst [vmem:[%s4222_s28 + $0xe8] sm:$0xff] %v3510_v0   ;;  %v3237_v59 = vunpack.c.h.bf16 %v3969_v1  ;;  %v3812_v53 = vunpack.c.l.bf16 %v4095_v44 }
  0x79   : > { %6021 = vst [vmem:[#allocation25_spill] sm:$0xff] %v4669_v8  ;;  %v4679_v18 = vadd.f32 %v3804_v48, %v778_v9  ;;  %v3515_v52 = vpack.c.bf16 %v779_v36, %v778_v9  ;;  %v4681_v5 = vadd.f32 %v3805_v25, %v779_v36  ;;  %v522_v54 = vmul.f32 %v4634_v50, %v3236_v15  ;;  %v4096_v48 = vld [vmem:[%s4187_s21 + $0x108] sm:$0xff]   ;;  %v3971_v15 = vld [vmem:[%s4181_s18 + $0x110] sm:$0xff]  }
  0x7a   : > { %v780_v14 = vmax.f32 %v652_v35, 0.0  ;;  %v781_v27 = vmax.f32 %v653_v22, 0.0  ;;  %v523_v11 = vmul.f32 %v4634_v50, %v3237_v59  ;;  %v3813_v35 = vunpack.c.h.bf16 %v4095_v44 }
  0x7b   : > { %6022 = vst [vmem:[#allocation26_spill] sm:$0xff] %v4679_v18  ;;  %6023 = vst [vmem:[#allocation27_spill] sm:$0xff] %v4681_v5  ;;  %v654_v36 = vadd.f32 %v4646_v2, %v522_v54  ;;  %v3240_v0 = vunpack.c.l.bf16 %v3970_v3  ;;  %v3241_v21 = vunpack.c.h.bf16 %v3970_v3  ;;  %v4097_v18 = vld [vmem:[%s4187_s21 + $0x110] sm:$0xff]   ;;  %v3816_v44 = vunpack.c.l.bf16 %v4096_v48  ;;  %v3972_v54 = vld [vmem:[%s4181_s18 + $0x118] sm:$0xff]  }
  0x7c   : > { %4030 = vst [vmem:[%s4222_s28 + $0xf0] sm:$0xff] %v3515_v52   ;;  %v3520_v1 = vpack.c.bf16 %v781_v27, %v780_v14  ;;  %v4690_v9 = vadd.f32 %v3808_v55, %v780_v14  ;;  %v4692_v25 = vadd.f32 %v3809_v60, %v781_v27  ;;  %v655_v22 = vadd.f32 %v4646_v2, %v523_v11 }
  0x7d   : > { %v782_v52 = vmax.f32 %v654_v36, 0.0  ;;  %v524_v27 = vmul.f32 %v4634_v50, %v3240_v0  ;;  %v525_v3 = vmul.f32 %v4634_v50, %v3241_v21  ;;  %v3817_v11 = vunpack.c.h.bf16 %v4096_v48 }
  0x7e   : > { %6024 = vst [vmem:[#allocation28_spill] sm:$0xff] %v4690_v9  ;;  %6025 = vst [vmem:[#allocation29_spill] sm:$0xff] %v4692_v25  ;;  %v783_v14 = vmax.f32 %v655_v22, 0.0  ;;  %v3244_v8 = vunpack.c.l.bf16 %v3971_v15  ;;  %v3245_v59 = vunpack.c.h.bf16 %v3971_v15  ;;  %v3248_v21 = vunpack.c.l.bf16 %v3972_v54  ;;  %v4098_v25 = vld [vmem:[%s4187_s21 + $0x118] sm:$0xff]  }
  0x7f   : > { %4031 = vst [vmem:[%s4222_s28 + $0xf8] sm:$0xff] %v3520_v1   ;;  %v3820_v1 = vunpack.c.l.bf16 %v4097_v18  ;;  %v4708_v16 = vadd.f32 %v3812_v53, %v782_v52  ;;  %v656_v36 = vadd.f32 %v4646_v2, %v524_v27  ;;  %v657_v22 = vadd.f32 %v4646_v2, %v525_v3  ;;  %v3973_v3 = vld [vmem:[%s4181_s18 + $0x120] sm:$0xff]  }
  0x80   : > { %v3525_v5 = vpack.c.bf16 %v783_v14, %v782_v52  ;;  %v4710_v55 = vadd.f32 %v3813_v35, %v783_v14  ;;  %v526_v0 = vmul.f32 %v4634_v50, %v3244_v8  ;;  %v527_v60 = vmul.f32 %v4634_v50, %v3245_v59 }
  0x81   : > { %6026 = vst [vmem:[#allocation30_spill] sm:$0xff] %v4708_v16  ;;  %v784_v15 = vmax.f32 %v656_v36, 0.0  ;;  %v3821_v53 = vunpack.c.h.bf16 %v4097_v18  ;;  %v3249_v52 = vunpack.c.h.bf16 %v3972_v54  ;;  %v785_v35 = vmax.f32 %v657_v22, 0.0 }
  0x82   : > { %6027 = vst [vmem:[#allocation31_spill] sm:$0xff] %v4710_v55  ;;  %4032 = vst [vmem:[%s4222_s28 + $0x100] sm:$0xff] %v3525_v5   ;;  %v658_v14 = vadd.f32 %v4646_v2, %v526_v0  ;;  %v659_v27 = vadd.f32 %v4646_v2, %v527_v60  ;;  %v528_v8 = vmul.f32 %v4634_v50, %v3248_v21  ;;  %v3824_v36 = vunpack.c.l.bf16 %v4098_v25  ;;  %v4121_v55 = vld [vmem:[%s4187_s21 + $0x1d0] sm:$0xff]  }
  0x83   : > { %v4726_v5 = vadd.f32 %v3816_v44, %v784_v15  ;;  %v529_v48 = vmul.f32 %v4634_v50, %v3249_v52  ;;  %v3530_v18 = vpack.c.bf16 %v785_v35, %v784_v15  ;;  %v4729_v54 = vadd.f32 %v3817_v11, %v785_v35 }
  0x84   : > { %v786_v22 = vmax.f32 %v658_v14, 0.0  ;;  %v787_v0 = vmax.f32 %v659_v27, 0.0  ;;  %v660_v60 = vadd.f32 %v4646_v2, %v528_v8  ;;  %v3825_v16 = vunpack.c.h.bf16 %v4098_v25 }
  0x85   : > { %6028 = vst [vmem:[#allocation32_spill] sm:$0xff] %v4726_v5  ;;  %6029 = vst [vmem:[#allocation33_spill] sm:$0xff] %v4729_v54  ;;  %v661_v21 = vadd.f32 %v4646_v2, %v529_v48  ;;  %v3252_v9 = vunpack.c.l.bf16 %v3973_v3  ;;  %v3253_v27 = vunpack.c.h.bf16 %v3973_v3  ;;  %v3974_v48 = vld [vmem:[%s4181_s18 + $0x128] sm:$0xff]  }
  0x86   : > { %4033 = vst [vmem:[%s4222_s28 + $0x108] sm:$0xff] %v3530_v18   ;;  %v3535_v52 = vpack.c.bf16 %v787_v0, %v786_v22  ;;  %v4737_v15 = vadd.f32 %v3820_v1, %v786_v22  ;;  %v4739_v11 = vadd.f32 %v3821_v53, %v787_v0  ;;  %v788_v35 = vmax.f32 %v660_v60, 0.0  ;;  %v4100_v22 = vld [vmem:[%s4187_s21 + $0x128] sm:$0xff]   ;;  %v4101_v18 = vld [vmem:[%s4187_s21 + $0x130] sm:$0xff]  }
  0x87   : > { %v789_v14 = vmax.f32 %v661_v21, 0.0  ;;  %v530_v8 = vmul.f32 %v4634_v50, %v3252_v9  ;;  %v3828_v53 = vunpack.c.l.bf16 %v4099_v6  ;;  %v531_v9 = vmul.f32 %v4634_v50, %v3253_v27  ;;  %v3975_v21 = vld [vmem:[%s4181_s18 + $0x130] sm:$0xff]  }
  0x88   : > { %6030 = vst [vmem:[#allocation34_spill] sm:$0xff] %v4737_v15  ;;  %6031 = vst [vmem:[#allocation35_spill] sm:$0xff] %v4739_v11  ;;  %v4751_v60 = vadd.f32 %v3824_v36, %v788_v35  ;;  %v3256_v44 = vunpack.c.l.bf16 %v3974_v48  ;;  %v3257_v59 = vunpack.c.h.bf16 %v3974_v48  ;;  %v3833_v48 = vunpack.c.h.bf16 %v4100_v22 }
  0x89   : > { %4034 = vst [vmem:[%s4222_s28 + $0x110] sm:$0xff] %v3535_v52   ;;  %v3540_v0 = vpack.c.bf16 %v789_v14, %v788_v35  ;;  %v4753_v3 = vadd.f32 %v3825_v16, %v789_v14  ;;  %v662_v25 = vadd.f32 %v4646_v2, %v530_v8  ;;  %v3829_v52 = vunpack.c.h.bf16 %v4099_v6  ;;  %v3976_v6 = vld [vmem:[%s4181_s18 + $0x138] sm:$0xff]  }
  0x8a   : > { %6032 = vst [vmem:[#allocation36_spill] sm:$0xff] %v4751_v60  ;;  %v663_v16 = vadd.f32 %v4646_v2, %v531_v9  ;;  %v3832_v35 = vunpack.c.l.bf16 %v4100_v22  ;;  %v532_v27 = vmul.f32 %v4634_v50, %v3256_v44  ;;  %v533_v11 = vmul.f32 %v4634_v50, %v3257_v59 }
  0x8b   : > { %6033 = vst [vmem:[#allocation37_spill] sm:$0xff] %v4753_v3  ;;  %4035 = vst [vmem:[%s4222_s28 + $0x118] sm:$0xff] %v3540_v0   ;;  %v790_v14 = vmax.f32 %v662_v25, 0.0  ;;  %v3260_v8 = vunpack.c.l.bf16 %v3975_v21  ;;  %v3261_v0 = vunpack.c.h.bf16 %v3975_v21  ;;  %v3836_v54 = vunpack.c.l.bf16 %v4101_v18 }
  0x8c   : > { %v791_v15 = vmax.f32 %v663_v16, 0.0  ;;  %v664_v36 = vadd.f32 %v4646_v2, %v532_v27  ;;  %v665_v9 = vadd.f32 %v4646_v2, %v533_v11  ;;  %v3264_v60 = vunpack.c.l.bf16 %v3976_v6  ;;  %v3977_v11 = vld [vmem:[%s4181_s18 + $0x140] sm:$0xff]  }
  0x8d   : > { %v4768_v1 = vadd.f32 %v3828_v53, %v790_v14  ;;  %v534_v25 = vmul.f32 %v4634_v50, %v3260_v8  ;;  %v535_v59 = vmul.f32 %v4634_v50, %v3261_v0  ;;  %v3837_v21 = vunpack.c.h.bf16 %v4101_v18  ;;  %v4102_v53 = vld [vmem:[%s4187_s21 + $0x138] sm:$0xff]  }
  0x8e   : > { %v3545_v3 = vpack.c.bf16 %v791_v15, %v790_v14  ;;  %v4773_v44 = vadd.f32 %v3829_v52, %v791_v15  ;;  %v792_v16 = vmax.f32 %v664_v36, 0.0  ;;  %v793_v5 = vmax.f32 %v665_v9, 0.0 }
  0x8f   : > { %6034 = vst [vmem:[#allocation38_spill] sm:$0xff] %v4768_v1  ;;  %v666_v22 = vadd.f32 %v4646_v2, %v534_v25  ;;  %v667_v27 = vadd.f32 %v4646_v2, %v535_v59  ;;  %v3265_v14 = vunpack.c.h.bf16 %v3976_v6  ;;  %v536_v15 = vmul.f32 %v4634_v50, %v3264_v60 }
  0x90   : > { %6035 = vst [vmem:[#allocation39_spill] sm:$0xff] %v4773_v44  ;;  %4036 = vst [vmem:[%s4222_s28 + $0x120] sm:$0xff] %v3545_v3   ;;  %v3550_v52 = vpack.c.bf16 %v793_v5, %v792_v16  ;;  %v4783_v8 = vadd.f32 %v3832_v35, %v792_v16  ;;  %v4785_v36 = vadd.f32 %v3833_v48, %v793_v5  ;;  %v3840_v25 = vunpack.c.l.bf16 %v4102_v53  ;;  %v4103_v48 = vld [vmem:[%s4187_s21 + $0x140] sm:$0xff]  }
  0x91   : > { %v794_v0 = vmax.f32 %v666_v22, 0.0  ;;  %v795_v18 = vmax.f32 %v667_v27, 0.0  ;;  %v537_v9 = vmul.f32 %v4634_v50, %v3265_v14  ;;  %v668_v3 = vadd.f32 %v4646_v2, %v536_v15  ;;  %v3978_v14 = vld [vmem:[%s4181_s18 + $0x148] sm:$0xff]  }
  0x92   : > { %6036 = vst [vmem:[#allocation40_spill] sm:$0xff] %v4783_v8  ;;  %6037 = vst [vmem:[#allocation41_spill] sm:$0xff] %v4785_v36  ;;  %v3841_v5 = vunpack.c.h.bf16 %v4102_v53  ;;  %v3268_v60 = vunpack.c.l.bf16 %v3977_v11  ;;  %v3272_v15 = vunpack.c.l.bf16 %v3978_v14  ;;  %v3273_v6 = vunpack.c.h.bf16 %v3978_v14  ;;  %v4104_v36 = vld [vmem:[%s4187_s21 + $0x148] sm:$0xff]  }
  0x93   : > { %4037 = vst [vmem:[%s4222_s28 + $0x128] sm:$0xff] %v3550_v52   ;;  %v4795_v35 = vadd.f32 %v3836_v54, %v794_v0  ;;  %v3555_v59 = vpack.c.bf16 %v795_v18, %v794_v0  ;;  %v4798_v16 = vadd.f32 %v3837_v21, %v795_v18  ;;  %v669_v22 = vadd.f32 %v4646_v2, %v537_v9  ;;  %v3979_v52 = vld [vmem:[%s4181_s18 + $0x150] sm:$0xff]  }
  0x94   : > { %v796_v27 = vmax.f32 %v668_v3, 0.0  ;;  %v3269_v54 = vunpack.c.h.bf16 %v3977_v11  ;;  %v3844_v18 = vunpack.c.l.bf16 %v4103_v48  ;;  %v538_v9 = vmul.f32 %v4634_v50, %v3268_v60 }
  0x95   : > { %6038 = vst [vmem:[#allocation42_spill] sm:$0xff] %v4795_v35  ;;  %6039 = vst [vmem:[#allocation43_spill] sm:$0xff] %v4798_v16  ;;  %v797_v21 = vmax.f32 %v669_v22, 0.0  ;;  %v540_v60 = vmul.f32 %v4634_v50, %v3272_v15  ;;  %v4105_v16 = vld [vmem:[%s4187_s21 + $0x150] sm:$0xff]   ;;  %v3848_v14 = vunpack.c.l.bf16 %v4104_v36  ;;  %v3849_v8 = vunpack.c.h.bf16 %v4104_v36 }
  0x96   : > { %4038 = vst [vmem:[%s4222_s28 + $0x130] sm:$0xff] %v3555_v59   ;;  %v4809_v0 = vadd.f32 %v3840_v25, %v796_v27  ;;  %v539_v3 = vmul.f32 %v4634_v50, %v3269_v54  ;;  %v3845_v25 = vunpack.c.h.bf16 %v4103_v48  ;;  %v670_v22 = vadd.f32 %v4646_v2, %v538_v9  ;;  %v3980_v9 = vld [vmem:[%s4181_s18 + $0x158] sm:$0xff]  }
  0x97   : > { %v3560_v35 = vpack.c.bf16 %v797_v21, %v796_v27  ;;  %v4815_v11 = vadd.f32 %v3841_v5, %v797_v21  ;;  %v541_v54 = vmul.f32 %v4634_v50, %v3273_v6  ;;  %v3276_v27 = vunpack.c.l.bf16 %v3979_v52 }
  0x98   : > { %6040 = vst [vmem:[#allocation44_spill] sm:$0xff] %v4809_v0  ;;  %v671_v53 = vadd.f32 %v4646_v2, %v539_v3  ;;  %v3277_v5 = vunpack.c.h.bf16 %v3979_v52  ;;  %v798_v21 = vmax.f32 %v670_v22, 0.0  ;;  %v672_v59 = vadd.f32 %v4646_v2, %v540_v60 }
  0x99   : > { %6041 = vst [vmem:[#allocation45_spill] sm:$0xff] %v4815_v11  ;;  %4039 = vst [vmem:[%s4222_s28 + $0x138] sm:$0xff] %v3560_v35   ;;  %v673_v48 = vadd.f32 %v4646_v2, %v541_v54  ;;  %v542_v3 = vmul.f32 %v4634_v50, %v3276_v27  ;;  %v3852_v6 = vunpack.c.l.bf16 %v4105_v16  ;;  %v3853_v0 = vunpack.c.h.bf16 %v4105_v16 }
  0x9a   : > { %v799_v44 = vmax.f32 %v671_v53, 0.0  ;;  %v543_v15 = vmul.f32 %v4634_v50, %v3277_v5  ;;  %v4830_v1 = vadd.f32 %v3844_v18, %v798_v21  ;;  %v800_v52 = vmax.f32 %v672_v59, 0.0 }
  0x9b   : > { %v801_v53 = vmax.f32 %v673_v48, 0.0  ;;  %v674_v22 = vadd.f32 %v4646_v2, %v542_v3  ;;  %v3280_v54 = vunpack.c.l.bf16 %v3980_v9  ;;  %v3981_v3 = vld [vmem:[%s4181_s18 + $0x160] sm:$0xff]  }
  0x9c   : > { %v3565_v35 = vpack.c.bf16 %v799_v44, %v798_v21  ;;  %6042 = vst [vmem:[#allocation46_spill] sm:$0xff] %v4830_v1  ;;  %v4832_v36 = vadd.f32 %v3845_v25, %v799_v44  ;;  %v675_v60 = vadd.f32 %v4646_v2, %v543_v15  ;;  %v4841_v18 = vadd.f32 %v3848_v14, %v800_v52  ;;  %v4106_v25 = vld [vmem:[%s4187_s21 + $0x158] sm:$0xff]  }
  0x9d   : > { %v3281_v44 = vunpack.c.h.bf16 %v3980_v9  ;;  %v3570_v59 = vpack.c.bf16 %v801_v53, %v800_v52  ;;  %v4844_v5 = vadd.f32 %v3849_v8, %v801_v53  ;;  %v802_v21 = vmax.f32 %v674_v22, 0.0  ;;  %v4107_v22 = vld [vmem:[%s4187_s21 + $0x160] sm:$0xff]  }
  0x9e   : > { %6043 = vst [vmem:[#allocation47_spill] sm:$0xff] %v4832_v36  ;;  %4040 = vst [vmem:[%s4222_s28 + $0x140] sm:$0xff] %v3565_v35   ;;  %v803_v48 = vmax.f32 %v675_v60, 0.0  ;;  %v544_v14 = vmul.f32 %v4634_v50, %v3280_v54  ;;  %v3856_v53 = vunpack.c.l.bf16 %v4106_v25  ;;  %v3857_v27 = vunpack.c.h.bf16 %v4106_v25  ;;  %v3982_v35 = vld [vmem:[%s4181_s18 + $0x168] sm:$0xff]  }
  0x9f   : > { %6044 = vst [vmem:[#allocation48_spill] sm:$0xff] %v4841_v18  ;;  %6045 = vst [vmem:[#allocation49_spill] sm:$0xff] %v4844_v5  ;;  %v545_v9 = vmul.f32 %v4634_v50, %v3281_v44  ;;  %v4854_v52 = vadd.f32 %v3852_v6, %v802_v21  ;;  %v3284_v36 = vunpack.c.l.bf16 %v3981_v3  ;;  %v3285_v44 = vunpack.c.h.bf16 %v3981_v3  ;;  %v3983_v5 = vld [vmem:[%s4181_s18 + $0x170] sm:$0xff]  }
  0xa0   : > { %4041 = vst [vmem:[%s4222_s28 + $0x148] sm:$0xff] %v3570_v59   ;;  %v3575_v16 = vpack.c.bf16 %v803_v48, %v802_v21  ;;  %v4856_v8 = vadd.f32 %v3853_v0, %v803_v48  ;;  %v676_v60 = vadd.f32 %v4646_v2, %v544_v14  ;;  %v3860_v25 = vunpack.c.l.bf16 %v4107_v22  ;;  %v4108_v14 = vld [vmem:[%s4187_s21 + $0x168] sm:$0xff]  }
  0xa1   : > { %6046 = vst [vmem:[#allocation50_spill] sm:$0xff] %v4854_v52  ;;  %v677_v15 = vadd.f32 %v4646_v2, %v545_v9  ;;  %v546_v48 = vmul.f32 %v4634_v50, %v3284_v36  ;;  %v547_v9 = vmul.f32 %v4634_v50, %v3285_v44  ;;  %v3861_v18 = vunpack.c.h.bf16 %v4107_v22  ;;  %v4109_v44 = vld [vmem:[%s4187_s21 + $0x170] sm:$0xff]  }
  0xa2   : > { %6047 = vst [vmem:[#allocation51_spill] sm:$0xff] %v4856_v8  ;;  %4042 = vst [vmem:[%s4222_s28 + $0x150] sm:$0xff] %v3575_v16   ;;  %v804_v59 = vmax.f32 %v676_v60, 0.0  ;;  %v3288_v54 = vunpack.c.l.bf16 %v3982_v35  ;;  %v3289_v16 = vunpack.c.h.bf16 %v3982_v35  ;;  %v3864_v0 = vunpack.c.l.bf16 %v4108_v14 }
  0xa3   : > { %v805_v21 = vmax.f32 %v677_v15, 0.0  ;;  %v678_v3 = vadd.f32 %v4646_v2, %v546_v48  ;;  %v679_v36 = vadd.f32 %v4646_v2, %v547_v9  ;;  %v3293_v9 = vunpack.c.h.bf16 %v3983_v5 }
  0xa4   : > { %v4873_v6 = vadd.f32 %v3856_v53, %v804_v59  ;;  %v548_v15 = vmul.f32 %v4634_v50, %v3288_v54  ;;  %v549_v60 = vmul.f32 %v4634_v50, %v3289_v16  ;;  %v3865_v53 = vunpack.c.h.bf16 %v4108_v14  ;;  %v3984_v54 = vld [vmem:[%s4181_s18 + $0x178] sm:$0xff]  }
  0xa5   : > { %v3580_v1 = vpack.c.bf16 %v805_v21, %v804_v59  ;;  %v4875_v52 = vadd.f32 %v3857_v27, %v805_v21  ;;  %v806_v22 = vmax.f32 %v678_v3, 0.0  ;;  %v3292_v59 = vunpack.c.l.bf16 %v3983_v5  ;;  %v4110_v16 = vld [vmem:[%s4187_s21 + $0x178] sm:$0xff]  }
  0xa6   : > { %6048 = vst [vmem:[#allocation52_spill] sm:$0xff] %v4873_v6  ;;  %v807_v27 = vmax.f32 %v679_v36, 0.0  ;;  %v680_v21 = vadd.f32 %v4646_v2, %v548_v15  ;;  %v681_v48 = vadd.f32 %v4646_v2, %v549_v60  ;;  %v3868_v35 = vunpack.c.l.bf16 %v4109_v44 }
  0xa7   : > { %6049 = vst [vmem:[#allocation53_spill] sm:$0xff] %v4875_v52  ;;  %4043 = vst [vmem:[%s4222_s28 + $0x158] sm:$0xff] %v3580_v1   ;;  %v4890_v8 = vadd.f32 %v3860_v25, %v806_v22  ;;  %v550_v1 = vmul.f32 %v4634_v50, %v3292_v59  ;;  %v551_v60 = vmul.f32 %v4634_v50, %v3293_v9  ;;  %v3869_v6 = vunpack.c.h.bf16 %v4109_v44  ;;  %v4111_v44 = vld [vmem:[%s4187_s21 + $0x180] sm:$0xff]   ;;  %v4112_v52 = vld [vmem:[%s4187_s21 + $0x188] sm:$0xff]  }
  0xa8   : > { %v3585_v3 = vpack.c.bf16 %v807_v27, %v806_v22  ;;  %v4893_v14 = vadd.f32 %v3861_v18, %v807_v27  ;;  %v808_v36 = vmax.f32 %v680_v21, 0.0  ;;  %v809_v15 = vmax.f32 %v681_v48, 0.0 }
  0xa9   : > { %6050 = vst [vmem:[#allocation54_spill] sm:$0xff] %v4890_v8  ;;  %v682_v5 = vadd.f32 %v4646_v2, %v550_v1  ;;  %v3296_v11 = vunpack.c.l.bf16 %v3984_v54  ;;  %v683_v27 = vadd.f32 %v4646_v2, %v551_v60  ;;  %v3297_v48 = vunpack.c.h.bf16 %v3984_v54  ;;  %v3985_v1 = vld [vmem:[%s4181_s18 + $0x180] sm:$0xff]   ;;  %v3986_v60 = vld [vmem:[%s4181_s18 + $0x188] sm:$0xff]  }
  0xaa   : > { %6051 = vst [vmem:[#allocation55_spill] sm:$0xff] %v4893_v14  ;;  %4044 = vst [vmem:[%s4222_s28 + $0x160] sm:$0xff] %v3585_v3   ;;  %v3590_v59 = vpack.c.bf16 %v809_v15, %v808_v36  ;;  %v4901_v22 = vadd.f32 %v3864_v0, %v808_v36  ;;  %v4903_v18 = vadd.f32 %v3865_v53, %v809_v15  ;;  %v3872_v53 = vunpack.c.l.bf16 %v4110_v16 }
  0xab   : > { %v810_v21 = vmax.f32 %v682_v5, 0.0  ;;  %v552_v9 = vmul.f32 %v4634_v50, %v3296_v11  ;;  %v811_v36 = vmax.f32 %v683_v27, 0.0  ;;  %v553_v54 = vmul.f32 %v4634_v50, %v3297_v48 }
  0xac   : > { %6052 = vst [vmem:[#allocation56_spill] sm:$0xff] %v4901_v22  ;;  %6053 = vst [vmem:[#allocation57_spill] sm:$0xff] %v4903_v18  ;;  %v3873_v5 = vunpack.c.h.bf16 %v4110_v16  ;;  %v3300_v3 = vunpack.c.l.bf16 %v3985_v1  ;;  %v3876_v14 = vunpack.c.l.bf16 %v4111_v44  ;;  %v3877_v27 = vunpack.c.h.bf16 %v4111_v44 }
  0xad   : > { %4045 = vst [vmem:[%s4222_s28 + $0x168] sm:$0xff] %v3590_v59   ;;  %v4916_v15 = vadd.f32 %v3868_v35, %v810_v21  ;;  %v684_v11 = vadd.f32 %v4646_v2, %v552_v9  ;;  %v3301_v59 = vunpack.c.h.bf16 %v3985_v1  ;;  %v3595_v8 = vpack.c.bf16 %v811_v36, %v810_v21 }
  0xae   : > { %v4921_v25 = vadd.f32 %v3869_v6, %v811_v36  ;;  %v685_v0 = vadd.f32 %v4646_v2, %v553_v54  ;;  %v554_v18 = vmul.f32 %v4634_v50, %v3300_v3  ;;  %v3304_v22 = vunpack.c.l.bf16 %v3986_v60  ;;  %v3987_v54 = vld [vmem:[%s4181_s18 + $0x190] sm:$0xff]  }
  0xaf   : > { %6054 = vst [vmem:[#allocation58_spill] sm:$0xff] %v4916_v15  ;;  %v812_v35 = vmax.f32 %v684_v11, 0.0  ;;  %v555_v48 = vmul.f32 %v4634_v50, %v3301_v59  ;;  %4046 = vst [vmem:[%s4222_s28 + $0x170] sm:$0xff] %v3595_v8   ;;  %v3305_v9 = vunpack.c.h.bf16 %v3986_v60  ;;  %v3880_v16 = vunpack.c.l.bf16 %v4112_v52 }
  0xb0   : > { %6055 = vst [vmem:[#allocation59_spill] sm:$0xff] %v4921_v25  ;;  %v813_v6 = vmax.f32 %v685_v0, 0.0  ;;  %v686_v44 = vadd.f32 %v4646_v2, %v554_v18  ;;  %v556_v36 = vmul.f32 %v4634_v50, %v3304_v22  ;;  %v3308_v60 = vunpack.c.l.bf16 %v3987_v54 }
  0xb1   : > { %v4932_v1 = vadd.f32 %v3872_v53, %v812_v35  ;;  %v687_v3 = vadd.f32 %v4646_v2, %v555_v48  ;;  %v557_v59 = vmul.f32 %v4634_v50, %v3305_v9  ;;  %v3881_v53 = vunpack.c.h.bf16 %v4112_v52 }
  0xb2   : > { %v3600_v8 = vpack.c.bf16 %v813_v6, %v812_v35  ;;  %v4938_v11 = vadd.f32 %v3873_v5, %v813_v6  ;;  %v814_v21 = vmax.f32 %v686_v44, 0.0  ;;  %v688_v0 = vadd.f32 %v4646_v2, %v556_v36  ;;  %v4113_v5 = vld [vmem:[%s4187_s21 + $0x190] sm:$0xff]  }
  0xb3   : > { %6056 = vst [vmem:[#allocation60_spill] sm:$0xff] %v4932_v1  ;;  %v815_v25 = vmax.f32 %v687_v3, 0.0  ;;  %v689_v22 = vadd.f32 %v4646_v2, %v557_v59  ;;  %v3309_v35 = vunpack.c.h.bf16 %v3987_v54  ;;  %v558_v36 = vmul.f32 %v4634_v50, %v3308_v60  ;;  %v3988_v59 = vld [vmem:[%s4181_s18 + $0x198] sm:$0xff]  }
  0xb4   : > { %6057 = vst [vmem:[#allocation61_spill] sm:$0xff] %v4938_v11  ;;  %4047 = vst [vmem:[%s4222_s28 + $0x178] sm:$0xff] %v3600_v8   ;;  %v4947_v6 = vadd.f32 %v3876_v14, %v814_v21  ;;  %v816_v44 = vmax.f32 %v688_v0, 0.0  ;;  %v3312_v54 = vunpack.c.l.bf16 %v3988_v59  ;;  %v3313_v52 = vunpack.c.h.bf16 %v3988_v59  ;;  %v3990_v11 = vld [vmem:[%s4181_s18 + $0x1a8] sm:$0xff]  }
  0xb5   : > { %v3605_v48 = vpack.c.bf16 %v815_v25, %v814_v21  ;;  %v4949_v9 = vadd.f32 %v3877_v27, %v815_v25  ;;  %v817_v3 = vmax.f32 %v689_v22, 0.0  ;;  %v559_v8 = vmul.f32 %v4634_v50, %v3309_v35  ;;  %v4114_v21 = vld [vmem:[%s4187_s21 + $0x198] sm:$0xff]   ;;  %v3989_v35 = vld [vmem:[%s4181_s18 + $0x1a0] sm:$0xff]  }
  0xb6   : > { %6058 = vst [vmem:[#allocation62_spill] sm:$0xff] %v4947_v6  ;;  %v4959_v14 = vadd.f32 %v3880_v16, %v816_v44  ;;  %v3884_v25 = vunpack.c.l.bf16 %v4113_v5  ;;  %v3885_v27 = vunpack.c.h.bf16 %v4113_v5  ;;  %v690_v22 = vadd.f32 %v4646_v2, %v558_v36 }
  0xb7   : > { %6059 = vst [vmem:[#allocation63_spill] sm:$0xff] %v4949_v9  ;;  %4048 = vst [vmem:[%s4222_s28 + $0x180] sm:$0xff] %v3605_v48   ;;  %v3610_v0 = vpack.c.bf16 %v817_v3, %v816_v44  ;;  %v4962_v18 = vadd.f32 %v3881_v53, %v817_v3  ;;  %v691_v60 = vadd.f32 %v4646_v2, %v559_v8  ;;  %v3888_v3 = vunpack.c.l.bf16 %v4114_v21  ;;  %v4115_v9 = vld [vmem:[%s4187_s21 + $0x1a0] sm:$0xff]  }
  0xb8   : > { %6060 = vst [vmem:[#allocation64_spill] sm:$0xff] %v4959_v14  ;;  %v818_v5 = vmax.f32 %v690_v22, 0.0  ;;  %v560_v36 = vmul.f32 %v4634_v50, %v3312_v54  ;;  %v561_v8 = vmul.f32 %v4634_v50, %v3313_v52  ;;  %v3316_v6 = vunpack.c.l.bf16 %v3989_v35  ;;  %v4116_v52 = vld [vmem:[%s4187_s21 + $0x1a8] sm:$0xff]  }
  0xb9   : > { %6061 = vst [vmem:[#allocation65_spill] sm:$0xff] %v4962_v18  ;;  %4049 = vst [vmem:[%s4222_s28 + $0x188] sm:$0xff] %v3610_v0   ;;  %v819_v44 = vmax.f32 %v691_v60, 0.0  ;;  %v3317_v48 = vunpack.c.h.bf16 %v3989_v35  ;;  %v3889_v0 = vunpack.c.h.bf16 %v4114_v21  ;;  %v3893_v18 = vunpack.c.h.bf16 %v4115_v9 }
  0xba   : > { %v4978_v14 = vadd.f32 %v3884_v25, %v818_v5  ;;  %v692_v22 = vadd.f32 %v4646_v2, %v560_v36  ;;  %v693_v60 = vadd.f32 %v4646_v2, %v561_v8  ;;  %v562_v53 = vmul.f32 %v4634_v50, %v3316_v6  ;;  %v3991_v6 = vld [vmem:[%s4181_s18 + $0x1b0] sm:$0xff]  }
  0xbb   : > { %v3615_v16 = vpack.c.bf16 %v819_v44, %v818_v5  ;;  %v4980_v59 = vadd.f32 %v3885_v27, %v819_v44  ;;  %v563_v54 = vmul.f32 %v4634_v50, %v3317_v48  ;;  %v3892_v27 = vunpack.c.l.bf16 %v4115_v9 }
  0xbc   : > { %6062 = vst [vmem:[#allocation66_spill] sm:$0xff] %v4978_v14  ;;  %v3320_v5 = vunpack.c.l.bf16 %v3990_v11  ;;  %v820_v44 = vmax.f32 %v692_v22, 0.0  ;;  %v821_v21 = vmax.f32 %v693_v60, 0.0  ;;  %v694_v36 = vadd.f32 %v4646_v2, %v562_v53 }
  0xbd   : > { %6063 = vst [vmem:[#allocation67_spill] sm:$0xff] %v4980_v59  ;;  %4050 = vst [vmem:[%s4222_s28 + $0x190] sm:$0xff] %v3615_v16   ;;  %v695_v8 = vadd.f32 %v4646_v2, %v563_v54  ;;  %v3321_v48 = vunpack.c.h.bf16 %v3990_v11  ;;  %v3896_v1 = vunpack.c.l.bf16 %v4116_v52  ;;  %v3324_v54 = vunpack.c.l.bf16 %v3991_v6 }
  0xbe   : > { %v564_v16 = vmul.f32 %v4634_v50, %v3320_v5  ;;  %v3620_v35 = vpack.c.bf16 %v821_v21, %v820_v44  ;;  %v4996_v14 = vadd.f32 %v3888_v3, %v820_v44  ;;  %v4998_v25 = vadd.f32 %v3889_v0, %v821_v21  ;;  %v4117_v44 = vld [vmem:[%s4187_s21 + $0x1b0] sm:$0xff]  }
  0xbf   : > { %v822_v22 = vmax.f32 %v694_v36, 0.0  ;;  %v823_v60 = vmax.f32 %v695_v8, 0.0  ;;  %v565_v59 = vmul.f32 %v4634_v50, %v3321_v48  ;;  %v3897_v5 = vunpack.c.h.bf16 %v4116_v52  ;;  %v3992_v48 = vld [vmem:[%s4181_s18 + $0x1b8] sm:$0xff]  }
  0xc0   : > { %6064 = vst [vmem:[#allocation68_spill] sm:$0xff] %v4996_v14  ;;  %6065 = vst [vmem:[#allocation69_spill] sm:$0xff] %v4998_v25  ;;  %v696_v53 = vadd.f32 %v4646_v2, %v564_v16  ;;  %v3325_v3 = vunpack.c.h.bf16 %v3991_v6  ;;  %v3328_v11 = vunpack.c.l.bf16 %v3992_v48  ;;  %v4118_v25 = vld [vmem:[%s4187_s21 + $0x1b8] sm:$0xff]   ;;  %v3993_v16 = vld [vmem:[%s4181_s18 + $0x1c0] sm:$0xff]  }
  0xc1   : > { %4051 = vst [vmem:[%s4222_s28 + $0x198] sm:$0xff] %v3620_v35   ;;  %v5005_v9 = vadd.f32 %v3892_v27, %v822_v22  ;;  %v3625_v0 = vpack.c.bf16 %v823_v60, %v822_v22  ;;  %v5008_v21 = vadd.f32 %v3893_v18, %v823_v60  ;;  %v697_v36 = vadd.f32 %v4646_v2, %v565_v59 }
  0xc2   : > { %v824_v8 = vmax.f32 %v696_v53, 0.0  ;;  %v566_v27 = vmul.f32 %v4634_v50, %v3324_v54  ;;  %v567_v52 = vmul.f32 %v4634_v50, %v3325_v3  ;;  %v3900_v22 = vunpack.c.l.bf16 %v4117_v44 }
  0xc3   : > { %6066 = vst [vmem:[#allocation70_spill] sm:$0xff] %v5005_v9  ;;  %6067 = vst [vmem:[#allocation71_spill] sm:$0xff] %v5008_v21  ;;  %v825_v6 = vmax.f32 %v697_v36, 0.0  ;;  %v3901_v59 = vunpack.c.h.bf16 %v4117_v44  ;;  %v3329_v35 = vunpack.c.h.bf16 %v3992_v48  ;;  %v3904_v54 = vunpack.c.l.bf16 %v4118_v25 }
  0xc4   : > { %4052 = vst [vmem:[%s4222_s28 + $0x1a0] sm:$0xff] %v3625_v0   ;;  %v5019_v18 = vadd.f32 %v3896_v1, %v824_v8  ;;  %v698_v60 = vadd.f32 %v4646_v2, %v566_v27  ;;  %v699_v53 = vadd.f32 %v4646_v2, %v567_v52  ;;  %v568_v27 = vmul.f32 %v4634_v50, %v3328_v11  ;;  %v3994_v11 = vld [vmem:[%s4181_s18 + $0x1c8] sm:$0xff]  }
  0xc5   : > { %v3630_v3 = vpack.c.bf16 %v825_v6, %v824_v8  ;;  %v5027_v0 = vadd.f32 %v3897_v5, %v825_v6  ;;  %v569_v52 = vmul.f32 %v4634_v50, %v3329_v35  ;;  %v3332_v8 = vunpack.c.l.bf16 %v3993_v16  ;;  %v4119_v6 = vld [vmem:[%s4187_s21 + $0x1c0] sm:$0xff]  }
  0xc6   : > { %6068 = vst [vmem:[#allocation72_spill] sm:$0xff] %v5019_v18  ;;  %v826_v44 = vmax.f32 %v698_v60, 0.0  ;;  %v827_v36 = vmax.f32 %v699_v53, 0.0  ;;  %v3333_v5 = vunpack.c.h.bf16 %v3993_v16  ;;  %v700_v60 = vadd.f32 %v4646_v2, %v568_v27 }
  0xc7   : > { %6069 = vst [vmem:[#allocation73_spill] sm:$0xff] %v5027_v0  ;;  %4053 = vst [vmem:[%s4222_s28 + $0x1a8] sm:$0xff] %v3630_v3   ;;  %v701_v35 = vadd.f32 %v4646_v2, %v569_v52  ;;  %v3905_v53 = vunpack.c.h.bf16 %v4118_v25  ;;  %v570_v3 = vmul.f32 %v4634_v50, %v3332_v8  ;;  %v4120_v0 = vld [vmem:[%s4187_s21 + $0x1c8] sm:$0xff]   ;;  %v3336_v25 = vunpack.c.l.bf16 %v3994_v11  ;;  %v3995_v52 = vld [vmem:[%s4181_s18 + $0x1d0] sm:$0xff]  }
  0xc8   : > { %v3635_v21 = vpack.c.bf16 %v827_v36, %v826_v44  ;;  %v5037_v9 = vadd.f32 %v3900_v22, %v826_v44  ;;  %v5039_v1 = vadd.f32 %v3901_v59, %v827_v36  ;;  %v571_v48 = vmul.f32 %v4634_v50, %v3333_v5 }
  0xc9   : > { %v828_v22 = vmax.f32 %v700_v60, 0.0  ;;  %v3908_v44 = vunpack.c.l.bf16 %v4119_v6  ;;  %v3909_v59 = vunpack.c.h.bf16 %v4119_v6  ;;  %v829_v36 = vmax.f32 %v701_v35, 0.0 }
  0xca   : > { %6070 = vst [vmem:[#allocation74_spill] sm:$0xff] %v5037_v9  ;;  %4054 = vst [vmem:[%s4222_s28 + $0x1b0] sm:$0xff] %v3635_v21   ;;  %v702_v27 = vadd.f32 %v4646_v2, %v570_v3  ;;  %v703_v18 = vadd.f32 %v4646_v2, %v571_v48  ;;  %v3337_v21 = vunpack.c.h.bf16 %v3994_v11  ;;  %v3912_v14 = vunpack.c.l.bf16 %v4120_v0 }
  0xcb   : > { %v5055_v5 = vadd.f32 %v3904_v54, %v828_v22  ;;  %v3640_v16 = vpack.c.bf16 %v829_v36, %v828_v22  ;;  %v5057_v60 = vadd.f32 %v3905_v53, %v829_v36  ;;  %v572_v3 = vmul.f32 %v4634_v50, %v3336_v25  ;;  %v4122_v25 = vld [vmem:[%s4187_s21 + $0x1d8] sm:$0xff]  }
  0xcc   : > { %v830_v6 = vmax.f32 %v702_v27, 0.0  ;;  %v831_v35 = vmax.f32 %v703_v18, 0.0  ;;  %v573_v48 = vmul.f32 %v4634_v50, %v3337_v21  ;;  %v3913_v9 = vunpack.c.h.bf16 %v4120_v0  ;;  %v5074_v50 = vld [vmem:[%s5836_s2] ss:$0 sm:$0xff] }
  0xcd   : > { %6071 = vst [vmem:[#allocation75_spill] sm:$0xff] %v5057_v60  ;;  %v3340_v15 = vunpack.c.l.bf16 %v3995_v52  ;;  %4055 = vst [vmem:[%s4222_s28 + $0x1b8] sm:$0xff] %v3640_v16   ;;  %v704_v18 = vadd.f32 %v4646_v2, %v572_v3  ;;  %v3341_v27 = vunpack.c.h.bf16 %v3995_v52  ;;  %v3996_v16 = vld [vmem:[%s4181_s18 + $0x1d8] sm:$0xff]   ;;  %v3916_v52 = vunpack.c.l.bf16 %v4121_v55 }
  0xce   : > { %v3645_v11 = vpack.c.bf16 %v831_v35, %v830_v6  ;;  %v5065_v22 = vadd.f32 %v3908_v44, %v830_v6  ;;  %v5067_v53 = vadd.f32 %v3909_v59, %v831_v35  ;;  %v705_v36 = vadd.f32 %v4646_v2, %v573_v48  ;;  %v3997_v48 = vld [vmem:[%s4181_s18 + $0x1e0] sm:$0xff]  }
  0xcf   : > { %v574_v0 = vmul.f32 %v5074_v50, %v3340_v15  ;;  %v832_v21 = vmax.f32 %v704_v18, 0.0  ;;  %v575_v35 = vmul.f32 %v5074_v50, %v3341_v27  ;;  %v5090_v15 = vld [vmem:[%s5836_s2 + $0x1] ss:$0 sm:$0xff]  ;;  %v3344_v44 = vunpack.c.l.bf16 %v3996_v16 }
  0xd0   : > { %6072 = vst [vmem:[#allocation76_spill] sm:$0xff] %v5065_v22  ;;  %6073 = vst [vmem:[#allocation77_spill] sm:$0xff] %v5067_v53  ;;  %v833_v6 = vmax.f32 %v705_v36, 0.0  ;;  %v3345_v59 = vunpack.c.h.bf16 %v3996_v16  ;;  %v3920_v54 = vunpack.c.l.bf16 %v4122_v25  ;;  %v3921_v60 = vunpack.c.h.bf16 %v4122_v25 }
  0xd1   : > { %4056 = vst [vmem:[%s4222_s28 + $0x1c0] sm:$0xff] %v3645_v11   ;;  %v706_v3 = vadd.f32 %v5090_v15, %v574_v0  ;;  %v3917_v11 = vunpack.c.h.bf16 %v4121_v55  ;;  %v5094_v8 = vadd.f32 %v3912_v14, %v832_v21  ;;  %v707_v36 = vadd.f32 %v5090_v15, %v575_v35 }
  0xd2   : > { %v3650_v2 = vpack.c.bf16 %v833_v6, %v832_v21  ;;  %v5096_v18 = vadd.f32 %v3913_v9, %v833_v6  ;;  %v576_v53 = vmul.f32 %v5074_v50, %v3344_v44  ;;  %v577_v22 = vmul.f32 %v5074_v50, %v3345_v59  ;;  %v4123_v21 = vld [vmem:[%s4187_s21 + $0x1e0] sm:$0xff]   ;;  %v3998_v59 = vld [vmem:[%s4181_s18 + $0x1e8] sm:$0xff]  }
  0xd3   : > { %6074 = vst [vmem:[#allocation78_spill] sm:$0xff] %v5094_v8  ;;  %v834_v27 = vmax.f32 %v706_v3, 0.0  ;;  %v3348_v0 = vunpack.c.l.bf16 %v3997_v48  ;;  %v835_v16 = vmax.f32 %v707_v36, 0.0  ;;  %v3349_v14 = vunpack.c.h.bf16 %v3997_v48 }
  0xd4   : > { %4057 = vst [vmem:[%s4222_s28 + $0x1c8] sm:$0xff] %v3650_v2   ;;  %v708_v6 = vadd.f32 %v5090_v15, %v576_v53  ;;  %v709_v35 = vadd.f32 %v5090_v15, %v577_v22  ;;  %v3924_v53 = vunpack.c.l.bf16 %v4123_v21  ;;  %v3925_v8 = vunpack.c.h.bf16 %v4123_v21 }
  0xd5   : > { %v5105_v9 = vadd.f32 %v3916_v52, %v834_v27  ;;  %v578_v44 = vmul.f32 %v5074_v50, %v3348_v0  ;;  %v3655_v3 = vpack.c.bf16 %v835_v16, %v834_v27  ;;  %v5113_v55 = vadd.f32 %v3917_v11, %v835_v16  ;;  %v4124_v11 = vld [vmem:[%s4187_s21 + $0x1e8] sm:$0xff]  }
  0xd6   : > { %v579_v25 = vmul.f32 %v5074_v50, %v3349_v14  ;;  %v836_v48 = vmax.f32 %v708_v6, 0.0  ;;  %v837_v36 = vmax.f32 %v709_v35, 0.0  ;;  %v3352_v2 = vunpack.c.l.bf16 %v3998_v59 }
  0xd7   : > { %6075 = vst [vmem:[#allocation79_spill] sm:$0xff] %v5105_v9  ;;  %v710_v52 = vadd.f32 %v5090_v15, %v578_v44  ;;  %4058 = vst [vmem:[%s4222_s28 + $0x1d0] sm:$0xff] %v3655_v3   ;;  %v3353_v3 = vunpack.c.h.bf16 %v3998_v59  ;;  %v3999_v9 = vld [vmem:[%s4181_s18 + $0x1f0] sm:$0xff]   ;;  %v3929_v21 = vunpack.c.h.bf16 %v4124_v11 }
  0xd8   : > { %v711_v0 = vadd.f32 %v5090_v15, %v579_v25  ;;  %v3660_v27 = vpack.c.bf16 %v837_v36, %v836_v48  ;;  %v5122_v16 = vadd.f32 %v3920_v54, %v836_v48  ;;  %v5124_v14 = vadd.f32 %v3921_v60, %v837_v36  ;;  %v5138_v48 = vld [vmem:[%s4187_s21 + $0x1f0] sm:$0xff]   ;;  %v5148_v60 = vld [vmem:[%s4187_s21 + $0x1f8] sm:$0xff]  }
  0xd9   : > { %v838_v6 = vmax.f32 %v710_v52, 0.0  ;;  %v580_v22 = vmul.f32 %v5074_v50, %v3352_v2  ;;  %v3928_v25 = vunpack.c.l.bf16 %v4124_v11  ;;  %v581_v59 = vmul.f32 %v5074_v50, %v3353_v3 }
  0xda   : > { %6076 = vst [vmem:[#allocation80_spill] sm:$0xff] %v5122_v16  ;;  %6077 = vst [vmem:[#allocation81_spill] sm:$0xff] %v5124_v14  ;;  %v839_v44 = vmax.f32 %v711_v0, 0.0  ;;  %v4000_v0 = vld [vmem:[%s4181_s18 + $0x1f8] sm:$0xff]   ;;  %v3356_v35 = vunpack.c.l.bf16 %v3999_v9  ;;  %v3357_v16 = vunpack.c.h.bf16 %v3999_v9 }
  0xdb   : > { %4059 = vst [vmem:[%s4222_s28 + $0x1d8] sm:$0xff] %v3660_v27   ;;  %v5135_v54 = vadd.f32 %v3924_v53, %v838_v6  ;;  %v712_v2 = vadd.f32 %v5090_v15, %v580_v22  ;;  %v3360_v14 = vunpack.c.l.bf16 %v4000_v0  ;;  %v3361_v27 = vunpack.c.h.bf16 %v4000_v0 }
  0xdc   : > { %v3665_v36 = vpack.c.bf16 %v839_v44, %v838_v6  ;;  %v5140_v52 = vadd.f32 %v3925_v8, %v839_v44  ;;  %v713_v8 = vadd.f32 %v5090_v15, %v581_v59  ;;  %v3932_v44 = vunpack.c.l.bf16 %v5138_v48 }
  0xdd   : > { %v840_v6 = vmax.f32 %v712_v2, 0.0  ;;  %v582_v22 = vmul.f32 %v5074_v50, %v3356_v35  ;;  %v583_v3 = vmul.f32 %v5074_v50, %v3357_v16  ;;  %v3936_v53 = vunpack.c.l.bf16 %v5148_v60 }
  0xde   : > { %4060 = vst [vmem:[%s4222_s28 + $0x1e0] sm:$0xff] %v3665_v36   ;;  %v841_v11 = vmax.f32 %v713_v8, 0.0  ;;  %v3933_v36 = vunpack.c.h.bf16 %v5138_v48  ;;  %v584_v16 = vmul.f32 %v5074_v50, %v3360_v14 }
  0xdf   : > { %v5157_v9 = vadd.f32 %v3928_v25, %v840_v6  ;;  %v5162_v59 = vadd.f32 %v5090_v15, %v582_v22  ;;  %v5165_v35 = vadd.f32 %v5090_v15, %v583_v3  ;;  %v585_v25 = vmul.f32 %v5074_v50, %v3361_v27 }
  0xe0   : > { %v5169_v2 = vpack.c.bf16 %v841_v11, %v840_v6  ;;  %v5171_v0 = vadd.f32 %v3929_v21, %v841_v11  ;;  %v5178_v50 = vadd.f32 %v5090_v15, %v584_v16  ;;  %v6078_v27 = vpack.c.bf16 %v4226_v42, %v4226_v42 }
  0xe1   : > { %v3100_v8 = vpack.c.bf16 %v5157_v9, %v5157_v9  ;;  %v842_v22 = vmax.f32 %v5162_v59, 0.0  ;;  %v843_v14 = vmax.f32 %v5165_v35, 0.0  ;;  %v5181_v21 = vadd.f32 %v5090_v15, %v585_v25 }
  0xe2   : > { %2383 = vst.msk [vmem:[%s4222_s28] sm:$0xf] %vm2382_vm0, %v6078_v27  ;;  %v6079_v6 = vpack.c.bf16 %v4228_v43, %v4228_v43  ;;  %v6080_v3 = vpack.c.bf16 %v4230_v46, %v4230_v46  ;;  %v6081_v15 = vpack.c.bf16 %v4232_v47, %v4232_v47  ;;  %v6082_v42 = vpack.c.bf16 %v4238_v51, %v4238_v51 }
  0xe3   : > { %v6083_v43 = vpack.c.bf16 %v4247_v57, %v4247_v57  ;;  %v6084_v46 = vpack.c.bf16 %v4259_v7, %v4259_v7  ;;  %v6085_v47 = vpack.c.bf16 %v4265_v17, %v4265_v17  ;;  %v6086_v51 = vpack.c.bf16 %v4280_v39, %v4280_v39  ;;  %4061 = vst [vmem:[%s4222_s28 + $0x1e8] sm:$0xff] %v5169_v2  }
  0xe4   : > { %2384 = vst.msk [vmem:[%s4222_s28 + $0x4] sm:$0xf] %vm2382_vm0, %v6079_v6  ;;  %2385 = vst.msk [vmem:[%s4222_s28 + $0x8] sm:$0xf] %vm2382_vm0, %v6080_v3  ;;  %v6087_v57 = vpack.c.bf16 %v4282_v40, %v4282_v40  ;;  %v6088_v7 = vpack.c.bf16 %v4291_v56, %v4291_v56  ;;  %v6089_v17 = vpack.c.bf16 %v4294_v62, %v4294_v62  ;;  %v6122_v6 = vld [vmem:[#allocation6_spill] sm:$0xff]  ;;  %v845_v59 = vmax.f32 %v5181_v21, 0.0 }
  0xe5   : > { %2386 = vst.msk [vmem:[%s4222_s28 + $0xc] sm:$0xf] %vm2382_vm0, %v6081_v15  ;;  %2387 = vst.msk [vmem:[%s4222_s28 + $0x10] sm:$0xf] %vm2382_vm0, %v6082_v42  ;;  %v6090_v39 = vpack.c.bf16 %v4304_v12, %v4304_v12  ;;  %v6091_v40 = vpack.c.bf16 %v4306_v13, %v4306_v13  ;;  %v6092_v56 = vpack.c.bf16 %v4323_v38, %v4323_v38  ;;  %v6124_v15 = vld [vmem:[#allocation7_spill] sm:$0xff] }
  0xe6   : > { %2388 = vst.msk [vmem:[%s4222_s28 + $0x14] sm:$0xf] %vm2382_vm0, %v6083_v43  ;;  %2389 = vst.msk [vmem:[%s4222_s28 + $0x18] sm:$0xf] %vm2382_vm0, %v6084_v46  ;;  %v6093_v62 = vpack.c.bf16 %v4325_v41, %v4325_v41  ;;  %v6094_v12 = vpack.c.bf16 %v4340_v19, %v4340_v19  ;;  %v6095_v13 = vpack.c.bf16 %v4343_v26, %v4343_v26  ;;  %v6126_v43 = vld [vmem:[#allocation8_spill] sm:$0xff] }
  0xe7   : > { %2390 = vst.msk [vmem:[%s4222_s28 + $0x1c] sm:$0xf] %vm2382_vm0, %v6085_v47  ;;  %2391 = vst.msk [vmem:[%s4222_s28 + $0x20] sm:$0xf] %vm2382_vm0, %v6086_v51  ;;  %v6096_v38 = vpack.c.bf16 %v4351_v37, %v4351_v37  ;;  %v6097_v41 = vpack.c.bf16 %v4353_v33, %v4353_v33  ;;  %v6098_v19 = vpack.c.bf16 %v4366_v10, %v4366_v10  ;;  %v6128_v47 = vld [vmem:[#allocation9_spill] sm:$0xff] }
  0xe8   : > { %2392 = vst.msk [vmem:[%s4222_s28 + $0x24] sm:$0xf] %vm2382_vm0, %v6087_v57  ;;  %2393 = vst.msk [vmem:[%s4222_s28 + $0x28] sm:$0xf] %vm2382_vm0, %v6088_v7  ;;  %v6099_v26 = vpack.c.bf16 %v4371_v34, %v4371_v34  ;;  %v6100_v37 = vpack.c.bf16 %v4382_v63, %v4382_v63  ;;  %v6101_v33 = vpack.c.bf16 %v4388_v28, %v4388_v28  ;;  %v6130_v57 = vld [vmem:[#allocation10_spill] sm:$0xff] }
  0xe9   : > { %2394 = vst.msk [vmem:[%s4222_s28 + $0x2c] sm:$0xf] %vm2382_vm0, %v6089_v17  ;;  %2395 = vst.msk [vmem:[%s4222_s28 + $0x30] sm:$0xf] %vm2382_vm0, %v6090_v39  ;;  %v6102_v10 = vpack.c.bf16 %v4397_v32, %v4397_v32  ;;  %v6103_v34 = vpack.c.bf16 %v4399_v49, %v4399_v49  ;;  %v6104_v63 = vpack.c.bf16 %v4409_v29, %v4409_v29  ;;  %v6132_v17 = vld [vmem:[#allocation11_spill] sm:$0xff] }
  0xea   : > { %2396 = vst.msk [vmem:[%s4222_s28 + $0x34] sm:$0xf] %vm2382_vm0, %v6091_v40  ;;  %2397 = vst.msk [vmem:[%s4222_s28 + $0x38] sm:$0xf] %vm2382_vm0, %v6092_v56  ;;  %v6105_v28 = vpack.c.bf16 %v4412_v58, %v4412_v58  ;;  %v6106_v32 = vpack.c.bf16 %v4428_v24, %v4428_v24  ;;  %v6107_v49 = vpack.c.bf16 %v4430_v31, %v4430_v31  ;;  %v6134_v40 = vld [vmem:[#allocation12_spill] sm:$0xff] }
  0xeb   : > { %2398 = vst.msk [vmem:[%s4222_s28 + $0x3c] sm:$0xf] %vm2382_vm0, %v6093_v62  ;;  %2399 = vst.msk [vmem:[%s4222_s28 + $0x40] sm:$0xf] %vm2382_vm0, %v6094_v12  ;;  %v6108_v29 = vpack.c.bf16 %v4446_v4, %v4446_v4  ;;  %v6109_v58 = vpack.c.bf16 %v4448_v30, %v4448_v30  ;;  %v6110_v24 = vpack.c.bf16 %v4455_v61, %v4455_v61  ;;  %v6114_v61 = vld [vmem:[#allocation2_spill] sm:$0xff]  ;;  %v6136_v62 = vld [vmem:[#allocation13_spill] sm:$0xff] }
  0xec   : > { %2400 = vst.msk [vmem:[%s4222_s28 + $0x44] sm:$0xf] %vm2382_vm0, %v6095_v13  ;;  %2401 = vst.msk [vmem:[%s4222_s28 + $0x48] sm:$0xf] %vm2382_vm0, %v6096_v38  ;;  %v6111_v31 = vpack.c.bf16 %v4458_v45, %v4458_v45  ;;  %v6112_v4 = vpack.c.bf16 %v4469_v23, %v4469_v23  ;;  %v6113_v30 = vpack.c.bf16 %v4477_v20, %v4477_v20  ;;  %v6116_v45 = vld [vmem:[#allocation3_spill] sm:$0xff]  ;;  %v6118_v23 = vld [vmem:[#allocation4_spill] sm:$0xff] }
  0xed   : > { %2402 = vst.msk [vmem:[%s4222_s28 + $0x4c] sm:$0xf] %vm2382_vm0, %v6097_v41  ;;  %2403 = vst.msk [vmem:[%s4222_s28 + $0x50] sm:$0xf] %vm2382_vm0, %v6098_v19  ;;  %v6115_v11 = vpack.c.bf16 %v6114_v61, %v6114_v61  ;;  %v6117_v16 = vpack.c.bf16 %v6116_v45, %v6116_v45  ;;  %v6119_v25 = vpack.c.bf16 %v6118_v23, %v6118_v23  ;;  %v6120_v20 = vld [vmem:[#allocation5_spill] sm:$0xff]  ;;  %v6138_v13 = vld [vmem:[#allocation14_spill] sm:$0xff] }
  0xee   : > { %2404 = vst.msk [vmem:[%s4222_s28 + $0x54] sm:$0xf] %vm2382_vm0, %v6099_v26  ;;  %2405 = vst.msk [vmem:[%s4222_s28 + $0x58] sm:$0xf] %vm2382_vm0, %v6100_v37  ;;  %v6121_v27 = vpack.c.bf16 %v6120_v20, %v6120_v20  ;;  %v6123_v3 = vpack.c.bf16 %v6122_v6, %v6122_v6  ;;  %v6125_v42 = vpack.c.bf16 %v6124_v15, %v6124_v15  ;;  %v6140_v41 = vld [vmem:[#allocation15_spill] sm:$0xff]  ;;  %v6142_v26 = vld [vmem:[#allocation16_spill] sm:$0xff] }
  0xef   : > { %2406 = vst.msk [vmem:[%s4222_s28 + $0x5c] sm:$0xf] %vm2382_vm0, %v6101_v33  ;;  %2407 = vst.msk [vmem:[%s4222_s28 + $0x60] sm:$0xf] %vm2382_vm0, %v6102_v10  ;;  %v6127_v46 = vpack.c.bf16 %v6126_v43, %v6126_v43  ;;  %v6129_v51 = vpack.c.bf16 %v6128_v47, %v6128_v47  ;;  %v6131_v7 = vpack.c.bf16 %v6130_v57, %v6130_v57  ;;  %v6144_v33 = vld [vmem:[#allocation17_spill] sm:$0xff] }
  0xf0   : > { %2408 = vst.msk [vmem:[%s4222_s28 + $0x64] sm:$0xf] %vm2382_vm0, %v6103_v34  ;;  %2409 = vst.msk [vmem:[%s4222_s28 + $0x68] sm:$0xf] %vm2382_vm0, %v6104_v63  ;;  %v6133_v39 = vpack.c.bf16 %v6132_v17, %v6132_v17  ;;  %v6135_v56 = vpack.c.bf16 %v6134_v40, %v6134_v40  ;;  %v6137_v12 = vpack.c.bf16 %v6136_v62, %v6136_v62  ;;  %v6146_v34 = vld [vmem:[#allocation18_spill] sm:$0xff] }
  0xf1   : > { %2410 = vst.msk [vmem:[%s4222_s28 + $0x6c] sm:$0xf] %vm2382_vm0, %v6105_v28  ;;  %2411 = vst.msk [vmem:[%s4222_s28 + $0x70] sm:$0xf] %vm2382_vm0, %v6106_v32  ;;  %v6139_v38 = vpack.c.bf16 %v6138_v13, %v6138_v13  ;;  %v6141_v19 = vpack.c.bf16 %v6140_v41, %v6140_v41  ;;  %v6143_v37 = vpack.c.bf16 %v6142_v26, %v6142_v26  ;;  %v6148_v28 = vld [vmem:[#allocation19_spill] sm:$0xff] }
  0xf2   : > { %2412 = vst.msk [vmem:[%s4222_s28 + $0x74] sm:$0xf] %vm2382_vm0, %v6107_v49  ;;  %2413 = vst.msk [vmem:[%s4222_s28 + $0x78] sm:$0xf] %vm2382_vm0, %v6108_v29  ;;  %v6145_v10 = vpack.c.bf16 %v6144_v33, %v6144_v33  ;;  %v6147_v63 = vpack.c.bf16 %v6146_v34, %v6146_v34  ;;  %v6149_v32 = vpack.c.bf16 %v6148_v28, %v6148_v28  ;;  %v6150_v49 = vld [vmem:[#allocation20_spill] sm:$0xff] }
  0xf3   : > { %2414 = vst.msk [vmem:[%s4222_s28 + $0x7c] sm:$0xf] %vm2382_vm0, %v6109_v58  ;;  %2415 = vst.msk [vmem:[%s4222_s28 + $0x80] sm:$0xf] %vm2382_vm0, %v6110_v24  ;;  %v6151_v29 = vpack.c.bf16 %v6150_v49, %v6150_v49  ;;  %v6152_v58 = vld [vmem:[#allocation21_spill] sm:$0xff]  ;;  %v1867_v2 = vadd.f32 %v3933_v36, %v843_v14 }
  0xf4   : > { %2416 = vst.msk [vmem:[%s4222_s28 + $0x84] sm:$0xf] %vm2382_vm0, %v6111_v31  ;;  %2417 = vst.msk [vmem:[%s4222_s28 + $0x88] sm:$0xf] %vm2382_vm0, %v6112_v4  ;;  %v6153_v24 = vpack.c.bf16 %v6152_v58, %v6152_v58  ;;  %v6154_v31 = vld [vmem:[#allocation22_spill] sm:$0xff] }
  0xf5   : > { %2418 = vst.msk [vmem:[%s4222_s28 + $0x8c] sm:$0xf] %vm2382_vm0, %v6113_v30  ;;  %2419 = vst.msk [vmem:[%s4222_s28 + $0x90] sm:$0xf] %vm2382_vm0, %v6115_v11  ;;  %v6155_v4 = vpack.c.bf16 %v6154_v31, %v6154_v31  ;;  %v6156_v30 = vld [vmem:[#allocation23_spill] sm:$0xff]  ;;  %v6158_v11 = vld [vmem:[#allocation24_spill] sm:$0xff] }
  0xf6   : > { %2420 = vst.msk [vmem:[%s4222_s28 + $0x94] sm:$0xf] %vm2382_vm0, %v6117_v16  ;;  %2421 = vst.msk [vmem:[%s4222_s28 + $0x98] sm:$0xf] %vm2382_vm0, %v6119_v25  ;;  %v6157_v61 = vpack.c.bf16 %v6156_v30, %v6156_v30  ;;  %v6159_v45 = vpack.c.bf16 %v6158_v11, %v6158_v11  ;;  %v6160_v16 = vld [vmem:[#allocation25_spill] sm:$0xff]  ;;  %v6162_v25 = vld [vmem:[#allocation26_spill] sm:$0xff] }
  0xf7   : > { %2422 = vst.msk [vmem:[%s4222_s28 + $0x9c] sm:$0xf] %vm2382_vm0, %v6121_v27  ;;  %2423 = vst.msk [vmem:[%s4222_s28 + $0xa0] sm:$0xf] %vm2382_vm0, %v6123_v3  ;;  %v6161_v23 = vpack.c.bf16 %v6160_v16, %v6160_v16  ;;  %v6163_v20 = vpack.c.bf16 %v6162_v25, %v6162_v25  ;;  %v6164_v27 = vld [vmem:[#allocation27_spill] sm:$0xff]  ;;  %v6166_v3 = vld [vmem:[#allocation28_spill] sm:$0xff] }
  0xf8   : > { %2424 = vst.msk [vmem:[%s4222_s28 + $0xa4] sm:$0xf] %vm2382_vm0, %v6125_v42  ;;  %2425 = vst.msk [vmem:[%s4222_s28 + $0xa8] sm:$0xf] %vm2382_vm0, %v6127_v46  ;;  %v6165_v6 = vpack.c.bf16 %v6164_v27, %v6164_v27  ;;  %v6167_v15 = vpack.c.bf16 %v6166_v3, %v6166_v3  ;;  %v6168_v42 = vld [vmem:[#allocation29_spill] sm:$0xff]  ;;  %v6170_v46 = vld [vmem:[#allocation30_spill] sm:$0xff] }
  0xf9   : > { %2426 = vst.msk [vmem:[%s4222_s28 + $0xac] sm:$0xf] %vm2382_vm0, %v6129_v51  ;;  %2427 = vst.msk [vmem:[%s4222_s28 + $0xb0] sm:$0xf] %vm2382_vm0, %v6131_v7  ;;  %v6169_v43 = vpack.c.bf16 %v6168_v42, %v6168_v42  ;;  %v6171_v47 = vpack.c.bf16 %v6170_v46, %v6170_v46  ;;  %v6172_v51 = vld [vmem:[#allocation31_spill] sm:$0xff]  ;;  %v6174_v7 = vld [vmem:[#allocation32_spill] sm:$0xff] }
  0xfa   : > { %2428 = vst.msk [vmem:[%s4222_s28 + $0xb4] sm:$0xf] %vm2382_vm0, %v6133_v39  ;;  %2429 = vst.msk [vmem:[%s4222_s28 + $0xb8] sm:$0xf] %vm2382_vm0, %v6135_v56  ;;  %v6173_v57 = vpack.c.bf16 %v6172_v51, %v6172_v51  ;;  %v6175_v17 = vpack.c.bf16 %v6174_v7, %v6174_v7  ;;  %v6176_v39 = vld [vmem:[#allocation33_spill] sm:$0xff]  ;;  %v6178_v56 = vld [vmem:[#allocation34_spill] sm:$0xff] }
  0xfb   : > { %2430 = vst.msk [vmem:[%s4222_s28 + $0xbc] sm:$0xf] %vm2382_vm0, %v6137_v12  ;;  %2431 = vst.msk [vmem:[%s4222_s28 + $0xc0] sm:$0xf] %vm2382_vm0, %v6139_v38  ;;  %v6177_v40 = vpack.c.bf16 %v6176_v39, %v6176_v39  ;;  %v6179_v62 = vpack.c.bf16 %v6178_v56, %v6178_v56  ;;  %v6180_v12 = vld [vmem:[#allocation35_spill] sm:$0xff]  ;;  %v6182_v38 = vld [vmem:[#allocation36_spill] sm:$0xff] }
  0xfc   : > { %2432 = vst.msk [vmem:[%s4222_s28 + $0xc4] sm:$0xf] %vm2382_vm0, %v6141_v19  ;;  %2433 = vst.msk [vmem:[%s4222_s28 + $0xc8] sm:$0xf] %vm2382_vm0, %v6143_v37  ;;  %v6181_v13 = vpack.c.bf16 %v6180_v12, %v6180_v12  ;;  %v6183_v41 = vpack.c.bf16 %v6182_v38, %v6182_v38  ;;  %v6184_v19 = vld [vmem:[#allocation37_spill] sm:$0xff]  ;;  %v6186_v37 = vld [vmem:[#allocation38_spill] sm:$0xff] }
  0xfd   : > { %2434 = vst.msk [vmem:[%s4222_s28 + $0xcc] sm:$0xf] %vm2382_vm0, %v6145_v10  ;;  %2435 = vst.msk [vmem:[%s4222_s28 + $0xd0] sm:$0xf] %vm2382_vm0, %v6147_v63  ;;  %v6185_v26 = vpack.c.bf16 %v6184_v19, %v6184_v19  ;;  %v6187_v33 = vpack.c.bf16 %v6186_v37, %v6186_v37  ;;  %v6188_v10 = vld [vmem:[#allocation39_spill] sm:$0xff]  ;;  %v6190_v63 = vld [vmem:[#allocation40_spill] sm:$0xff] }
  0xfe   : > { %2436 = vst.msk [vmem:[%s4222_s28 + $0xd4] sm:$0xf] %vm2382_vm0, %v6149_v32  ;;  %2437 = vst.msk [vmem:[%s4222_s28 + $0xd8] sm:$0xf] %vm2382_vm0, %v6151_v29  ;;  %v6189_v34 = vpack.c.bf16 %v6188_v10, %v6188_v10  ;;  %v6191_v28 = vpack.c.bf16 %v6190_v63, %v6190_v63  ;;  %v6192_v32 = vld [vmem:[#allocation41_spill] sm:$0xff]  ;;  %v6194_v29 = vld [vmem:[#allocation42_spill] sm:$0xff] }
  0xff   : > { %2438 = vst.msk [vmem:[%s4222_s28 + $0xdc] sm:$0xf] %vm2382_vm0, %v6153_v24  ;;  %2439 = vst.msk [vmem:[%s4222_s28 + $0xe0] sm:$0xf] %vm2382_vm0, %v6155_v4  ;;  %v6193_v49 = vpack.c.bf16 %v6192_v32, %v6192_v32  ;;  %v6195_v58 = vpack.c.bf16 %v6194_v29, %v6194_v29  ;;  %v6196_v24 = vld [vmem:[#allocation43_spill] sm:$0xff]  ;;  %v6198_v4 = vld [vmem:[#allocation44_spill] sm:$0xff] }
 0x100   : > { %2440 = vst.msk [vmem:[%s4222_s28 + $0xe4] sm:$0xf] %vm2382_vm0, %v6157_v61  ;;  %2441 = vst.msk [vmem:[%s4222_s28 + $0xe8] sm:$0xf] %vm2382_vm0, %v6159_v45  ;;  %v6197_v31 = vpack.c.bf16 %v6196_v24, %v6196_v24  ;;  %v6199_v30 = vpack.c.bf16 %v6198_v4, %v6198_v4  ;;  %v6200_v61 = vld [vmem:[#allocation45_spill] sm:$0xff]  ;;  %v6202_v45 = vld [vmem:[#allocation46_spill] sm:$0xff] }
 0x101   : > { %2442 = vst.msk [vmem:[%s4222_s28 + $0xec] sm:$0xf] %vm2382_vm0, %v6161_v23  ;;  %2443 = vst.msk [vmem:[%s4222_s28 + $0xf0] sm:$0xf] %vm2382_vm0, %v6163_v20  ;;  %v6201_v11 = vpack.c.bf16 %v6200_v61, %v6200_v61  ;;  %v6203_v16 = vpack.c.bf16 %v6202_v45, %v6202_v45  ;;  %v6204_v23 = vld [vmem:[#allocation47_spill] sm:$0xff]  ;;  %v6206_v20 = vld [vmem:[#allocation48_spill] sm:$0xff] }
 0x102   : > { %2444 = vst.msk [vmem:[%s4222_s28 + $0xf4] sm:$0xf] %vm2382_vm0, %v6165_v6  ;;  %2445 = vst.msk [vmem:[%s4222_s28 + $0xf8] sm:$0xf] %vm2382_vm0, %v6167_v15  ;;  %v6205_v25 = vpack.c.bf16 %v6204_v23, %v6204_v23  ;;  %v6207_v27 = vpack.c.bf16 %v6206_v20, %v6206_v20  ;;  %v6208_v6 = vld [vmem:[#allocation49_spill] sm:$0xff]  ;;  %v6210_v15 = vld [vmem:[#allocation50_spill] sm:$0xff] }
 0x103   : > { %2446 = vst.msk [vmem:[%s4222_s28 + $0xfc] sm:$0xf] %vm2382_vm0, %v6169_v43  ;;  %2447 = vst.msk [vmem:[%s4222_s28 + $0x100] sm:$0xf] %vm2382_vm0, %v6171_v47  ;;  %v6209_v3 = vpack.c.bf16 %v6208_v6, %v6208_v6  ;;  %v6211_v42 = vpack.c.bf16 %v6210_v15, %v6210_v15  ;;  %v6212_v43 = vld [vmem:[#allocation51_spill] sm:$0xff]  ;;  %v6214_v47 = vld [vmem:[#allocation52_spill] sm:$0xff] }
 0x104   : > { %2448 = vst.msk [vmem:[%s4222_s28 + $0x104] sm:$0xf] %vm2382_vm0, %v6173_v57  ;;  %2449 = vst.msk [vmem:[%s4222_s28 + $0x108] sm:$0xf] %vm2382_vm0, %v6175_v17  ;;  %v6213_v46 = vpack.c.bf16 %v6212_v43, %v6212_v43  ;;  %v6215_v51 = vpack.c.bf16 %v6214_v47, %v6214_v47  ;;  %v6216_v57 = vld [vmem:[#allocation53_spill] sm:$0xff]  ;;  %v6218_v17 = vld [vmem:[#allocation54_spill] sm:$0xff] }
 0x105   : > { %2450 = vst.msk [vmem:[%s4222_s28 + $0x10c] sm:$0xf] %vm2382_vm0, %v6177_v40  ;;  %2451 = vst.msk [vmem:[%s4222_s28 + $0x110] sm:$0xf] %vm2382_vm0, %v6179_v62  ;;  %v6217_v7 = vpack.c.bf16 %v6216_v57, %v6216_v57  ;;  %v6219_v39 = vpack.c.bf16 %v6218_v17, %v6218_v17  ;;  %v6220_v40 = vld [vmem:[#allocation55_spill] sm:$0xff]  ;;  %v6222_v62 = vld [vmem:[#allocation56_spill] sm:$0xff]  ;;  %v6261_v17 = vpack.c.bf16 %v5055_v5, %v5055_v5 }
 0x106   : > { %2452 = vst.msk [vmem:[%s4222_s28 + $0x114] sm:$0xf] %vm2382_vm0, %v6181_v13  ;;  %2453 = vst.msk [vmem:[%s4222_s28 + $0x118] sm:$0xf] %vm2382_vm0, %v6183_v41  ;;  %v6221_v56 = vpack.c.bf16 %v6220_v40, %v6220_v40  ;;  %v6223_v12 = vpack.c.bf16 %v6222_v62, %v6222_v62  ;;  %v6224_v13 = vld [vmem:[#allocation57_spill] sm:$0xff]  ;;  %v6226_v41 = vld [vmem:[#allocation58_spill] sm:$0xff] }
 0x107   : > { %2454 = vst.msk [vmem:[%s4222_s28 + $0x11c] sm:$0xf] %vm2382_vm0, %v6185_v26  ;;  %2455 = vst.msk [vmem:[%s4222_s28 + $0x120] sm:$0xf] %vm2382_vm0, %v6187_v33  ;;  %v6225_v38 = vpack.c.bf16 %v6224_v13, %v6224_v13  ;;  %v6227_v19 = vpack.c.bf16 %v6226_v41, %v6226_v41  ;;  %v6228_v26 = vld [vmem:[#allocation59_spill] sm:$0xff]  ;;  %v6230_v33 = vld [vmem:[#allocation60_spill] sm:$0xff] }
 0x108   : > { %2456 = vst.msk [vmem:[%s4222_s28 + $0x124] sm:$0xf] %vm2382_vm0, %v6189_v34  ;;  %2457 = vst.msk [vmem:[%s4222_s28 + $0x128] sm:$0xf] %vm2382_vm0, %v6191_v28  ;;  %v6229_v37 = vpack.c.bf16 %v6228_v26, %v6228_v26  ;;  %v6231_v10 = vpack.c.bf16 %v6230_v33, %v6230_v33  ;;  %v6232_v34 = vld [vmem:[#allocation61_spill] sm:$0xff]  ;;  %v6234_v28 = vld [vmem:[#allocation62_spill] sm:$0xff]  ;;  %v6273_v26 = vpack.c.bf16 %v5113_v55, %v5113_v55 }
 0x109   : > { %2458 = vst.msk [vmem:[%s4222_s28 + $0x12c] sm:$0xf] %vm2382_vm0, %v6193_v49  ;;  %2459 = vst.msk [vmem:[%s4222_s28 + $0x130] sm:$0xf] %vm2382_vm0, %v6195_v58  ;;  %v6233_v63 = vpack.c.bf16 %v6232_v34, %v6232_v34  ;;  %v6235_v32 = vpack.c.bf16 %v6234_v28, %v6234_v28  ;;  %v6236_v49 = vld [vmem:[#allocation63_spill] sm:$0xff]  ;;  %v6238_v58 = vld [vmem:[#allocation64_spill] sm:$0xff]  ;;  %v6278_v34 = vpack.c.bf16 %v5135_v54, %v5135_v54  ;;  %v3937_v28 = vunpack.c.h.bf16 %v5148_v60 }
 0x10a   : > { %2460 = vst.msk [vmem:[%s4222_s28 + $0x134] sm:$0xf] %vm2382_vm0, %v6197_v31  ;;  %2461 = vst.msk [vmem:[%s4222_s28 + $0x138] sm:$0xf] %vm2382_vm0, %v6199_v30  ;;  %v6237_v29 = vpack.c.bf16 %v6236_v49, %v6236_v49  ;;  %v6239_v24 = vpack.c.bf16 %v6238_v58, %v6238_v58  ;;  %v6240_v31 = vld [vmem:[#allocation65_spill] sm:$0xff]  ;;  %v6242_v30 = vld [vmem:[#allocation66_spill] sm:$0xff]  ;;  %v6279_v55 = vpack.c.bf16 %v5140_v52, %v5140_v52 }
 0x10b   : > { %2462 = vst.msk [vmem:[%s4222_s28 + $0x13c] sm:$0xf] %vm2382_vm0, %v6201_v11  ;;  %2463 = vst.msk [vmem:[%s4222_s28 + $0x140] sm:$0xf] %vm2382_vm0, %v6203_v16  ;;  %v6241_v4 = vpack.c.bf16 %v6240_v31, %v6240_v31  ;;  %v6243_v61 = vpack.c.bf16 %v6242_v30, %v6242_v30  ;;  %v6244_v11 = vld [vmem:[#allocation67_spill] sm:$0xff]  ;;  %v6246_v16 = vld [vmem:[#allocation68_spill] sm:$0xff]  ;;  %v3675_v54 = vpack.c.bf16 %v843_v14, %v842_v22 }
 0x10c   : > { %2464 = vst.msk [vmem:[%s4222_s28 + $0x144] sm:$0xf] %vm2382_vm0, %v6205_v25  ;;  %2465 = vst.msk [vmem:[%s4222_s28 + $0x148] sm:$0xf] %vm2382_vm0, %v6207_v27  ;;  %v6245_v45 = vpack.c.bf16 %v6244_v11, %v6244_v11  ;;  %v6247_v23 = vpack.c.bf16 %v6246_v16, %v6246_v16  ;;  %v6248_v25 = vld [vmem:[#allocation69_spill] sm:$0xff]  ;;  %v6250_v27 = vld [vmem:[#allocation70_spill] sm:$0xff]  ;;  %v1866_v52 = vadd.f32 %v3932_v44, %v842_v22 }
 0x10d   : > { %2466 = vst.msk [vmem:[%s4222_s28 + $0x14c] sm:$0xf] %vm2382_vm0, %v6209_v3  ;;  %2467 = vst.msk [vmem:[%s4222_s28 + $0x150] sm:$0xf] %vm2382_vm0, %v6211_v42  ;;  %v6249_v20 = vpack.c.bf16 %v6248_v25, %v6248_v25  ;;  %v6251_v6 = vpack.c.bf16 %v6250_v27, %v6250_v27  ;;  %v6252_v3 = vld [vmem:[#allocation71_spill] sm:$0xff]  ;;  %v6254_v42 = vld [vmem:[#allocation72_spill] sm:$0xff]  ;;  %v3103_v22 = vpack.c.bf16 %v1867_v2, %v1867_v2 }
 0x10e   : > { %2468 = vst.msk [vmem:[%s4222_s28 + $0x154] sm:$0xf] %vm2382_vm0, %v6213_v46  ;;  %2469 = vst.msk [vmem:[%s4222_s28 + $0x158] sm:$0xf] %vm2382_vm0, %v6215_v51  ;;  %v6253_v15 = vpack.c.bf16 %v6252_v3, %v6252_v3  ;;  %v6255_v43 = vpack.c.bf16 %v6254_v42, %v6254_v42  ;;  %v6256_v46 = vld [vmem:[#allocation73_spill] sm:$0xff]  ;;  %v6258_v51 = vld [vmem:[#allocation74_spill] sm:$0xff]  ;;  %v3102_v44 = vpack.c.bf16 %v1866_v52, %v1866_v52 }
 0x10f   : > { %2470 = vst.msk [vmem:[%s4222_s28 + $0x15c] sm:$0xf] %vm2382_vm0, %v6217_v7  ;;  %2471 = vst.msk [vmem:[%s4222_s28 + $0x160] sm:$0xf] %vm2382_vm0, %v6219_v39  ;;  %v6257_v47 = vpack.c.bf16 %v6256_v46, %v6256_v46  ;;  %v6259_v57 = vpack.c.bf16 %v6258_v51, %v6258_v51  ;;  %v6260_v7 = vpack.c.bf16 %v5039_v1, %v5039_v1  ;;  %v6262_v39 = vld [vmem:[#allocation75_spill] sm:$0xff]  ;;  %v6268_v13 = vld [vmem:[#allocation78_spill] sm:$0xff] }
 0x110   : > { %2472 = vst.msk [vmem:[%s4222_s28 + $0x164] sm:$0xf] %vm2382_vm0, %v6221_v56  ;;  %2473 = vst.msk [vmem:[%s4222_s28 + $0x168] sm:$0xf] %vm2382_vm0, %v6223_v12  ;;  %v6263_v40 = vpack.c.bf16 %v6262_v39, %v6262_v39  ;;  %v6264_v56 = vld [vmem:[#allocation76_spill] sm:$0xff]  ;;  %v6266_v12 = vld [vmem:[#allocation77_spill] sm:$0xff]  ;;  %v6269_v5 = vpack.c.bf16 %v6268_v13, %v6268_v13  ;;  %v1869_v35 = vadd.f32 %v3937_v28, %v845_v59 }
 0x111   : > { %2474 = vst.msk [vmem:[%s4222_s28 + $0x16c] sm:$0xf] %vm2382_vm0, %v6225_v38  ;;  %2475 = vst.msk [vmem:[%s4222_s28 + $0x170] sm:$0xf] %vm2382_vm0, %v6227_v19  ;;  %v6265_v62 = vpack.c.bf16 %v6264_v56, %v6264_v56  ;;  %v6267_v1 = vpack.c.bf16 %v6266_v12, %v6266_v12  ;;  %v6270_v38 = vpack.c.bf16 %v5096_v18, %v5096_v18  ;;  %v6271_v41 = vld [vmem:[#allocation79_spill] sm:$0xff]  ;;  %v6276_v18 = vld [vmem:[#allocation81_spill] sm:$0xff] }
 0x112   : > { %2476 = vst.msk [vmem:[%s4222_s28 + $0x174] sm:$0xf] %vm2382_vm0, %v6229_v37  ;;  %2477 = vst.msk [vmem:[%s4222_s28 + $0x178] sm:$0xf] %vm2382_vm0, %v6231_v10  ;;  %v6272_v19 = vpack.c.bf16 %v6271_v41, %v6271_v41  ;;  %v6274_v37 = vld [vmem:[#allocation80_spill] sm:$0xff]  ;;  %v6277_v10 = vpack.c.bf16 %v6276_v18, %v6276_v18  ;;  %v3105_v9 = vpack.c.bf16 %v1869_v35, %v1869_v35 }
 0x113   : > { %2478 = vst.msk [vmem:[%s4222_s28 + $0x17c] sm:$0xf] %vm2382_vm0, %v6233_v63  ;;  %2479 = vst.msk [vmem:[%s4222_s28 + $0x180] sm:$0xf] %vm2382_vm0, %v6235_v32  ;;  %v6275_v33 = vpack.c.bf16 %v6274_v37, %v6274_v37  ;;  %v3101_v63 = vpack.c.bf16 %v5171_v0, %v5171_v0  ;;  %v844_v0 = vmax.f32 %v5178_v50, 0.0 }
 0x114   : > { %2480 = vst.msk [vmem:[%s4222_s28 + $0x184] sm:$0xf] %vm2382_vm0, %v6237_v29  ;;  %2481 = vst.msk [vmem:[%s4222_s28 + $0x188] sm:$0xf] %vm2382_vm0, %v6239_v24 }
 0x115   : > { %2482 = vst.msk [vmem:[%s4222_s28 + $0x18c] sm:$0xf] %vm2382_vm0, %v6241_v4  ;;  %2483 = vst.msk [vmem:[%s4222_s28 + $0x190] sm:$0xf] %vm2382_vm0, %v6243_v61  ;;  %v1868_v48 = vadd.f32 %v3936_v53, %v844_v0  ;;  %v3680_v36 = vpack.c.bf16 %v845_v59, %v844_v0 }
 0x116   : > { %2484 = vst.msk [vmem:[%s4222_s28 + $0x194] sm:$0xf] %vm2382_vm0, %v6245_v45  ;;  %2485 = vst.msk [vmem:[%s4222_s28 + $0x198] sm:$0xf] %vm2382_vm0, %v6247_v23 }
 0x117   : > { %2486 = vst.msk [vmem:[%s4222_s28 + $0x19c] sm:$0xf] %vm2382_vm0, %v6249_v20  ;;  %2487 = vst.msk [vmem:[%s4222_s28 + $0x1a0] sm:$0xf] %vm2382_vm0, %v6251_v6  ;;  %v3104_v14 = vpack.c.bf16 %v1868_v48, %v1868_v48 }
 0x118   : > { %2488 = vst.msk [vmem:[%s4222_s28 + $0x1a4] sm:$0xf] %vm2382_vm0, %v6253_v15  ;;  %2489 = vst.msk [vmem:[%s4222_s28 + $0x1a8] sm:$0xf] %vm2382_vm0, %v6255_v43 }
 0x119   : > { %2490 = vst.msk [vmem:[%s4222_s28 + $0x1ac] sm:$0xf] %vm2382_vm0, %v6257_v47  ;;  %2491 = vst.msk [vmem:[%s4222_s28 + $0x1b0] sm:$0xf] %vm2382_vm0, %v6259_v57 }
 0x11a   : > { %2492 = vst.msk [vmem:[%s4222_s28 + $0x1b4] sm:$0xf] %vm2382_vm0, %v6260_v7  ;;  %2493 = vst.msk [vmem:[%s4222_s28 + $0x1b8] sm:$0xf] %vm2382_vm0, %v6261_v17 }
 0x11b   : > { %2494 = vst.msk [vmem:[%s4222_s28 + $0x1bc] sm:$0xf] %vm2382_vm0, %v6263_v40  ;;  %2495 = vst.msk [vmem:[%s4222_s28 + $0x1c0] sm:$0xf] %vm2382_vm0, %v6265_v62 }
 0x11c   : > { %2496 = vst.msk [vmem:[%s4222_s28 + $0x1c4] sm:$0xf] %vm2382_vm0, %v6267_v1  ;;  %2497 = vst.msk [vmem:[%s4222_s28 + $0x1c8] sm:$0xf] %vm2382_vm0, %v6269_v5 }
 0x11d   : > { %2498 = vst.msk [vmem:[%s4222_s28 + $0x1cc] sm:$0xf] %vm2382_vm0, %v6270_v38  ;;  %2499 = vst.msk [vmem:[%s4222_s28 + $0x1d0] sm:$0xf] %vm2382_vm0, %v6272_v19 }
 0x11e   : > { %2500 = vst.msk [vmem:[%s4222_s28 + $0x1d4] sm:$0xf] %vm2382_vm0, %v6273_v26  ;;  %2501 = vst.msk [vmem:[%s4222_s28 + $0x1d8] sm:$0xf] %vm2382_vm0, %v6275_v33 }
 0x11f   : > { %2502 = vst.msk [vmem:[%s4222_s28 + $0x1dc] sm:$0xf] %vm2382_vm0, %v6277_v10  ;;  %2503 = vst.msk [vmem:[%s4222_s28 + $0x1e0] sm:$0xf] %vm2382_vm0, %v6278_v34 }
 0x120   : > { %2504 = vst.msk [vmem:[%s4222_s28 + $0x1e4] sm:$0xf] %vm2382_vm0, %v6279_v55  ;;  %2505 = vst.msk [vmem:[%s4222_s28 + $0x1e8] sm:$0xf] %vm2382_vm0, %v3100_v8 }
 0x121   : > { %2506 = vst.msk [vmem:[%s4222_s28 + $0x1ec] sm:$0xf] %vm2382_vm0, %v3101_v63  ;;  %4062 = vst [vmem:[%s4222_s28 + $0x1f0] sm:$0xff] %v3675_v54  }
 0x122   : > { %2507 = vst.msk [vmem:[%s4222_s28 + $0x1f0] sm:$0xf] %vm2382_vm0, %v3102_v44  ;;  %2508 = vst.msk [vmem:[%s4222_s28 + $0x1f4] sm:$0xf] %vm2382_vm0, %v3103_v22 }
 0x123   : > { %4063 = vst [vmem:[%s4222_s28 + $0x1f8] sm:$0xff] %v3680_v36  }
 0x124   : > { %2509 = vst.msk [vmem:[%s4222_s28 + $0x1f8] sm:$0xf] %vm2382_vm0, %v3104_v14  ;;  %2510 = vst.msk [vmem:[%s4222_s28 + $0x1fc] sm:$0xf] %vm2382_vm0, %v3105_v9 }
 0x125 PF: > { %s13_s12 = sadd.s32 1, %s4145_s12  }
 0x126   : > { %p10_p4 = scmp.ge.s32.totalorder %s13_s12, 4  }
 0x128   :  { %12 = sbr.rel (!%p10_p4) target bundleno = 1 (0x1), region = 65 }

// kernel: decoder_block_forward.11
= control target key start
LH: loop header
LB: loop body
LE: loop exit
PB: predicated region body
PF: predicated region fallthrough
CT: control target
= control target key end

     0   :  { %s1346_s9 = smov 0   ;;  %s1839_s0 = inlined_call_operand.vmem [shape: bf16[2048,128], index: 0, kind: input, shape index: {}]   ;;  %s1840_s1 = inlined_call_operand.vmem [shape: f32[8,128], index: 1, kind: input, shape index: {}]   ;;  %s1841_s2 = inlined_call_operand.vmem [shape: f32[2048,128], index: 2, kind: output, shape index: {}]  }
   0x1 LB: > { %s981_s10 = sadd.s32 4294967295, %s1329_s9   ;;  %p985_p0 = scmp.ge.s32.totalorder %s1329_s9, 1  ;;  %s1329_s9 = sphi %s1346_s9, %s12_s9  }
   0x2   : > { %p113_p1 = scmp.lt.s32.totalorder %s1329_s9, 3 }
   0x4   : > { %p114_p2 = pnand %p985_p0, %p113_p1 }
   0x5   : > { %s986_s11 = sshll.u32 (!%p114_p2), %s981_s10, 7 }
   0x6   : > { %117 = sbr.rel (%p114_p2) target bundleno = 147 (0x93), region = 28  ;;  %p136_p3 = scmp.lt.s32.totalorder (!%p114_p2), %s986_s11, 255 }
   0xb   : > { %s1843_s11 = smov (!%p136_p3, %s986_s11), 255  ;;  %v1365_v0 = vld [vmem:[%s1840_s1] ss:$0 sm:$0xff]  ;;  %v1374_v9 = vld [vmem:[%s1840_s1 + $0x1] ss:$0 sm:$0xff] }
   0xc   : > { %s987_s12 = sshll.u32 %s1843_s11, 2  ;;  %s989_s20 = sshll.u32 %s1843_s11, 3 }
   0xd   : > { %s1360_s15 = scalar_lea.vmem %s1839_s0, %s987_s12  ;;  %s1392_s23 = scalar_lea.vmem %s1841_s2, %s989_s20 }
   0xe   : > { %v995_v1 = vld [vmem:[%s1360_s15] sm:$0xff]   ;;  %v1250_v2 = vld [vmem:[%s1360_s15 + $0x8] sm:$0xff]   ;;  %v1251_v3 = vld [vmem:[%s1360_s15 + $0x10] sm:$0xff]  }
   0xf   : > { %v996_v4 = vunpack.c.l.bf16 %v995_v1  ;;  %v997_v5 = vunpack.c.h.bf16 %v995_v1  ;;  %v1000_v6 = vunpack.c.l.bf16 %v1250_v2  ;;  %v1001_v7 = vunpack.c.h.bf16 %v1250_v2  ;;  %v1252_v8 = vld [vmem:[%s1360_s15 + $0x18] sm:$0xff]   ;;  %v1253_v30 = vld [vmem:[%s1360_s15 + $0x20] sm:$0xff]   ;;  %v1254_v31 = vld [vmem:[%s1360_s15 + $0x28] sm:$0xff]  }
  0x10   : > { %v1004_v10 = vunpack.c.l.bf16 %v1251_v3  ;;  %v1005_v11 = vunpack.c.h.bf16 %v1251_v3  ;;  %v1008_v12 = vunpack.c.l.bf16 %v1252_v8  ;;  %v1009_v13 = vunpack.c.h.bf16 %v1252_v8  ;;  %v1255_v36 = vld [vmem:[%s1360_s15 + $0x30] sm:$0xff]   ;;  %v1256_v37 = vld [vmem:[%s1360_s15 + $0x38] sm:$0xff]   ;;  %v1257_v3 = vld [vmem:[%s1360_s15 + $0x40] sm:$0xff]  }
  0x11   : > { %v409_v14 = vmul.f32 %v996_v4, %v1365_v0  ;;  %v410_v15 = vmul.f32 %v997_v5, %v1365_v0  ;;  %v411_v16 = vmul.f32 %v1000_v6, %v1365_v0  ;;  %v412_v17 = vmul.f32 %v1001_v7, %v1365_v0  ;;  %v1258_v4 = vld [vmem:[%s1360_s15 + $0x48] sm:$0xff]  }
  0x12   : > { %v413_v18 = vmul.f32 %v1004_v10, %v1365_v0  ;;  %v414_v19 = vmul.f32 %v1005_v11, %v1365_v0  ;;  %v415_v20 = vmul.f32 %v1008_v12, %v1365_v0  ;;  %v416_v21 = vmul.f32 %v1009_v13, %v1365_v0  ;;  %v1259_v10 = vld [vmem:[%s1360_s15 + $0x50] sm:$0xff]   ;;  %v1260_v11 = vld [vmem:[%s1360_s15 + $0x58] sm:$0xff]  }
  0x13   : > { %v541_v22 = vadd.f32 %v1374_v9, %v409_v14  ;;  %v542_v23 = vadd.f32 %v1374_v9, %v410_v15  ;;  %v543_v24 = vadd.f32 %v1374_v9, %v411_v16  ;;  %v544_v25 = vadd.f32 %v1374_v9, %v412_v17 }
  0x14   : > { %v545_v26 = vadd.f32 %v1374_v9, %v413_v18  ;;  %v546_v27 = vadd.f32 %v1374_v9, %v414_v19  ;;  %v547_v28 = vadd.f32 %v1374_v9, %v415_v20  ;;  %v548_v29 = vadd.f32 %v1374_v9, %v416_v21 }
  0x15   : > { %v669_v32 = vmax.f32 %v541_v22, 0.0  ;;  %v670_v33 = vmax.f32 %v542_v23, 0.0  ;;  %v671_v34 = vmax.f32 %v543_v24, 0.0  ;;  %v672_v35 = vmax.f32 %v544_v25, 0.0 }
  0x16   : > { %v673_v38 = vmax.f32 %v545_v26, 0.0  ;;  %v674_v39 = vmax.f32 %v546_v27, 0.0  ;;  %v675_v40 = vmax.f32 %v547_v28, 0.0  ;;  %v676_v41 = vmax.f32 %v548_v29, 0.0 }
  0x17   : > { %797 = vst [vmem:[%s1392_s23] sm:$0xff] %v669_v32  ;;  %798 = vst [vmem:[%s1392_s23 + $0x8] sm:$0xff] %v670_v33  ;;  %v1012_v42 = vunpack.c.l.bf16 %v1253_v30  ;;  %v1013_v43 = vunpack.c.h.bf16 %v1253_v30  ;;  %v1016_v44 = vunpack.c.l.bf16 %v1254_v31  ;;  %v1017_v45 = vunpack.c.h.bf16 %v1254_v31 }
  0x18   : > { %799 = vst [vmem:[%s1392_s23 + $0x10] sm:$0xff] %v671_v34  ;;  %800 = vst [vmem:[%s1392_s23 + $0x18] sm:$0xff] %v672_v35  ;;  %v1020_v46 = vunpack.c.l.bf16 %v1255_v36  ;;  %v1021_v47 = vunpack.c.h.bf16 %v1255_v36  ;;  %v1024_v48 = vunpack.c.l.bf16 %v1256_v37  ;;  %v1025_v49 = vunpack.c.h.bf16 %v1256_v37 }
  0x19   : > { %801 = vst [vmem:[%s1392_s23 + $0x20] sm:$0xff] %v673_v38  ;;  %802 = vst [vmem:[%s1392_s23 + $0x28] sm:$0xff] %v674_v39  ;;  %v417_v50 = vmul.f32 %v1012_v42, %v1365_v0  ;;  %v418_v51 = vmul.f32 %v1013_v43, %v1365_v0  ;;  %v419_v52 = vmul.f32 %v1016_v44, %v1365_v0  ;;  %v1028_v16 = vunpack.c.l.bf16 %v1257_v3 }
  0x1a   : > { %803 = vst [vmem:[%s1392_s23 + $0x30] sm:$0xff] %v675_v40  ;;  %804 = vst [vmem:[%s1392_s23 + $0x38] sm:$0xff] %v676_v41  ;;  %v420_v53 = vmul.f32 %v1017_v45, %v1365_v0  ;;  %v421_v54 = vmul.f32 %v1020_v46, %v1365_v0  ;;  %v422_v55 = vmul.f32 %v1021_v47, %v1365_v0  ;;  %v1029_v17 = vunpack.c.h.bf16 %v1257_v3  ;;  %v1261_v40 = vld [vmem:[%s1360_s15 + $0x60] sm:$0xff]   ;;  %v1262_v41 = vld [vmem:[%s1360_s15 + $0x68] sm:$0xff]  }
  0x1b   : > { %v423_v56 = vmul.f32 %v1024_v48, %v1365_v0  ;;  %v424_v57 = vmul.f32 %v1025_v49, %v1365_v0  ;;  %v549_v58 = vadd.f32 %v1374_v9, %v417_v50  ;;  %v550_v59 = vadd.f32 %v1374_v9, %v418_v51  ;;  %v1263_v46 = vld [vmem:[%s1360_s15 + $0x70] sm:$0xff]   ;;  %v1264_v47 = vld [vmem:[%s1360_s15 + $0x78] sm:$0xff]  }
  0x1c   : > { %v551_v60 = vadd.f32 %v1374_v9, %v419_v52  ;;  %v552_v61 = vadd.f32 %v1374_v9, %v420_v53  ;;  %v553_v62 = vadd.f32 %v1374_v9, %v421_v54  ;;  %v554_v63 = vadd.f32 %v1374_v9, %v422_v55 }
  0x1d   : > { %v555_v1 = vadd.f32 %v1374_v9, %v423_v56  ;;  %v556_v2 = vadd.f32 %v1374_v9, %v424_v57  ;;  %v677_v5 = vmax.f32 %v549_v58, 0.0  ;;  %v678_v6 = vmax.f32 %v550_v59, 0.0 }
  0x1e   : > { %v679_v7 = vmax.f32 %v551_v60, 0.0  ;;  %v680_v8 = vmax.f32 %v552_v61, 0.0  ;;  %v681_v12 = vmax.f32 %v553_v62, 0.0  ;;  %v682_v13 = vmax.f32 %v554_v63, 0.0 }
  0x1f   : > { %v683_v14 = vmax.f32 %v555_v1, 0.0  ;;  %v684_v15 = vmax.f32 %v556_v2, 0.0  ;;  %805 = vst [vmem:[%s1392_s23 + $0x40] sm:$0xff] %v677_v5  ;;  %806 = vst [vmem:[%s1392_s23 + $0x48] sm:$0xff] %v678_v6  ;;  %v1032_v18 = vunpack.c.l.bf16 %v1258_v4  ;;  %v1033_v19 = vunpack.c.h.bf16 %v1258_v4 }
  0x20   : > { %807 = vst [vmem:[%s1392_s23 + $0x50] sm:$0xff] %v679_v7  ;;  %808 = vst [vmem:[%s1392_s23 + $0x58] sm:$0xff] %v680_v8  ;;  %v1036_v20 = vunpack.c.l.bf16 %v1259_v10  ;;  %v1037_v21 = vunpack.c.h.bf16 %v1259_v10  ;;  %v1040_v22 = vunpack.c.l.bf16 %v1260_v11  ;;  %v1041_v23 = vunpack.c.h.bf16 %v1260_v11 }
  0x21   : > { %809 = vst [vmem:[%s1392_s23 + $0x60] sm:$0xff] %v681_v12  ;;  %810 = vst [vmem:[%s1392_s23 + $0x68] sm:$0xff] %v682_v13  ;;  %v425_v24 = vmul.f32 %v1028_v16, %v1365_v0  ;;  %v426_v25 = vmul.f32 %v1029_v17, %v1365_v0  ;;  %v427_v26 = vmul.f32 %v1032_v18, %v1365_v0  ;;  %v1044_v52 = vunpack.c.l.bf16 %v1261_v40 }
  0x22   : > { %811 = vst [vmem:[%s1392_s23 + $0x70] sm:$0xff] %v683_v14  ;;  %812 = vst [vmem:[%s1392_s23 + $0x78] sm:$0xff] %v684_v15  ;;  %v428_v27 = vmul.f32 %v1033_v19, %v1365_v0  ;;  %v429_v28 = vmul.f32 %v1036_v20, %v1365_v0  ;;  %v430_v29 = vmul.f32 %v1037_v21, %v1365_v0  ;;  %v1045_v53 = vunpack.c.h.bf16 %v1261_v40  ;;  %v1265_v14 = vld [vmem:[%s1360_s15 + $0x80] sm:$0xff]   ;;  %v1266_v15 = vld [vmem:[%s1360_s15 + $0x88] sm:$0xff]  }
  0x23   : > { %v431_v30 = vmul.f32 %v1040_v22, %v1365_v0  ;;  %v432_v31 = vmul.f32 %v1041_v23, %v1365_v0  ;;  %v557_v32 = vadd.f32 %v1374_v9, %v425_v24  ;;  %v558_v33 = vadd.f32 %v1374_v9, %v426_v25  ;;  %v1267_v20 = vld [vmem:[%s1360_s15 + $0x90] sm:$0xff]   ;;  %v1268_v21 = vld [vmem:[%s1360_s15 + $0x98] sm:$0xff]  }
  0x24   : > { %v559_v34 = vadd.f32 %v1374_v9, %v427_v26  ;;  %v560_v35 = vadd.f32 %v1374_v9, %v428_v27  ;;  %v561_v36 = vadd.f32 %v1374_v9, %v429_v28  ;;  %v562_v37 = vadd.f32 %v1374_v9, %v430_v29 }
  0x25   : > { %v563_v38 = vadd.f32 %v1374_v9, %v431_v30  ;;  %v564_v39 = vadd.f32 %v1374_v9, %v432_v31  ;;  %v685_v42 = vmax.f32 %v557_v32, 0.0  ;;  %v686_v43 = vmax.f32 %v558_v33, 0.0 }
  0x26   : > { %v687_v44 = vmax.f32 %v559_v34, 0.0  ;;  %v688_v45 = vmax.f32 %v560_v35, 0.0  ;;  %v689_v48 = vmax.f32 %v561_v36, 0.0  ;;  %v690_v49 = vmax.f32 %v562_v37, 0.0 }
  0x27   : > { %v691_v50 = vmax.f32 %v563_v38, 0.0  ;;  %v692_v51 = vmax.f32 %v564_v39, 0.0  ;;  %813 = vst [vmem:[%s1392_s23 + $0x80] sm:$0xff] %v685_v42  ;;  %814 = vst [vmem:[%s1392_s23 + $0x88] sm:$0xff] %v686_v43  ;;  %v1048_v54 = vunpack.c.l.bf16 %v1262_v41  ;;  %v1049_v55 = vunpack.c.h.bf16 %v1262_v41 }
  0x28   : > { %815 = vst [vmem:[%s1392_s23 + $0x90] sm:$0xff] %v687_v44  ;;  %816 = vst [vmem:[%s1392_s23 + $0x98] sm:$0xff] %v688_v45  ;;  %v1052_v56 = vunpack.c.l.bf16 %v1263_v46  ;;  %v1053_v57 = vunpack.c.h.bf16 %v1263_v46  ;;  %v1056_v58 = vunpack.c.l.bf16 %v1264_v47  ;;  %v1057_v59 = vunpack.c.h.bf16 %v1264_v47 }
  0x29   : > { %817 = vst [vmem:[%s1392_s23 + $0xa0] sm:$0xff] %v689_v48  ;;  %818 = vst [vmem:[%s1392_s23 + $0xa8] sm:$0xff] %v690_v49  ;;  %v433_v60 = vmul.f32 %v1044_v52, %v1365_v0  ;;  %v434_v61 = vmul.f32 %v1045_v53, %v1365_v0  ;;  %v435_v62 = vmul.f32 %v1048_v54, %v1365_v0  ;;  %v1060_v26 = vunpack.c.l.bf16 %v1265_v14 }
  0x2a   : > { %819 = vst [vmem:[%s1392_s23 + $0xb0] sm:$0xff] %v691_v50  ;;  %820 = vst [vmem:[%s1392_s23 + $0xb8] sm:$0xff] %v692_v51  ;;  %v436_v63 = vmul.f32 %v1049_v55, %v1365_v0  ;;  %v437_v1 = vmul.f32 %v1052_v56, %v1365_v0  ;;  %v438_v2 = vmul.f32 %v1053_v57, %v1365_v0  ;;  %v1061_v27 = vunpack.c.h.bf16 %v1265_v14  ;;  %v1269_v50 = vld [vmem:[%s1360_s15 + $0xa0] sm:$0xff]   ;;  %v1270_v51 = vld [vmem:[%s1360_s15 + $0xa8] sm:$0xff]  }
  0x2b   : > { %v439_v3 = vmul.f32 %v1056_v58, %v1365_v0  ;;  %v440_v4 = vmul.f32 %v1057_v59, %v1365_v0  ;;  %v565_v5 = vadd.f32 %v1374_v9, %v433_v60  ;;  %v566_v6 = vadd.f32 %v1374_v9, %v434_v61  ;;  %v1271_v56 = vld [vmem:[%s1360_s15 + $0xb0] sm:$0xff]   ;;  %v1272_v57 = vld [vmem:[%s1360_s15 + $0xb8] sm:$0xff]  }
  0x2c   : > { %v567_v7 = vadd.f32 %v1374_v9, %v435_v62  ;;  %v568_v8 = vadd.f32 %v1374_v9, %v436_v63  ;;  %v569_v10 = vadd.f32 %v1374_v9, %v437_v1  ;;  %v570_v11 = vadd.f32 %v1374_v9, %v438_v2 }
  0x2d   : > { %v571_v12 = vadd.f32 %v1374_v9, %v439_v3  ;;  %v572_v13 = vadd.f32 %v1374_v9, %v440_v4  ;;  %v693_v16 = vmax.f32 %v565_v5, 0.0  ;;  %v694_v17 = vmax.f32 %v566_v6, 0.0 }
  0x2e   : > { %v695_v18 = vmax.f32 %v567_v7, 0.0  ;;  %v696_v19 = vmax.f32 %v568_v8, 0.0  ;;  %v697_v22 = vmax.f32 %v569_v10, 0.0  ;;  %v698_v23 = vmax.f32 %v570_v11, 0.0 }
  0x2f   : > { %v699_v24 = vmax.f32 %v571_v12, 0.0  ;;  %v700_v25 = vmax.f32 %v572_v13, 0.0  ;;  %821 = vst [vmem:[%s1392_s23 + $0xc0] sm:$0xff] %v693_v16  ;;  %822 = vst [vmem:[%s1392_s23 + $0xc8] sm:$0xff] %v694_v17  ;;  %v1064_v28 = vunpack.c.l.bf16 %v1266_v15  ;;  %v1065_v29 = vunpack.c.h.bf16 %v1266_v15 }
  0x30   : > { %823 = vst [vmem:[%s1392_s23 + $0xd0] sm:$0xff] %v695_v18  ;;  %824 = vst [vmem:[%s1392_s23 + $0xd8] sm:$0xff] %v696_v19  ;;  %v1068_v30 = vunpack.c.l.bf16 %v1267_v20  ;;  %v1069_v31 = vunpack.c.h.bf16 %v1267_v20  ;;  %v1072_v32 = vunpack.c.l.bf16 %v1268_v21  ;;  %v1073_v33 = vunpack.c.h.bf16 %v1268_v21 }
  0x31   : > { %825 = vst [vmem:[%s1392_s23 + $0xe0] sm:$0xff] %v697_v22  ;;  %826 = vst [vmem:[%s1392_s23 + $0xe8] sm:$0xff] %v698_v23  ;;  %v441_v34 = vmul.f32 %v1060_v26, %v1365_v0  ;;  %v442_v35 = vmul.f32 %v1061_v27, %v1365_v0  ;;  %v443_v36 = vmul.f32 %v1064_v28, %v1365_v0  ;;  %v1076_v62 = vunpack.c.l.bf16 %v1269_v50 }
  0x32   : > { %827 = vst [vmem:[%s1392_s23 + $0xf0] sm:$0xff] %v699_v24  ;;  %828 = vst [vmem:[%s1392_s23 + $0xf8] sm:$0xff] %v700_v25  ;;  %v444_v37 = vmul.f32 %v1065_v29, %v1365_v0  ;;  %v445_v38 = vmul.f32 %v1068_v30, %v1365_v0  ;;  %v446_v39 = vmul.f32 %v1069_v31, %v1365_v0  ;;  %v1077_v63 = vunpack.c.h.bf16 %v1269_v50  ;;  %v1273_v24 = vld [vmem:[%s1360_s15 + $0xc0] sm:$0xff]   ;;  %v1274_v25 = vld [vmem:[%s1360_s15 + $0xc8] sm:$0xff]  }
  0x33   : > { %v447_v40 = vmul.f32 %v1072_v32, %v1365_v0  ;;  %v448_v41 = vmul.f32 %v1073_v33, %v1365_v0  ;;  %v573_v42 = vadd.f32 %v1374_v9, %v441_v34  ;;  %v574_v43 = vadd.f32 %v1374_v9, %v442_v35  ;;  %v1275_v30 = vld [vmem:[%s1360_s15 + $0xd0] sm:$0xff]   ;;  %v1276_v31 = vld [vmem:[%s1360_s15 + $0xd8] sm:$0xff]  }
  0x34   : > { %v575_v44 = vadd.f32 %v1374_v9, %v443_v36  ;;  %v576_v45 = vadd.f32 %v1374_v9, %v444_v37  ;;  %v577_v46 = vadd.f32 %v1374_v9, %v445_v38  ;;  %v578_v47 = vadd.f32 %v1374_v9, %v446_v39 }
  0x35   : > { %v579_v48 = vadd.f32 %v1374_v9, %v447_v40  ;;  %v580_v49 = vadd.f32 %v1374_v9, %v448_v41  ;;  %v701_v52 = vmax.f32 %v573_v42, 0.0  ;;  %v702_v53 = vmax.f32 %v574_v43, 0.0 }
  0x36   : > { %v703_v54 = vmax.f32 %v575_v44, 0.0  ;;  %v704_v55 = vmax.f32 %v576_v45, 0.0  ;;  %v705_v58 = vmax.f32 %v577_v46, 0.0  ;;  %v706_v59 = vmax.f32 %v578_v47, 0.0 }
  0x37   : > { %v707_v60 = vmax.f32 %v579_v48, 0.0  ;;  %v708_v61 = vmax.f32 %v580_v49, 0.0  ;;  %829 = vst [vmem:[%s1392_s23 + $0x100] sm:$0xff] %v701_v52  ;;  %830 = vst [vmem:[%s1392_s23 + $0x108] sm:$0xff] %v702_v53  ;;  %v1080_v1 = vunpack.c.l.bf16 %v1270_v51  ;;  %v1081_v2 = vunpack.c.h.bf16 %v1270_v51 }
  0x38   : > { %831 = vst [vmem:[%s1392_s23 + $0x110] sm:$0xff] %v703_v54  ;;  %832 = vst [vmem:[%s1392_s23 + $0x118] sm:$0xff] %v704_v55  ;;  %v1084_v3 = vunpack.c.l.bf16 %v1271_v56  ;;  %v1085_v4 = vunpack.c.h.bf16 %v1271_v56  ;;  %v1088_v5 = vunpack.c.l.bf16 %v1272_v57  ;;  %v1089_v6 = vunpack.c.h.bf16 %v1272_v57 }
  0x39   : > { %833 = vst [vmem:[%s1392_s23 + $0x120] sm:$0xff] %v705_v58  ;;  %834 = vst [vmem:[%s1392_s23 + $0x128] sm:$0xff] %v706_v59  ;;  %v449_v7 = vmul.f32 %v1076_v62, %v1365_v0  ;;  %v450_v8 = vmul.f32 %v1077_v63, %v1365_v0  ;;  %v451_v10 = vmul.f32 %v1080_v1, %v1365_v0  ;;  %v1092_v36 = vunpack.c.l.bf16 %v1273_v24 }
  0x3a   : > { %835 = vst [vmem:[%s1392_s23 + $0x130] sm:$0xff] %v707_v60  ;;  %836 = vst [vmem:[%s1392_s23 + $0x138] sm:$0xff] %v708_v61  ;;  %v452_v11 = vmul.f32 %v1081_v2, %v1365_v0  ;;  %v453_v12 = vmul.f32 %v1084_v3, %v1365_v0  ;;  %v454_v13 = vmul.f32 %v1085_v4, %v1365_v0  ;;  %v1093_v37 = vunpack.c.h.bf16 %v1273_v24  ;;  %v1277_v60 = vld [vmem:[%s1360_s15 + $0xe0] sm:$0xff]   ;;  %v1278_v61 = vld [vmem:[%s1360_s15 + $0xe8] sm:$0xff]  }
  0x3b   : > { %v455_v14 = vmul.f32 %v1088_v5, %v1365_v0  ;;  %v456_v15 = vmul.f32 %v1089_v6, %v1365_v0  ;;  %v581_v16 = vadd.f32 %v1374_v9, %v449_v7  ;;  %v582_v17 = vadd.f32 %v1374_v9, %v450_v8  ;;  %v1279_v3 = vld [vmem:[%s1360_s15 + $0xf0] sm:$0xff]   ;;  %v1280_v4 = vld [vmem:[%s1360_s15 + $0xf8] sm:$0xff]  }
  0x3c   : > { %v583_v18 = vadd.f32 %v1374_v9, %v451_v10  ;;  %v584_v19 = vadd.f32 %v1374_v9, %v452_v11  ;;  %v585_v20 = vadd.f32 %v1374_v9, %v453_v12  ;;  %v586_v21 = vadd.f32 %v1374_v9, %v454_v13 }
  0x3d   : > { %v587_v22 = vadd.f32 %v1374_v9, %v455_v14  ;;  %v588_v23 = vadd.f32 %v1374_v9, %v456_v15  ;;  %v709_v26 = vmax.f32 %v581_v16, 0.0  ;;  %v710_v27 = vmax.f32 %v582_v17, 0.0 }
  0x3e   : > { %v711_v28 = vmax.f32 %v583_v18, 0.0  ;;  %v712_v29 = vmax.f32 %v584_v19, 0.0  ;;  %v713_v32 = vmax.f32 %v585_v20, 0.0  ;;  %v714_v33 = vmax.f32 %v586_v21, 0.0 }
  0x3f   : > { %v715_v34 = vmax.f32 %v587_v22, 0.0  ;;  %v716_v35 = vmax.f32 %v588_v23, 0.0  ;;  %837 = vst [vmem:[%s1392_s23 + $0x140] sm:$0xff] %v709_v26  ;;  %838 = vst [vmem:[%s1392_s23 + $0x148] sm:$0xff] %v710_v27  ;;  %v1096_v38 = vunpack.c.l.bf16 %v1274_v25  ;;  %v1097_v39 = vunpack.c.h.bf16 %v1274_v25 }
  0x40   : > { %839 = vst [vmem:[%s1392_s23 + $0x150] sm:$0xff] %v711_v28  ;;  %840 = vst [vmem:[%s1392_s23 + $0x158] sm:$0xff] %v712_v29  ;;  %v1100_v40 = vunpack.c.l.bf16 %v1275_v30  ;;  %v1101_v41 = vunpack.c.h.bf16 %v1275_v30  ;;  %v1104_v42 = vunpack.c.l.bf16 %v1276_v31  ;;  %v1105_v43 = vunpack.c.h.bf16 %v1276_v31 }
  0x41   : > { %841 = vst [vmem:[%s1392_s23 + $0x160] sm:$0xff] %v713_v32  ;;  %842 = vst [vmem:[%s1392_s23 + $0x168] sm:$0xff] %v714_v33  ;;  %v457_v44 = vmul.f32 %v1092_v36, %v1365_v0  ;;  %v458_v45 = vmul.f32 %v1093_v37, %v1365_v0  ;;  %v459_v46 = vmul.f32 %v1096_v38, %v1365_v0  ;;  %v1108_v10 = vunpack.c.l.bf16 %v1277_v60 }
  0x42   : > { %843 = vst [vmem:[%s1392_s23 + $0x170] sm:$0xff] %v715_v34  ;;  %844 = vst [vmem:[%s1392_s23 + $0x178] sm:$0xff] %v716_v35  ;;  %v460_v47 = vmul.f32 %v1097_v39, %v1365_v0  ;;  %v461_v48 = vmul.f32 %v1100_v40, %v1365_v0  ;;  %v462_v49 = vmul.f32 %v1101_v41, %v1365_v0  ;;  %v1109_v11 = vunpack.c.h.bf16 %v1277_v60  ;;  %v1281_v34 = vld [vmem:[%s1360_s15 + $0x100] sm:$0xff]   ;;  %v1282_v35 = vld [vmem:[%s1360_s15 + $0x108] sm:$0xff]  }
  0x43   : > { %v463_v50 = vmul.f32 %v1104_v42, %v1365_v0  ;;  %v464_v51 = vmul.f32 %v1105_v43, %v1365_v0  ;;  %v589_v52 = vadd.f32 %v1374_v9, %v457_v44  ;;  %v590_v53 = vadd.f32 %v1374_v9, %v458_v45  ;;  %v1283_v40 = vld [vmem:[%s1360_s15 + $0x110] sm:$0xff]   ;;  %v1284_v41 = vld [vmem:[%s1360_s15 + $0x118] sm:$0xff]  }
  0x44   : > { %v591_v54 = vadd.f32 %v1374_v9, %v459_v46  ;;  %v592_v55 = vadd.f32 %v1374_v9, %v460_v47  ;;  %v593_v56 = vadd.f32 %v1374_v9, %v461_v48  ;;  %v594_v57 = vadd.f32 %v1374_v9, %v462_v49 }
  0x45   : > { %v595_v58 = vadd.f32 %v1374_v9, %v463_v50  ;;  %v596_v59 = vadd.f32 %v1374_v9, %v464_v51  ;;  %v717_v62 = vmax.f32 %v589_v52, 0.0  ;;  %v718_v63 = vmax.f32 %v590_v53, 0.0 }
  0x46   : > { %v719_v1 = vmax.f32 %v591_v54, 0.0  ;;  %v720_v2 = vmax.f32 %v592_v55, 0.0  ;;  %v721_v5 = vmax.f32 %v593_v56, 0.0  ;;  %v722_v6 = vmax.f32 %v594_v57, 0.0 }
  0x47   : > { %v723_v7 = vmax.f32 %v595_v58, 0.0  ;;  %v724_v8 = vmax.f32 %v596_v59, 0.0  ;;  %845 = vst [vmem:[%s1392_s23 + $0x180] sm:$0xff] %v717_v62  ;;  %846 = vst [vmem:[%s1392_s23 + $0x188] sm:$0xff] %v718_v63  ;;  %v1112_v12 = vunpack.c.l.bf16 %v1278_v61  ;;  %v1113_v13 = vunpack.c.h.bf16 %v1278_v61 }
  0x48   : > { %847 = vst [vmem:[%s1392_s23 + $0x190] sm:$0xff] %v719_v1  ;;  %848 = vst [vmem:[%s1392_s23 + $0x198] sm:$0xff] %v720_v2  ;;  %v1116_v14 = vunpack.c.l.bf16 %v1279_v3  ;;  %v1117_v15 = vunpack.c.h.bf16 %v1279_v3  ;;  %v1120_v16 = vunpack.c.l.bf16 %v1280_v4  ;;  %v1121_v17 = vunpack.c.h.bf16 %v1280_v4 }
  0x49   : > { %849 = vst [vmem:[%s1392_s23 + $0x1a0] sm:$0xff] %v721_v5  ;;  %850 = vst [vmem:[%s1392_s23 + $0x1a8] sm:$0xff] %v722_v6  ;;  %v465_v18 = vmul.f32 %v1108_v10, %v1365_v0  ;;  %v466_v19 = vmul.f32 %v1109_v11, %v1365_v0  ;;  %v467_v20 = vmul.f32 %v1112_v12, %v1365_v0  ;;  %v1124_v46 = vunpack.c.l.bf16 %v1281_v34 }
  0x4a   : > { %851 = vst [vmem:[%s1392_s23 + $0x1b0] sm:$0xff] %v723_v7  ;;  %852 = vst [vmem:[%s1392_s23 + $0x1b8] sm:$0xff] %v724_v8  ;;  %v468_v21 = vmul.f32 %v1113_v13, %v1365_v0  ;;  %v469_v22 = vmul.f32 %v1116_v14, %v1365_v0  ;;  %v470_v23 = vmul.f32 %v1117_v15, %v1365_v0  ;;  %v1125_v47 = vunpack.c.h.bf16 %v1281_v34  ;;  %v1285_v7 = vld [vmem:[%s1360_s15 + $0x120] sm:$0xff]   ;;  %v1286_v8 = vld [vmem:[%s1360_s15 + $0x128] sm:$0xff]  }
  0x4b   : > { %v471_v24 = vmul.f32 %v1120_v16, %v1365_v0  ;;  %v472_v25 = vmul.f32 %v1121_v17, %v1365_v0  ;;  %v597_v26 = vadd.f32 %v1374_v9, %v465_v18  ;;  %v598_v27 = vadd.f32 %v1374_v9, %v466_v19  ;;  %v1287_v14 = vld [vmem:[%s1360_s15 + $0x130] sm:$0xff]   ;;  %v1288_v15 = vld [vmem:[%s1360_s15 + $0x138] sm:$0xff]  }
  0x4c   : > { %v599_v28 = vadd.f32 %v1374_v9, %v467_v20  ;;  %v600_v29 = vadd.f32 %v1374_v9, %v468_v21  ;;  %v601_v30 = vadd.f32 %v1374_v9, %v469_v22  ;;  %v602_v31 = vadd.f32 %v1374_v9, %v470_v23 }
  0x4d   : > { %v603_v32 = vadd.f32 %v1374_v9, %v471_v24  ;;  %v604_v33 = vadd.f32 %v1374_v9, %v472_v25  ;;  %v725_v36 = vmax.f32 %v597_v26, 0.0  ;;  %v726_v37 = vmax.f32 %v598_v27, 0.0 }
  0x4e   : > { %v727_v38 = vmax.f32 %v599_v28, 0.0  ;;  %v728_v39 = vmax.f32 %v600_v29, 0.0  ;;  %v729_v42 = vmax.f32 %v601_v30, 0.0  ;;  %v730_v43 = vmax.f32 %v602_v31, 0.0 }
  0x4f   : > { %v731_v44 = vmax.f32 %v603_v32, 0.0  ;;  %v732_v45 = vmax.f32 %v604_v33, 0.0  ;;  %853 = vst [vmem:[%s1392_s23 + $0x1c0] sm:$0xff] %v725_v36  ;;  %854 = vst [vmem:[%s1392_s23 + $0x1c8] sm:$0xff] %v726_v37  ;;  %v1128_v48 = vunpack.c.l.bf16 %v1282_v35  ;;  %v1129_v49 = vunpack.c.h.bf16 %v1282_v35 }
  0x50   : > { %855 = vst [vmem:[%s1392_s23 + $0x1d0] sm:$0xff] %v727_v38  ;;  %856 = vst [vmem:[%s1392_s23 + $0x1d8] sm:$0xff] %v728_v39  ;;  %v1132_v50 = vunpack.c.l.bf16 %v1283_v40  ;;  %v1133_v51 = vunpack.c.h.bf16 %v1283_v40  ;;  %v1136_v52 = vunpack.c.l.bf16 %v1284_v41  ;;  %v1137_v53 = vunpack.c.h.bf16 %v1284_v41 }
  0x51   : > { %857 = vst [vmem:[%s1392_s23 + $0x1e0] sm:$0xff] %v729_v42  ;;  %858 = vst [vmem:[%s1392_s23 + $0x1e8] sm:$0xff] %v730_v43  ;;  %v473_v54 = vmul.f32 %v1124_v46, %v1365_v0  ;;  %v474_v55 = vmul.f32 %v1125_v47, %v1365_v0  ;;  %v475_v56 = vmul.f32 %v1128_v48, %v1365_v0  ;;  %v1140_v20 = vunpack.c.l.bf16 %v1285_v7 }
  0x52   : > { %859 = vst [vmem:[%s1392_s23 + $0x1f0] sm:$0xff] %v731_v44  ;;  %860 = vst [vmem:[%s1392_s23 + $0x1f8] sm:$0xff] %v732_v45  ;;  %v476_v57 = vmul.f32 %v1129_v49, %v1365_v0  ;;  %v477_v58 = vmul.f32 %v1132_v50, %v1365_v0  ;;  %v478_v59 = vmul.f32 %v1133_v51, %v1365_v0  ;;  %v1141_v21 = vunpack.c.h.bf16 %v1285_v7  ;;  %v1289_v44 = vld [vmem:[%s1360_s15 + $0x140] sm:$0xff]   ;;  %v1290_v45 = vld [vmem:[%s1360_s15 + $0x148] sm:$0xff]  }
  0x53   : > { %v479_v60 = vmul.f32 %v1136_v52, %v1365_v0  ;;  %v480_v61 = vmul.f32 %v1137_v53, %v1365_v0  ;;  %v605_v62 = vadd.f32 %v1374_v9, %v473_v54  ;;  %v606_v63 = vadd.f32 %v1374_v9, %v474_v55  ;;  %v1291_v50 = vld [vmem:[%s1360_s15 + $0x150] sm:$0xff]   ;;  %v1292_v51 = vld [vmem:[%s1360_s15 + $0x158] sm:$0xff]  }
  0x54   : > { %v607_v1 = vadd.f32 %v1374_v9, %v475_v56  ;;  %v608_v2 = vadd.f32 %v1374_v9, %v476_v57  ;;  %v609_v3 = vadd.f32 %v1374_v9, %v477_v58  ;;  %v610_v4 = vadd.f32 %v1374_v9, %v478_v59 }
  0x55   : > { %v611_v5 = vadd.f32 %v1374_v9, %v479_v60  ;;  %v612_v6 = vadd.f32 %v1374_v9, %v480_v61  ;;  %v733_v10 = vmax.f32 %v605_v62, 0.0  ;;  %v734_v11 = vmax.f32 %v606_v63, 0.0 }
  0x56   : > { %v735_v12 = vmax.f32 %v607_v1, 0.0  ;;  %v736_v13 = vmax.f32 %v608_v2, 0.0  ;;  %v737_v16 = vmax.f32 %v609_v3, 0.0  ;;  %v738_v17 = vmax.f32 %v610_v4, 0.0 }
  0x57   : > { %v739_v18 = vmax.f32 %v611_v5, 0.0  ;;  %v740_v19 = vmax.f32 %v612_v6, 0.0  ;;  %861 = vst [vmem:[%s1392_s23 + $0x200] sm:$0xff] %v733_v10  ;;  %862 = vst [vmem:[%s1392_s23 + $0x208] sm:$0xff] %v734_v11  ;;  %v1144_v22 = vunpack.c.l.bf16 %v1286_v8  ;;  %v1145_v23 = vunpack.c.h.bf16 %v1286_v8 }
  0x58   : > { %863 = vst [vmem:[%s1392_s23 + $0x210] sm:$0xff] %v735_v12  ;;  %864 = vst [vmem:[%s1392_s23 + $0x218] sm:$0xff] %v736_v13  ;;  %v1148_v24 = vunpack.c.l.bf16 %v1287_v14  ;;  %v1149_v25 = vunpack.c.h.bf16 %v1287_v14  ;;  %v1152_v26 = vunpack.c.l.bf16 %v1288_v15  ;;  %v1153_v27 = vunpack.c.h.bf16 %v1288_v15 }
  0x59   : > { %865 = vst [vmem:[%s1392_s23 + $0x220] sm:$0xff] %v737_v16  ;;  %866 = vst [vmem:[%s1392_s23 + $0x228] sm:$0xff] %v738_v17  ;;  %v481_v28 = vmul.f32 %v1140_v20, %v1365_v0  ;;  %v482_v29 = vmul.f32 %v1141_v21, %v1365_v0  ;;  %v483_v30 = vmul.f32 %v1144_v22, %v1365_v0  ;;  %v1156_v56 = vunpack.c.l.bf16 %v1289_v44 }
  0x5a   : > { %867 = vst [vmem:[%s1392_s23 + $0x230] sm:$0xff] %v739_v18  ;;  %868 = vst [vmem:[%s1392_s23 + $0x238] sm:$0xff] %v740_v19  ;;  %v484_v31 = vmul.f32 %v1145_v23, %v1365_v0  ;;  %v485_v32 = vmul.f32 %v1148_v24, %v1365_v0  ;;  %v486_v33 = vmul.f32 %v1149_v25, %v1365_v0  ;;  %v1157_v57 = vunpack.c.h.bf16 %v1289_v44  ;;  %v1293_v18 = vld [vmem:[%s1360_s15 + $0x160] sm:$0xff]   ;;  %v1294_v19 = vld [vmem:[%s1360_s15 + $0x168] sm:$0xff]  }
  0x5b   : > { %v487_v34 = vmul.f32 %v1152_v26, %v1365_v0  ;;  %v488_v35 = vmul.f32 %v1153_v27, %v1365_v0  ;;  %v613_v36 = vadd.f32 %v1374_v9, %v481_v28  ;;  %v614_v37 = vadd.f32 %v1374_v9, %v482_v29  ;;  %v1295_v24 = vld [vmem:[%s1360_s15 + $0x170] sm:$0xff]   ;;  %v1296_v25 = vld [vmem:[%s1360_s15 + $0x178] sm:$0xff]  }
  0x5c   : > { %v615_v38 = vadd.f32 %v1374_v9, %v483_v30  ;;  %v616_v39 = vadd.f32 %v1374_v9, %v484_v31  ;;  %v617_v40 = vadd.f32 %v1374_v9, %v485_v32  ;;  %v618_v41 = vadd.f32 %v1374_v9, %v486_v33 }
  0x5d   : > { %v619_v42 = vadd.f32 %v1374_v9, %v487_v34  ;;  %v620_v43 = vadd.f32 %v1374_v9, %v488_v35  ;;  %v741_v46 = vmax.f32 %v613_v36, 0.0  ;;  %v742_v47 = vmax.f32 %v614_v37, 0.0 }
  0x5e   : > { %v743_v48 = vmax.f32 %v615_v38, 0.0  ;;  %v744_v49 = vmax.f32 %v616_v39, 0.0  ;;  %v745_v52 = vmax.f32 %v617_v40, 0.0  ;;  %v746_v53 = vmax.f32 %v618_v41, 0.0 }
  0x5f   : > { %v747_v54 = vmax.f32 %v619_v42, 0.0  ;;  %v748_v55 = vmax.f32 %v620_v43, 0.0  ;;  %869 = vst [vmem:[%s1392_s23 + $0x240] sm:$0xff] %v741_v46  ;;  %870 = vst [vmem:[%s1392_s23 + $0x248] sm:$0xff] %v742_v47  ;;  %v1160_v58 = vunpack.c.l.bf16 %v1290_v45  ;;  %v1161_v59 = vunpack.c.h.bf16 %v1290_v45 }
  0x60   : > { %871 = vst [vmem:[%s1392_s23 + $0x250] sm:$0xff] %v743_v48  ;;  %872 = vst [vmem:[%s1392_s23 + $0x258] sm:$0xff] %v744_v49  ;;  %v1164_v60 = vunpack.c.l.bf16 %v1291_v50  ;;  %v1165_v61 = vunpack.c.h.bf16 %v1291_v50  ;;  %v1168_v62 = vunpack.c.l.bf16 %v1292_v51  ;;  %v1169_v63 = vunpack.c.h.bf16 %v1292_v51 }
  0x61   : > { %873 = vst [vmem:[%s1392_s23 + $0x260] sm:$0xff] %v745_v52  ;;  %874 = vst [vmem:[%s1392_s23 + $0x268] sm:$0xff] %v746_v53  ;;  %v489_v1 = vmul.f32 %v1156_v56, %v1365_v0  ;;  %v490_v2 = vmul.f32 %v1157_v57, %v1365_v0  ;;  %v491_v3 = vmul.f32 %v1160_v58, %v1365_v0  ;;  %v1172_v30 = vunpack.c.l.bf16 %v1293_v18  ;;  %v1297_v53 = vld [vmem:[%s1360_s15 + $0x180] sm:$0xff]  }
  0x62   : > { %875 = vst [vmem:[%s1392_s23 + $0x270] sm:$0xff] %v747_v54  ;;  %876 = vst [vmem:[%s1392_s23 + $0x278] sm:$0xff] %v748_v55  ;;  %v492_v4 = vmul.f32 %v1161_v59, %v1365_v0  ;;  %v493_v5 = vmul.f32 %v1164_v60, %v1365_v0  ;;  %v494_v6 = vmul.f32 %v1165_v61, %v1365_v0  ;;  %v1173_v31 = vunpack.c.h.bf16 %v1293_v18  ;;  %v1298_v54 = vld [vmem:[%s1360_s15 + $0x188] sm:$0xff]   ;;  %v1299_v59 = vld [vmem:[%s1360_s15 + $0x190] sm:$0xff]  }
  0x63   : > { %v495_v7 = vmul.f32 %v1168_v62, %v1365_v0  ;;  %v496_v8 = vmul.f32 %v1169_v63, %v1365_v0  ;;  %v621_v10 = vadd.f32 %v1374_v9, %v489_v1  ;;  %v622_v11 = vadd.f32 %v1374_v9, %v490_v2  ;;  %v1300_v60 = vld [vmem:[%s1360_s15 + $0x198] sm:$0xff]  }
  0x64   : > { %v623_v12 = vadd.f32 %v1374_v9, %v491_v3  ;;  %v624_v13 = vadd.f32 %v1374_v9, %v492_v4  ;;  %v625_v14 = vadd.f32 %v1374_v9, %v493_v5  ;;  %v626_v15 = vadd.f32 %v1374_v9, %v494_v6 }
  0x65   : > { %v627_v16 = vadd.f32 %v1374_v9, %v495_v7  ;;  %v628_v17 = vadd.f32 %v1374_v9, %v496_v8  ;;  %v749_v20 = vmax.f32 %v621_v10, 0.0  ;;  %v750_v21 = vmax.f32 %v622_v11, 0.0  ;;  %v1721_v10 = vld [vmem:[%s1840_s1] ss:$0 sm:$0xff] }
  0x66   : > { %v751_v22 = vmax.f32 %v623_v12, 0.0  ;;  %v752_v23 = vmax.f32 %v624_v13, 0.0  ;;  %v753_v26 = vmax.f32 %v625_v14, 0.0  ;;  %v754_v27 = vmax.f32 %v626_v15, 0.0 }
  0x67   : > { %v755_v28 = vmax.f32 %v627_v16, 0.0  ;;  %v756_v29 = vmax.f32 %v628_v17, 0.0  ;;  %877 = vst [vmem:[%s1392_s23 + $0x280] sm:$0xff] %v749_v20  ;;  %878 = vst [vmem:[%s1392_s23 + $0x288] sm:$0xff] %v750_v21  ;;  %v1176_v32 = vunpack.c.l.bf16 %v1294_v19  ;;  %v1177_v33 = vunpack.c.h.bf16 %v1294_v19  ;;  %v1734_v19 = vld [vmem:[%s1840_s1 + $0x1] ss:$0 sm:$0xff] }
  0x68   : > { %879 = vst [vmem:[%s1392_s23 + $0x290] sm:$0xff] %v751_v22  ;;  %880 = vst [vmem:[%s1392_s23 + $0x298] sm:$0xff] %v752_v23  ;;  %v1180_v34 = vunpack.c.l.bf16 %v1295_v24  ;;  %v1181_v35 = vunpack.c.h.bf16 %v1295_v24  ;;  %v1184_v36 = vunpack.c.l.bf16 %v1296_v25  ;;  %v1185_v37 = vunpack.c.h.bf16 %v1296_v25 }
  0x69   : > { %881 = vst [vmem:[%s1392_s23 + $0x2a0] sm:$0xff] %v753_v26  ;;  %882 = vst [vmem:[%s1392_s23 + $0x2a8] sm:$0xff] %v754_v27  ;;  %v497_v38 = vmul.f32 %v1172_v30, %v1365_v0  ;;  %v498_v39 = vmul.f32 %v1173_v31, %v1365_v0  ;;  %v499_v40 = vmul.f32 %v1176_v32, %v1365_v0  ;;  %v1189_v2 = vunpack.c.h.bf16 %v1297_v53 }
  0x6a   : > { %883 = vst [vmem:[%s1392_s23 + $0x2b0] sm:$0xff] %v755_v28  ;;  %884 = vst [vmem:[%s1392_s23 + $0x2b8] sm:$0xff] %v756_v29  ;;  %v500_v41 = vmul.f32 %v1177_v33, %v1365_v0  ;;  %v501_v42 = vmul.f32 %v1180_v34, %v1365_v0  ;;  %v502_v43 = vmul.f32 %v1181_v35, %v1365_v0  ;;  %v1192_v3 = vunpack.c.l.bf16 %v1298_v54  ;;  %v1301_v28 = vld [vmem:[%s1360_s15 + $0x1a0] sm:$0xff]   ;;  %v1302_v29 = vld [vmem:[%s1360_s15 + $0x1a8] sm:$0xff]  }
  0x6b   : > { %v503_v44 = vmul.f32 %v1184_v36, %v1365_v0  ;;  %v504_v45 = vmul.f32 %v1185_v37, %v1365_v0  ;;  %v629_v46 = vadd.f32 %v1374_v9, %v497_v38  ;;  %v630_v47 = vadd.f32 %v1374_v9, %v498_v39  ;;  %v1303_v34 = vld [vmem:[%s1360_s15 + $0x1b0] sm:$0xff]   ;;  %v1304_v35 = vld [vmem:[%s1360_s15 + $0x1b8] sm:$0xff]  }
  0x6c   : > { %v631_v48 = vadd.f32 %v1374_v9, %v499_v40  ;;  %v632_v49 = vadd.f32 %v1374_v9, %v500_v41  ;;  %v633_v50 = vadd.f32 %v1374_v9, %v501_v42  ;;  %v634_v51 = vadd.f32 %v1374_v9, %v502_v43 }
  0x6d   : > { %v635_v52 = vadd.f32 %v1374_v9, %v503_v44  ;;  %v636_v0 = vadd.f32 %v1374_v9, %v504_v45  ;;  %v757_v55 = vmax.f32 %v629_v46, 0.0  ;;  %v758_v56 = vmax.f32 %v630_v47, 0.0 }
  0x6e   : > { %v759_v57 = vmax.f32 %v631_v48, 0.0  ;;  %v760_v58 = vmax.f32 %v632_v49, 0.0  ;;  %v761_v61 = vmax.f32 %v633_v50, 0.0  ;;  %v762_v62 = vmax.f32 %v634_v51, 0.0 }
  0x6f   : > { %v763_v63 = vmax.f32 %v635_v52, 0.0  ;;  %v764_v1 = vmax.f32 %v636_v0, 0.0  ;;  %885 = vst [vmem:[%s1392_s23 + $0x2c0] sm:$0xff] %v757_v55  ;;  %886 = vst [vmem:[%s1392_s23 + $0x2c8] sm:$0xff] %v758_v56  ;;  %v1188_v9 = vunpack.c.l.bf16 %v1297_v53  ;;  %v1193_v4 = vunpack.c.h.bf16 %v1298_v54 }
  0x70   : > { %887 = vst [vmem:[%s1392_s23 + $0x2d0] sm:$0xff] %v759_v57  ;;  %888 = vst [vmem:[%s1392_s23 + $0x2d8] sm:$0xff] %v760_v58  ;;  %v1196_v5 = vunpack.c.l.bf16 %v1299_v59  ;;  %v1197_v6 = vunpack.c.h.bf16 %v1299_v59  ;;  %v1200_v7 = vunpack.c.l.bf16 %v1300_v60  ;;  %v1201_v8 = vunpack.c.h.bf16 %v1300_v60 }
  0x71   : > { %889 = vst [vmem:[%s1392_s23 + $0x2e0] sm:$0xff] %v761_v61  ;;  %890 = vst [vmem:[%s1392_s23 + $0x2e8] sm:$0xff] %v762_v62  ;;  %v505_v11 = vmul.f32 %v1721_v10, %v1188_v9  ;;  %v506_v12 = vmul.f32 %v1721_v10, %v1189_v2  ;;  %v507_v13 = vmul.f32 %v1721_v10, %v1192_v3  ;;  %v1204_v40 = vunpack.c.l.bf16 %v1301_v28 }
  0x72   : > { %891 = vst [vmem:[%s1392_s23 + $0x2f0] sm:$0xff] %v763_v63  ;;  %892 = vst [vmem:[%s1392_s23 + $0x2f8] sm:$0xff] %v764_v1  ;;  %v508_v14 = vmul.f32 %v1721_v10, %v1193_v4  ;;  %v509_v15 = vmul.f32 %v1721_v10, %v1196_v5  ;;  %v510_v16 = vmul.f32 %v1721_v10, %v1197_v6  ;;  %v1205_v41 = vunpack.c.h.bf16 %v1301_v28  ;;  %v1305_v63 = vld [vmem:[%s1360_s15 + $0x1c0] sm:$0xff]   ;;  %v1306_v1 = vld [vmem:[%s1360_s15 + $0x1c8] sm:$0xff]  }
  0x73   : > { %v511_v17 = vmul.f32 %v1721_v10, %v1200_v7  ;;  %v512_v18 = vmul.f32 %v1721_v10, %v1201_v8  ;;  %v637_v20 = vadd.f32 %v1734_v19, %v505_v11  ;;  %v638_v21 = vadd.f32 %v1734_v19, %v506_v12  ;;  %v1307_v5 = vld [vmem:[%s1360_s15 + $0x1d0] sm:$0xff]   ;;  %v1308_v6 = vld [vmem:[%s1360_s15 + $0x1d8] sm:$0xff]  }
  0x74   : > { %v639_v22 = vadd.f32 %v1734_v19, %v507_v13  ;;  %v640_v23 = vadd.f32 %v1734_v19, %v508_v14  ;;  %v641_v24 = vadd.f32 %v1734_v19, %v509_v15  ;;  %v642_v25 = vadd.f32 %v1734_v19, %v510_v16 }
  0x75   : > { %v643_v26 = vadd.f32 %v1734_v19, %v511_v17  ;;  %v644_v27 = vadd.f32 %v1734_v19, %v512_v18  ;;  %v765_v30 = vmax.f32 %v637_v20, 0.0  ;;  %v766_v31 = vmax.f32 %v638_v21, 0.0 }
  0x76   : > { %v767_v32 = vmax.f32 %v639_v22, 0.0  ;;  %v768_v33 = vmax.f32 %v640_v23, 0.0  ;;  %v769_v36 = vmax.f32 %v641_v24, 0.0  ;;  %v770_v37 = vmax.f32 %v642_v25, 0.0 }
  0x77   : > { %v771_v38 = vmax.f32 %v643_v26, 0.0  ;;  %v772_v39 = vmax.f32 %v644_v27, 0.0  ;;  %893 = vst [vmem:[%s1392_s23 + $0x300] sm:$0xff] %v765_v30  ;;  %894 = vst [vmem:[%s1392_s23 + $0x308] sm:$0xff] %v766_v31  ;;  %v1208_v42 = vunpack.c.l.bf16 %v1302_v29  ;;  %v1209_v43 = vunpack.c.h.bf16 %v1302_v29 }
  0x78   : > { %895 = vst [vmem:[%s1392_s23 + $0x310] sm:$0xff] %v767_v32  ;;  %896 = vst [vmem:[%s1392_s23 + $0x318] sm:$0xff] %v768_v33  ;;  %v1212_v44 = vunpack.c.l.bf16 %v1303_v34  ;;  %v1213_v45 = vunpack.c.h.bf16 %v1303_v34  ;;  %v1216_v46 = vunpack.c.l.bf16 %v1304_v35  ;;  %v1217_v47 = vunpack.c.h.bf16 %v1304_v35 }
  0x79   : > { %897 = vst [vmem:[%s1392_s23 + $0x320] sm:$0xff] %v769_v36  ;;  %898 = vst [vmem:[%s1392_s23 + $0x328] sm:$0xff] %v770_v37  ;;  %v513_v48 = vmul.f32 %v1721_v10, %v1204_v40  ;;  %v514_v49 = vmul.f32 %v1721_v10, %v1205_v41  ;;  %v515_v50 = vmul.f32 %v1721_v10, %v1208_v42  ;;  %v1220_v13 = vunpack.c.l.bf16 %v1305_v63 }
  0x7a   : > { %899 = vst [vmem:[%s1392_s23 + $0x330] sm:$0xff] %v771_v38  ;;  %900 = vst [vmem:[%s1392_s23 + $0x338] sm:$0xff] %v772_v39  ;;  %v516_v51 = vmul.f32 %v1721_v10, %v1209_v43  ;;  %v517_v52 = vmul.f32 %v1721_v10, %v1212_v44  ;;  %v518_v0 = vmul.f32 %v1721_v10, %v1213_v45  ;;  %v1221_v14 = vunpack.c.h.bf16 %v1305_v63  ;;  %v1309_v38 = vld [vmem:[%s1360_s15 + $0x1e0] sm:$0xff]   ;;  %v1310_v39 = vld [vmem:[%s1360_s15 + $0x1e8] sm:$0xff]  }
  0x7b   : > { %v519_v53 = vmul.f32 %v1721_v10, %v1216_v46  ;;  %v520_v54 = vmul.f32 %v1721_v10, %v1217_v47  ;;  %v645_v55 = vadd.f32 %v1734_v19, %v513_v48  ;;  %v646_v56 = vadd.f32 %v1734_v19, %v514_v49  ;;  %v1311_v44 = vld [vmem:[%s1360_s15 + $0x1f0] sm:$0xff]   ;;  %v1312_v45 = vld [vmem:[%s1360_s15 + $0x1f8] sm:$0xff]  }
  0x7c   : > { %v647_v57 = vadd.f32 %v1734_v19, %v515_v50  ;;  %v648_v58 = vadd.f32 %v1734_v19, %v516_v51  ;;  %v649_v59 = vadd.f32 %v1734_v19, %v517_v52  ;;  %v650_v60 = vadd.f32 %v1734_v19, %v518_v0 }
  0x7d   : > { %v651_v61 = vadd.f32 %v1734_v19, %v519_v53  ;;  %v652_v62 = vadd.f32 %v1734_v19, %v520_v54  ;;  %v773_v9 = vmax.f32 %v645_v55, 0.0  ;;  %v774_v2 = vmax.f32 %v646_v56, 0.0 }
  0x7e   : > { %v775_v3 = vmax.f32 %v647_v57, 0.0  ;;  %v776_v4 = vmax.f32 %v648_v58, 0.0  ;;  %v777_v7 = vmax.f32 %v649_v59, 0.0  ;;  %v778_v8 = vmax.f32 %v650_v60, 0.0 }
  0x7f   : > { %v779_v11 = vmax.f32 %v651_v61, 0.0  ;;  %v780_v12 = vmax.f32 %v652_v62, 0.0  ;;  %901 = vst [vmem:[%s1392_s23 + $0x340] sm:$0xff] %v773_v9  ;;  %902 = vst [vmem:[%s1392_s23 + $0x348] sm:$0xff] %v774_v2  ;;  %v1224_v15 = vunpack.c.l.bf16 %v1306_v1  ;;  %v1225_v16 = vunpack.c.h.bf16 %v1306_v1 }
  0x80   : > { %903 = vst [vmem:[%s1392_s23 + $0x350] sm:$0xff] %v775_v3  ;;  %904 = vst [vmem:[%s1392_s23 + $0x358] sm:$0xff] %v776_v4  ;;  %v1228_v17 = vunpack.c.l.bf16 %v1307_v5  ;;  %v1229_v18 = vunpack.c.h.bf16 %v1307_v5  ;;  %v1232_v20 = vunpack.c.l.bf16 %v1308_v6  ;;  %v1233_v21 = vunpack.c.h.bf16 %v1308_v6 }
  0x81   : > { %905 = vst [vmem:[%s1392_s23 + $0x360] sm:$0xff] %v777_v7  ;;  %906 = vst [vmem:[%s1392_s23 + $0x368] sm:$0xff] %v778_v8  ;;  %v521_v22 = vmul.f32 %v1721_v10, %v1220_v13  ;;  %v522_v23 = vmul.f32 %v1721_v10, %v1221_v14  ;;  %v523_v24 = vmul.f32 %v1721_v10, %v1224_v15  ;;  %v1236_v50 = vunpack.c.l.bf16 %v1309_v38 }
  0x82   : > { %907 = vst [vmem:[%s1392_s23 + $0x370] sm:$0xff] %v779_v11  ;;  %908 = vst [vmem:[%s1392_s23 + $0x378] sm:$0xff] %v780_v12  ;;  %v524_v25 = vmul.f32 %v1721_v10, %v1225_v16  ;;  %v525_v26 = vmul.f32 %v1721_v10, %v1228_v17  ;;  %v526_v27 = vmul.f32 %v1721_v10, %v1229_v18  ;;  %v1237_v51 = vunpack.c.h.bf16 %v1309_v38 }
  0x83   : > { %v527_v28 = vmul.f32 %v1721_v10, %v1232_v20  ;;  %v528_v29 = vmul.f32 %v1721_v10, %v1233_v21  ;;  %v653_v30 = vadd.f32 %v1734_v19, %v521_v22  ;;  %v654_v31 = vadd.f32 %v1734_v19, %v522_v23 }
  0x84   : > { %v655_v32 = vadd.f32 %v1734_v19, %v523_v24  ;;  %v656_v33 = vadd.f32 %v1734_v19, %v524_v25  ;;  %v657_v34 = vadd.f32 %v1734_v19, %v525_v26  ;;  %v658_v35 = vadd.f32 %v1734_v19, %v526_v27 }
  0x85   : > { %v659_v36 = vadd.f32 %v1734_v19, %v527_v28  ;;  %v660_v37 = vadd.f32 %v1734_v19, %v528_v29  ;;  %v781_v40 = vmax.f32 %v653_v30, 0.0  ;;  %v782_v41 = vmax.f32 %v654_v31, 0.0 }
  0x86   : > { %v783_v42 = vmax.f32 %v655_v32, 0.0  ;;  %v784_v43 = vmax.f32 %v656_v33, 0.0  ;;  %v785_v46 = vmax.f32 %v657_v34, 0.0  ;;  %v786_v47 = vmax.f32 %v658_v35, 0.0 }
  0x87   : > { %v787_v48 = vmax.f32 %v659_v36, 0.0  ;;  %v788_v49 = vmax.f32 %v660_v37, 0.0  ;;  %909 = vst [vmem:[%s1392_s23 + $0x380] sm:$0xff] %v781_v40  ;;  %910 = vst [vmem:[%s1392_s23 + $0x388] sm:$0xff] %v782_v41  ;;  %v1240_v52 = vunpack.c.l.bf16 %v1310_v39  ;;  %v1241_v0 = vunpack.c.h.bf16 %v1310_v39 }
  0x88   : > { %911 = vst [vmem:[%s1392_s23 + $0x390] sm:$0xff] %v783_v42  ;;  %912 = vst [vmem:[%s1392_s23 + $0x398] sm:$0xff] %v784_v43  ;;  %v1244_v53 = vunpack.c.l.bf16 %v1311_v44  ;;  %v1245_v54 = vunpack.c.h.bf16 %v1311_v44  ;;  %v1248_v55 = vunpack.c.l.bf16 %v1312_v45  ;;  %v1249_v56 = vunpack.c.h.bf16 %v1312_v45 }
  0x89   : > { %913 = vst [vmem:[%s1392_s23 + $0x3a0] sm:$0xff] %v785_v46  ;;  %914 = vst [vmem:[%s1392_s23 + $0x3a8] sm:$0xff] %v786_v47  ;;  %v529_v57 = vmul.f32 %v1721_v10, %v1236_v50  ;;  %v530_v58 = vmul.f32 %v1721_v10, %v1237_v51  ;;  %v531_v59 = vmul.f32 %v1721_v10, %v1240_v52 }
  0x8a   : > { %915 = vst [vmem:[%s1392_s23 + $0x3b0] sm:$0xff] %v787_v48  ;;  %916 = vst [vmem:[%s1392_s23 + $0x3b8] sm:$0xff] %v788_v49  ;;  %v532_v60 = vmul.f32 %v1721_v10, %v1241_v0  ;;  %v533_v61 = vmul.f32 %v1721_v10, %v1244_v53  ;;  %v534_v62 = vmul.f32 %v1721_v10, %v1245_v54 }
  0x8b   : > { %v535_v63 = vmul.f32 %v1721_v10, %v1248_v55  ;;  %v536_v1 = vmul.f32 %v1721_v10, %v1249_v56  ;;  %v661_v9 = vadd.f32 %v1734_v19, %v529_v57  ;;  %v662_v2 = vadd.f32 %v1734_v19, %v530_v58 }
  0x8c   : > { %v663_v3 = vadd.f32 %v1734_v19, %v531_v59  ;;  %v664_v4 = vadd.f32 %v1734_v19, %v532_v60  ;;  %v665_v5 = vadd.f32 %v1734_v19, %v533_v61  ;;  %v666_v6 = vadd.f32 %v1734_v19, %v534_v62 }
  0x8d   : > { %v667_v10 = vadd.f32 %v1734_v19, %v535_v63  ;;  %v668_v7 = vadd.f32 %v1734_v19, %v536_v1  ;;  %v789_v8 = vmax.f32 %v661_v9, 0.0  ;;  %v790_v11 = vmax.f32 %v662_v2, 0.0 }
  0x8e   : > { %v791_v12 = vmax.f32 %v663_v3, 0.0  ;;  %v792_v13 = vmax.f32 %v664_v4, 0.0  ;;  %v793_v14 = vmax.f32 %v665_v5, 0.0  ;;  %v794_v15 = vmax.f32 %v666_v6, 0.0 }
  0x8f   : > { %v795_v16 = vmax.f32 %v667_v10, 0.0  ;;  %v796_v17 = vmax.f32 %v668_v7, 0.0  ;;  %917 = vst [vmem:[%s1392_s23 + $0x3c0] sm:$0xff] %v789_v8  ;;  %918 = vst [vmem:[%s1392_s23 + $0x3c8] sm:$0xff] %v790_v11 }
  0x90   : > { %919 = vst [vmem:[%s1392_s23 + $0x3d0] sm:$0xff] %v791_v12  ;;  %920 = vst [vmem:[%s1392_s23 + $0x3d8] sm:$0xff] %v792_v13 }
  0x91   : > { %921 = vst [vmem:[%s1392_s23 + $0x3e0] sm:$0xff] %v793_v14  ;;  %922 = vst [vmem:[%s1392_s23 + $0x3e8] sm:$0xff] %v794_v15 }
  0x92   : > { %923 = vst [vmem:[%s1392_s23 + $0x3f0] sm:$0xff] %v795_v16  ;;  %924 = vst [vmem:[%s1392_s23 + $0x3f8] sm:$0xff] %v796_v17 }
  0x93 PF: > { %s12_s9 = sadd.s32 1, %s1329_s9  }
  0x94   : > { %p9_p4 = scmp.ge.s32.totalorder %s12_s9, 4  }
  0x96   :  { %11 = sbr.rel (!%p9_p4) target bundleno = 1 (0x1), region = 58 }

// kernel: decoder_block_forward.9
= control target key start
LH: loop header
LB: loop body
LE: loop exit
PB: predicated region body
PF: predicated region fallthrough
CT: control target
= control target key end

     0   :  { %s2497_s9 = smov 0   ;;  %s2929_s0 = inlined_call_operand.vmem [shape: bf16[2048,128], index: 0, kind: input, shape index: {}]   ;;  %s2930_s1 = inlined_call_operand.vmem [shape: f32[8,128], index: 1, kind: input, shape index: {}]   ;;  %s2931_s2 = inlined_call_operand.vmem [shape: bf16[2048,128], index: 2, kind: output, shape index: {}]  }
   0x1 LB: > { %s1493_s10 = sadd.s32 4294967295, %s2480_s9   ;;  %p1497_p0 = scmp.ge.s32.totalorder %s2480_s9, 1  ;;  %s2480_s9 = sphi %s2497_s9, %s12_s9  }
   0x2   : > { %p113_p1 = scmp.lt.s32.totalorder %s2480_s9, 3 }
   0x4   : > { %p114_p2 = pnand %p1497_p0, %p113_p1 }
   0x5   : > { %s1498_s11 = sshll.u32 (!%p114_p2), %s1493_s10, 7 }
   0x6   : > { %117 = sbr.rel (%p114_p2) target bundleno = 165 (0xa5), region = 28  ;;  %p136_p3 = scmp.lt.s32.totalorder (!%p114_p2), %s1498_s11, 255 }
   0xb   : > { %s2933_s11 = smov (!%p136_p3, %s1498_s11), 255  ;;  %v2518_v0 = vld [vmem:[%s2930_s1] ss:$0 sm:$0xff]  ;;  %v2527_v9 = vld [vmem:[%s2930_s1 + $0x1] ss:$0 sm:$0xff] }
   0xc   : > { %s1499_s12 = sshll.u32 %s2933_s11, 2 }
   0xd   : > { %s2513_s15 = scalar_lea.vmem %s2929_s0, %s1499_s12  ;;  %s2552_s22 = scalar_lea.vmem %s2931_s2, %s1499_s12 }
   0xe   : > { %v1763_v1 = vld [vmem:[%s2513_s15] sm:$0xff]   ;;  %v2338_v2 = vld [vmem:[%s2513_s15 + $0x8] sm:$0xff]   ;;  %v2339_v3 = vld [vmem:[%s2513_s15 + $0x10] sm:$0xff]  }
   0xf   : > { %v1764_v4 = vunpack.c.l.bf16 %v1763_v1  ;;  %v1765_v5 = vunpack.c.h.bf16 %v1763_v1  ;;  %v1768_v6 = vunpack.c.l.bf16 %v2338_v2  ;;  %v1769_v7 = vunpack.c.h.bf16 %v2338_v2  ;;  %v2340_v8 = vld [vmem:[%s2513_s15 + $0x18] sm:$0xff]   ;;  %v2341_v30 = vld [vmem:[%s2513_s15 + $0x20] sm:$0xff]   ;;  %v2342_v35 = vld [vmem:[%s2513_s15 + $0x28] sm:$0xff]  }
  0x10   : > { %v1772_v10 = vunpack.c.l.bf16 %v2339_v3  ;;  %v1773_v11 = vunpack.c.h.bf16 %v2339_v3  ;;  %v1776_v12 = vunpack.c.l.bf16 %v2340_v8  ;;  %v1777_v13 = vunpack.c.h.bf16 %v2340_v8  ;;  %v2343_v40 = vld [vmem:[%s2513_s15 + $0x30] sm:$0xff]   ;;  %v2344_v45 = vld [vmem:[%s2513_s15 + $0x38] sm:$0xff]   ;;  %v2345_v3 = vld [vmem:[%s2513_s15 + $0x40] sm:$0xff]  }
  0x11   : > { %v409_v14 = vmul.f32 %v1764_v4, %v2518_v0  ;;  %v410_v15 = vmul.f32 %v1765_v5, %v2518_v0  ;;  %v411_v16 = vmul.f32 %v1768_v6, %v2518_v0  ;;  %v412_v17 = vmul.f32 %v1769_v7, %v2518_v0 }
  0x12   : > { %v413_v18 = vmul.f32 %v1772_v10, %v2518_v0  ;;  %v414_v19 = vmul.f32 %v1773_v11, %v2518_v0  ;;  %v415_v20 = vmul.f32 %v1776_v12, %v2518_v0  ;;  %v416_v21 = vmul.f32 %v1777_v13, %v2518_v0  ;;  %v2346_v13 = vld [vmem:[%s2513_s15 + $0x48] sm:$0xff]  }
  0x13   : > { %v541_v22 = vadd.f32 %v2527_v9, %v409_v14  ;;  %v542_v23 = vadd.f32 %v2527_v9, %v410_v15  ;;  %v543_v24 = vadd.f32 %v2527_v9, %v411_v16  ;;  %v544_v25 = vadd.f32 %v2527_v9, %v412_v17 }
  0x14   : > { %v545_v26 = vadd.f32 %v2527_v9, %v413_v18  ;;  %v546_v27 = vadd.f32 %v2527_v9, %v414_v19  ;;  %v547_v28 = vadd.f32 %v2527_v9, %v415_v20  ;;  %v548_v29 = vadd.f32 %v2527_v9, %v416_v21  ;;  %v2347_v18 = vld [vmem:[%s2513_s15 + $0x50] sm:$0xff]  }
  0x15   : > { %v669_v31 = vmax.f32 %v541_v22, 0.0  ;;  %v670_v32 = vmax.f32 %v542_v23, 0.0  ;;  %v671_v33 = vmax.f32 %v543_v24, 0.0  ;;  %v672_v34 = vmax.f32 %v544_v25, 0.0  ;;  %v2348_v23 = vld [vmem:[%s2513_s15 + $0x58] sm:$0xff]  }
  0x16   : > { %v673_v36 = vmax.f32 %v545_v26, 0.0  ;;  %v674_v37 = vmax.f32 %v546_v27, 0.0  ;;  %v675_v38 = vmax.f32 %v547_v28, 0.0  ;;  %v676_v39 = vmax.f32 %v548_v29, 0.0 }
  0x17   : > { %v2021_v41 = vpack.c.bf16 %v670_v32, %v669_v31  ;;  %v2026_v42 = vpack.c.bf16 %v672_v34, %v671_v33  ;;  %v1780_v43 = vunpack.c.l.bf16 %v2341_v30  ;;  %v1781_v44 = vunpack.c.h.bf16 %v2341_v30 }
  0x18   : > { %v2031_v46 = vpack.c.bf16 %v674_v37, %v673_v36  ;;  %v2036_v47 = vpack.c.bf16 %v676_v39, %v675_v38  ;;  %v1784_v48 = vunpack.c.l.bf16 %v2342_v35  ;;  %v1785_v49 = vunpack.c.h.bf16 %v2342_v35 }
  0x19   : > { %2022 = vst [vmem:[%s2552_s22] sm:$0xff] %v2021_v41   ;;  %2401 = vst [vmem:[%s2552_s22 + $0x8] sm:$0xff] %v2026_v42   ;;  %v417_v50 = vmul.f32 %v1780_v43, %v2518_v0  ;;  %v418_v51 = vmul.f32 %v1781_v44, %v2518_v0  ;;  %v1788_v52 = vunpack.c.l.bf16 %v2343_v40  ;;  %v1789_v53 = vunpack.c.h.bf16 %v2343_v40  ;;  %v2349_v40 = vld [vmem:[%s2513_s15 + $0x60] sm:$0xff]  }
  0x1a   : > { %2402 = vst [vmem:[%s2552_s22 + $0x10] sm:$0xff] %v2031_v46   ;;  %2403 = vst [vmem:[%s2552_s22 + $0x18] sm:$0xff] %v2036_v47   ;;  %v419_v54 = vmul.f32 %v1784_v48, %v2518_v0  ;;  %v420_v55 = vmul.f32 %v1785_v49, %v2518_v0  ;;  %v1792_v56 = vunpack.c.l.bf16 %v2344_v45  ;;  %v1793_v57 = vunpack.c.h.bf16 %v2344_v45 }
  0x1b   : > { %v549_v58 = vadd.f32 %v2527_v9, %v417_v50  ;;  %v550_v59 = vadd.f32 %v2527_v9, %v418_v51  ;;  %v421_v60 = vmul.f32 %v1788_v52, %v2518_v0  ;;  %v422_v61 = vmul.f32 %v1789_v53, %v2518_v0  ;;  %v2350_v53 = vld [vmem:[%s2513_s15 + $0x68] sm:$0xff]  }
  0x1c   : > { %v551_v62 = vadd.f32 %v2527_v9, %v419_v54  ;;  %v552_v63 = vadd.f32 %v2527_v9, %v420_v55  ;;  %v423_v1 = vmul.f32 %v1792_v56, %v2518_v0  ;;  %v424_v2 = vmul.f32 %v1793_v57, %v2518_v0 }
  0x1d   : > { %v677_v4 = vmax.f32 %v549_v58, 0.0  ;;  %v678_v5 = vmax.f32 %v550_v59, 0.0  ;;  %v553_v6 = vadd.f32 %v2527_v9, %v421_v60  ;;  %v554_v7 = vadd.f32 %v2527_v9, %v422_v61  ;;  %v2351_v58 = vld [vmem:[%s2513_s15 + $0x70] sm:$0xff]  }
  0x1e   : > { %v679_v8 = vmax.f32 %v551_v62, 0.0  ;;  %v680_v10 = vmax.f32 %v552_v63, 0.0  ;;  %v555_v11 = vadd.f32 %v2527_v9, %v423_v1  ;;  %v556_v12 = vadd.f32 %v2527_v9, %v424_v2  ;;  %v2352_v63 = vld [vmem:[%s2513_s15 + $0x78] sm:$0xff]  }
  0x1f   : > { %v2041_v14 = vpack.c.bf16 %v678_v5, %v677_v4  ;;  %v681_v15 = vmax.f32 %v553_v6, 0.0  ;;  %v682_v16 = vmax.f32 %v554_v7, 0.0  ;;  %v1796_v17 = vunpack.c.l.bf16 %v2345_v3 }
  0x20   : > { %v2046_v19 = vpack.c.bf16 %v680_v10, %v679_v8  ;;  %v683_v20 = vmax.f32 %v555_v11, 0.0  ;;  %v684_v21 = vmax.f32 %v556_v12, 0.0  ;;  %v1797_v22 = vunpack.c.h.bf16 %v2345_v3 }
  0x21   : > { %2404 = vst [vmem:[%s2552_s22 + $0x20] sm:$0xff] %v2041_v14   ;;  %v2051_v24 = vpack.c.bf16 %v682_v16, %v681_v15  ;;  %v425_v25 = vmul.f32 %v1796_v17, %v2518_v0  ;;  %v1800_v26 = vunpack.c.l.bf16 %v2346_v13  ;;  %v1801_v27 = vunpack.c.h.bf16 %v2346_v13  ;;  %v2353_v14 = vld [vmem:[%s2513_s15 + $0x80] sm:$0xff]  }
  0x22   : > { %2405 = vst [vmem:[%s2552_s22 + $0x28] sm:$0xff] %v2046_v19   ;;  %v2056_v28 = vpack.c.bf16 %v684_v21, %v683_v20  ;;  %v426_v29 = vmul.f32 %v1797_v22, %v2518_v0  ;;  %v1804_v30 = vunpack.c.l.bf16 %v2347_v18  ;;  %v1805_v31 = vunpack.c.h.bf16 %v2347_v18 }
  0x23   : > { %2406 = vst [vmem:[%s2552_s22 + $0x30] sm:$0xff] %v2051_v24   ;;  %v557_v32 = vadd.f32 %v2527_v9, %v425_v25  ;;  %v427_v33 = vmul.f32 %v1800_v26, %v2518_v0  ;;  %v428_v34 = vmul.f32 %v1801_v27, %v2518_v0  ;;  %v1808_v35 = vunpack.c.l.bf16 %v2348_v23 }
  0x24   : > { %2407 = vst [vmem:[%s2552_s22 + $0x38] sm:$0xff] %v2056_v28   ;;  %v558_v36 = vadd.f32 %v2527_v9, %v426_v29  ;;  %v429_v37 = vmul.f32 %v1804_v30, %v2518_v0  ;;  %v430_v38 = vmul.f32 %v1805_v31, %v2518_v0  ;;  %v1809_v39 = vunpack.c.h.bf16 %v2348_v23  ;;  %v2354_v31 = vld [vmem:[%s2513_s15 + $0x88] sm:$0xff]  }
  0x25   : > { %v685_v41 = vmax.f32 %v557_v32, 0.0  ;;  %v559_v42 = vadd.f32 %v2527_v9, %v427_v33  ;;  %v560_v43 = vadd.f32 %v2527_v9, %v428_v34  ;;  %v431_v44 = vmul.f32 %v1808_v35, %v2518_v0 }
  0x26   : > { %v686_v45 = vmax.f32 %v558_v36, 0.0  ;;  %v561_v46 = vadd.f32 %v2527_v9, %v429_v37  ;;  %v562_v47 = vadd.f32 %v2527_v9, %v430_v38  ;;  %v432_v48 = vmul.f32 %v1809_v39, %v2518_v0  ;;  %v2355_v36 = vld [vmem:[%s2513_s15 + $0x90] sm:$0xff]  }
  0x27   : > { %v687_v49 = vmax.f32 %v559_v42, 0.0  ;;  %v688_v50 = vmax.f32 %v560_v43, 0.0  ;;  %v563_v51 = vadd.f32 %v2527_v9, %v431_v44  ;;  %v1812_v52 = vunpack.c.l.bf16 %v2349_v40 }
  0x28   : > { %v2061_v54 = vpack.c.bf16 %v686_v45, %v685_v41  ;;  %v689_v55 = vmax.f32 %v561_v46, 0.0  ;;  %v690_v56 = vmax.f32 %v562_v47, 0.0  ;;  %v564_v57 = vadd.f32 %v2527_v9, %v432_v48  ;;  %v2356_v41 = vld [vmem:[%s2513_s15 + $0x98] sm:$0xff]  }
  0x29   : > { %v2066_v59 = vpack.c.bf16 %v688_v50, %v687_v49  ;;  %v691_v60 = vmax.f32 %v563_v51, 0.0  ;;  %v1813_v61 = vunpack.c.h.bf16 %v2349_v40  ;;  %v433_v62 = vmul.f32 %v1812_v52, %v2518_v0 }
  0x2a   : > { %2408 = vst [vmem:[%s2552_s22 + $0x40] sm:$0xff] %v2061_v54   ;;  %v2071_v1 = vpack.c.bf16 %v690_v56, %v689_v55  ;;  %v692_v2 = vmax.f32 %v564_v57, 0.0  ;;  %v1816_v3 = vunpack.c.l.bf16 %v2350_v53  ;;  %v1817_v4 = vunpack.c.h.bf16 %v2350_v53  ;;  %v2357_v54 = vld [vmem:[%s2513_s15 + $0xa0] sm:$0xff]  }
  0x2b   : > { %2409 = vst [vmem:[%s2552_s22 + $0x48] sm:$0xff] %v2066_v59   ;;  %v434_v5 = vmul.f32 %v1813_v61, %v2518_v0  ;;  %v565_v6 = vadd.f32 %v2527_v9, %v433_v62  ;;  %v1820_v7 = vunpack.c.l.bf16 %v2351_v58  ;;  %v1821_v8 = vunpack.c.h.bf16 %v2351_v58 }
  0x2c   : > { %2410 = vst [vmem:[%s2552_s22 + $0x50] sm:$0xff] %v2071_v1   ;;  %v2076_v10 = vpack.c.bf16 %v692_v2, %v691_v60  ;;  %v435_v11 = vmul.f32 %v1816_v3, %v2518_v0  ;;  %v436_v12 = vmul.f32 %v1817_v4, %v2518_v0  ;;  %v1824_v13 = vunpack.c.l.bf16 %v2352_v63  ;;  %v2358_v4 = vld [vmem:[%s2513_s15 + $0xa8] sm:$0xff]  }
  0x2d   : > { %v566_v15 = vadd.f32 %v2527_v9, %v434_v5  ;;  %v693_v16 = vmax.f32 %v565_v6, 0.0  ;;  %v437_v17 = vmul.f32 %v1820_v7, %v2518_v0  ;;  %v438_v18 = vmul.f32 %v1821_v8, %v2518_v0 }
  0x2e   : > { %2411 = vst [vmem:[%s2552_s22 + $0x58] sm:$0xff] %v2076_v10   ;;  %v567_v19 = vadd.f32 %v2527_v9, %v435_v11  ;;  %v568_v20 = vadd.f32 %v2527_v9, %v436_v12  ;;  %v1825_v21 = vunpack.c.h.bf16 %v2352_v63  ;;  %v439_v22 = vmul.f32 %v1824_v13, %v2518_v0 }
  0x2f   : > { %v694_v23 = vmax.f32 %v566_v15, 0.0  ;;  %v569_v24 = vadd.f32 %v2527_v9, %v437_v17  ;;  %v570_v25 = vadd.f32 %v2527_v9, %v438_v18  ;;  %v1828_v26 = vunpack.c.l.bf16 %v2353_v14 }
  0x30   : > { %v695_v27 = vmax.f32 %v567_v19, 0.0  ;;  %v696_v28 = vmax.f32 %v568_v20, 0.0  ;;  %v440_v29 = vmul.f32 %v1825_v21, %v2518_v0  ;;  %v571_v30 = vadd.f32 %v2527_v9, %v439_v22  ;;  %v2360_v19 = vld [vmem:[%s2513_s15 + $0xb8] sm:$0xff]  }
  0x31   : > { %v2081_v32 = vpack.c.bf16 %v694_v23, %v693_v16  ;;  %v697_v33 = vmax.f32 %v569_v24, 0.0  ;;  %v698_v34 = vmax.f32 %v570_v25, 0.0  ;;  %v1829_v35 = vunpack.c.h.bf16 %v2353_v14  ;;  %v2359_v14 = vld [vmem:[%s2513_s15 + $0xb0] sm:$0xff]  }
  0x32   : > { %v2086_v37 = vpack.c.bf16 %v696_v28, %v695_v27  ;;  %v572_v38 = vadd.f32 %v2527_v9, %v440_v29  ;;  %v699_v39 = vmax.f32 %v571_v30, 0.0  ;;  %v441_v40 = vmul.f32 %v1828_v26, %v2518_v0 }
  0x33   : > { %2412 = vst [vmem:[%s2552_s22 + $0x60] sm:$0xff] %v2081_v32   ;;  %v2091_v42 = vpack.c.bf16 %v698_v34, %v697_v33  ;;  %v442_v43 = vmul.f32 %v1829_v35, %v2518_v0  ;;  %v1832_v44 = vunpack.c.l.bf16 %v2354_v31  ;;  %v1833_v45 = vunpack.c.h.bf16 %v2354_v31  ;;  %v2361_v32 = vld [vmem:[%s2513_s15 + $0xc0] sm:$0xff]  }
  0x34   : > { %2413 = vst [vmem:[%s2552_s22 + $0x68] sm:$0xff] %v2086_v37   ;;  %v700_v46 = vmax.f32 %v572_v38, 0.0  ;;  %v573_v47 = vadd.f32 %v2527_v9, %v441_v40  ;;  %v1836_v48 = vunpack.c.l.bf16 %v2355_v36  ;;  %v1837_v49 = vunpack.c.h.bf16 %v2355_v36 }
  0x35   : > { %2414 = vst [vmem:[%s2552_s22 + $0x70] sm:$0xff] %v2091_v42   ;;  %v574_v50 = vadd.f32 %v2527_v9, %v442_v43  ;;  %v443_v51 = vmul.f32 %v1832_v44, %v2518_v0  ;;  %v444_v52 = vmul.f32 %v1833_v45, %v2518_v0  ;;  %v1840_v53 = vunpack.c.l.bf16 %v2356_v41  ;;  %v2362_v45 = vld [vmem:[%s2513_s15 + $0xc8] sm:$0xff]  }
  0x36   : > { %v2096_v55 = vpack.c.bf16 %v700_v46, %v699_v39  ;;  %v701_v56 = vmax.f32 %v573_v47, 0.0  ;;  %v445_v57 = vmul.f32 %v1836_v48, %v2518_v0  ;;  %v446_v58 = vmul.f32 %v1837_v49, %v2518_v0 }
  0x37   : > { %v702_v59 = vmax.f32 %v574_v50, 0.0  ;;  %v575_v60 = vadd.f32 %v2527_v9, %v443_v51  ;;  %v576_v61 = vadd.f32 %v2527_v9, %v444_v52  ;;  %v1841_v62 = vunpack.c.h.bf16 %v2356_v41 }
  0x38   : > { %2415 = vst [vmem:[%s2552_s22 + $0x78] sm:$0xff] %v2096_v55   ;;  %v577_v63 = vadd.f32 %v2527_v9, %v445_v57  ;;  %v578_v1 = vadd.f32 %v2527_v9, %v446_v58  ;;  %v447_v2 = vmul.f32 %v1840_v53, %v2518_v0  ;;  %v1844_v3 = vunpack.c.l.bf16 %v2357_v54 }
  0x39   : > { %v2101_v5 = vpack.c.bf16 %v702_v59, %v701_v56  ;;  %v703_v6 = vmax.f32 %v575_v60, 0.0  ;;  %v704_v7 = vmax.f32 %v576_v61, 0.0  ;;  %v448_v8 = vmul.f32 %v1841_v62, %v2518_v0 }
  0x3a   : > { %v705_v10 = vmax.f32 %v577_v63, 0.0  ;;  %v706_v11 = vmax.f32 %v578_v1, 0.0  ;;  %v579_v12 = vadd.f32 %v2527_v9, %v447_v2  ;;  %v1845_v13 = vunpack.c.h.bf16 %v2357_v54  ;;  %v2363_v54 = vld [vmem:[%s2513_s15 + $0xd0] sm:$0xff]   ;;  %v2364_v63 = vld [vmem:[%s2513_s15 + $0xd8] sm:$0xff]  }
  0x3b   : > { %2416 = vst [vmem:[%s2552_s22 + $0x80] sm:$0xff] %v2101_v5   ;;  %v2106_v15 = vpack.c.bf16 %v704_v7, %v703_v6  ;;  %v580_v16 = vadd.f32 %v2527_v9, %v448_v8  ;;  %v449_v17 = vmul.f32 %v1844_v3, %v2518_v0  ;;  %v1848_v18 = vunpack.c.l.bf16 %v2358_v4 }
  0x3c   : > { %v2111_v20 = vpack.c.bf16 %v706_v11, %v705_v10  ;;  %v707_v21 = vmax.f32 %v579_v12, 0.0  ;;  %v450_v22 = vmul.f32 %v1845_v13, %v2518_v0  ;;  %v1849_v23 = vunpack.c.h.bf16 %v2358_v4  ;;  %v2365_v10 = vld [vmem:[%s2513_s15 + $0xe0] sm:$0xff]  }
  0x3d   : > { %2417 = vst [vmem:[%s2552_s22 + $0x88] sm:$0xff] %v2106_v15   ;;  %v708_v24 = vmax.f32 %v580_v16, 0.0  ;;  %v581_v25 = vadd.f32 %v2527_v9, %v449_v17  ;;  %v451_v26 = vmul.f32 %v1848_v18, %v2518_v0  ;;  %v1852_v27 = vunpack.c.l.bf16 %v2359_v14 }
  0x3e   : > { %2418 = vst [vmem:[%s2552_s22 + $0x90] sm:$0xff] %v2111_v20   ;;  %v582_v28 = vadd.f32 %v2527_v9, %v450_v22  ;;  %v452_v29 = vmul.f32 %v1849_v23, %v2518_v0  ;;  %v1853_v30 = vunpack.c.h.bf16 %v2359_v14  ;;  %v1856_v31 = vunpack.c.l.bf16 %v2360_v19  ;;  %v2366_v23 = vld [vmem:[%s2513_s15 + $0xe8] sm:$0xff]  }
  0x3f   : > { %v2116_v33 = vpack.c.bf16 %v708_v24, %v707_v21  ;;  %v709_v34 = vmax.f32 %v581_v25, 0.0  ;;  %v583_v35 = vadd.f32 %v2527_v9, %v451_v26  ;;  %v453_v36 = vmul.f32 %v1852_v27, %v2518_v0 }
  0x40   : > { %v710_v37 = vmax.f32 %v582_v28, 0.0  ;;  %v584_v38 = vadd.f32 %v2527_v9, %v452_v29  ;;  %v454_v39 = vmul.f32 %v1853_v30, %v2518_v0  ;;  %v1857_v40 = vunpack.c.h.bf16 %v2360_v19 }
  0x41   : > { %2419 = vst [vmem:[%s2552_s22 + $0x98] sm:$0xff] %v2116_v33   ;;  %v711_v41 = vmax.f32 %v583_v35, 0.0  ;;  %v585_v42 = vadd.f32 %v2527_v9, %v453_v36  ;;  %v455_v43 = vmul.f32 %v1856_v31, %v2518_v0  ;;  %v1860_v44 = vunpack.c.l.bf16 %v2361_v32 }
  0x42   : > { %v2121_v46 = vpack.c.bf16 %v710_v37, %v709_v34  ;;  %v712_v47 = vmax.f32 %v584_v38, 0.0  ;;  %v586_v48 = vadd.f32 %v2527_v9, %v454_v39  ;;  %v456_v49 = vmul.f32 %v1857_v40, %v2518_v0 }
  0x43   : > { %v713_v50 = vmax.f32 %v585_v42, 0.0  ;;  %v587_v51 = vadd.f32 %v2527_v9, %v455_v43  ;;  %v1861_v52 = vunpack.c.h.bf16 %v2361_v32  ;;  %v457_v53 = vmul.f32 %v1860_v44, %v2518_v0  ;;  %v2367_v32 = vld [vmem:[%s2513_s15 + $0xf0] sm:$0xff]  }
  0x44   : > { %2420 = vst [vmem:[%s2552_s22 + $0xa0] sm:$0xff] %v2121_v46   ;;  %v2126_v55 = vpack.c.bf16 %v712_v47, %v711_v41  ;;  %v714_v56 = vmax.f32 %v586_v48, 0.0  ;;  %v588_v57 = vadd.f32 %v2527_v9, %v456_v49  ;;  %v1864_v58 = vunpack.c.l.bf16 %v2362_v45  ;;  %v2368_v41 = vld [vmem:[%s2513_s15 + $0xf8] sm:$0xff]  }
  0x45   : > { %v715_v59 = vmax.f32 %v587_v51, 0.0  ;;  %v458_v60 = vmul.f32 %v1861_v52, %v2518_v0  ;;  %v589_v61 = vadd.f32 %v2527_v9, %v457_v53  ;;  %v1865_v62 = vunpack.c.h.bf16 %v2362_v45 }
  0x46   : > { %2421 = vst [vmem:[%s2552_s22 + $0xa8] sm:$0xff] %v2126_v55   ;;  %v2131_v1 = vpack.c.bf16 %v714_v56, %v713_v50  ;;  %v716_v2 = vmax.f32 %v588_v57, 0.0  ;;  %v459_v3 = vmul.f32 %v1864_v58, %v2518_v0  ;;  %v1868_v4 = vunpack.c.l.bf16 %v2363_v54  ;;  %v2369_v50 = vld [vmem:[%s2513_s15 + $0x100] sm:$0xff]  }
  0x47   : > { %v590_v5 = vadd.f32 %v2527_v9, %v458_v60  ;;  %v717_v6 = vmax.f32 %v589_v61, 0.0  ;;  %v460_v7 = vmul.f32 %v1865_v62, %v2518_v0  ;;  %v1869_v8 = vunpack.c.h.bf16 %v2363_v54 }
  0x48   : > { %2422 = vst [vmem:[%s2552_s22 + $0xb0] sm:$0xff] %v2131_v1   ;;  %v2136_v11 = vpack.c.bf16 %v716_v2, %v715_v59  ;;  %v591_v12 = vadd.f32 %v2527_v9, %v459_v3  ;;  %v461_v13 = vmul.f32 %v1868_v4, %v2518_v0  ;;  %v1872_v14 = vunpack.c.l.bf16 %v2364_v63 }
  0x49   : > { %v718_v15 = vmax.f32 %v590_v5, 0.0  ;;  %v592_v16 = vadd.f32 %v2527_v9, %v460_v7  ;;  %v462_v17 = vmul.f32 %v1869_v8, %v2518_v0  ;;  %v1873_v18 = vunpack.c.h.bf16 %v2364_v63  ;;  %v2370_v63 = vld [vmem:[%s2513_s15 + $0x108] sm:$0xff]  }
  0x4a   : > { %2423 = vst [vmem:[%s2552_s22 + $0xb8] sm:$0xff] %v2136_v11   ;;  %v719_v19 = vmax.f32 %v591_v12, 0.0  ;;  %v593_v20 = vadd.f32 %v2527_v9, %v461_v13  ;;  %v463_v21 = vmul.f32 %v1872_v14, %v2518_v0  ;;  %v1876_v22 = vunpack.c.l.bf16 %v2365_v10 }
  0x4b   : > { %v2141_v24 = vpack.c.bf16 %v718_v15, %v717_v6  ;;  %v720_v25 = vmax.f32 %v592_v16, 0.0  ;;  %v594_v26 = vadd.f32 %v2527_v9, %v462_v17  ;;  %v464_v27 = vmul.f32 %v1873_v18, %v2518_v0 }
  0x4c   : > { %v721_v28 = vmax.f32 %v593_v20, 0.0  ;;  %v595_v29 = vadd.f32 %v2527_v9, %v463_v21  ;;  %v1877_v30 = vunpack.c.h.bf16 %v2365_v10  ;;  %v465_v31 = vmul.f32 %v1876_v22, %v2518_v0  ;;  %v2371_v10 = vld [vmem:[%s2513_s15 + $0x110] sm:$0xff]  }
  0x4d   : > { %2424 = vst [vmem:[%s2552_s22 + $0xc0] sm:$0xff] %v2141_v24   ;;  %v2146_v33 = vpack.c.bf16 %v720_v25, %v719_v19  ;;  %v722_v34 = vmax.f32 %v594_v26, 0.0  ;;  %v596_v35 = vadd.f32 %v2527_v9, %v464_v27  ;;  %v1880_v36 = vunpack.c.l.bf16 %v2366_v23  ;;  %v2372_v19 = vld [vmem:[%s2513_s15 + $0x118] sm:$0xff]  }
  0x4e   : > { %v723_v37 = vmax.f32 %v595_v29, 0.0  ;;  %v466_v38 = vmul.f32 %v1877_v30, %v2518_v0  ;;  %v597_v39 = vadd.f32 %v2527_v9, %v465_v31  ;;  %v1881_v40 = vunpack.c.h.bf16 %v2366_v23 }
  0x4f   : > { %2425 = vst [vmem:[%s2552_s22 + $0xc8] sm:$0xff] %v2146_v33   ;;  %v2151_v42 = vpack.c.bf16 %v722_v34, %v721_v28  ;;  %v724_v43 = vmax.f32 %v596_v35, 0.0  ;;  %v467_v44 = vmul.f32 %v1880_v36, %v2518_v0  ;;  %v1884_v45 = vunpack.c.l.bf16 %v2367_v32  ;;  %v2373_v28 = vld [vmem:[%s2513_s15 + $0x120] sm:$0xff]  }
  0x50   : > { %v598_v46 = vadd.f32 %v2527_v9, %v466_v38  ;;  %v725_v47 = vmax.f32 %v597_v39, 0.0  ;;  %v468_v48 = vmul.f32 %v1881_v40, %v2518_v0  ;;  %v1885_v49 = vunpack.c.h.bf16 %v2367_v32 }
  0x51   : > { %2426 = vst [vmem:[%s2552_s22 + $0xd0] sm:$0xff] %v2151_v42   ;;  %v2156_v51 = vpack.c.bf16 %v724_v43, %v723_v37  ;;  %v599_v52 = vadd.f32 %v2527_v9, %v467_v44  ;;  %v469_v53 = vmul.f32 %v1884_v45, %v2518_v0  ;;  %v1888_v54 = vunpack.c.l.bf16 %v2368_v41 }
  0x52   : > { %v726_v55 = vmax.f32 %v598_v46, 0.0  ;;  %v600_v56 = vadd.f32 %v2527_v9, %v468_v48  ;;  %v470_v57 = vmul.f32 %v1885_v49, %v2518_v0  ;;  %v1889_v58 = vunpack.c.h.bf16 %v2368_v41  ;;  %v2374_v41 = vld [vmem:[%s2513_s15 + $0x128] sm:$0xff]  }
  0x53   : > { %2427 = vst [vmem:[%s2552_s22 + $0xd8] sm:$0xff] %v2156_v51   ;;  %v727_v59 = vmax.f32 %v599_v52, 0.0  ;;  %v601_v60 = vadd.f32 %v2527_v9, %v469_v53  ;;  %v471_v61 = vmul.f32 %v1888_v54, %v2518_v0  ;;  %v1892_v62 = vunpack.c.l.bf16 %v2369_v50 }
  0x54   : > { %v2161_v1 = vpack.c.bf16 %v726_v55, %v725_v47  ;;  %v728_v2 = vmax.f32 %v600_v56, 0.0  ;;  %v602_v3 = vadd.f32 %v2527_v9, %v470_v57  ;;  %v472_v4 = vmul.f32 %v1889_v58, %v2518_v0 }
  0x55   : > { %v729_v5 = vmax.f32 %v601_v60, 0.0  ;;  %v603_v6 = vadd.f32 %v2527_v9, %v471_v61  ;;  %v1893_v7 = vunpack.c.h.bf16 %v2369_v50  ;;  %v473_v8 = vmul.f32 %v1892_v62, %v2518_v0  ;;  %v2375_v50 = vld [vmem:[%s2513_s15 + $0x130] sm:$0xff]  }
  0x56   : > { %2428 = vst [vmem:[%s2552_s22 + $0xe0] sm:$0xff] %v2161_v1   ;;  %v2166_v11 = vpack.c.bf16 %v728_v2, %v727_v59  ;;  %v730_v12 = vmax.f32 %v602_v3, 0.0  ;;  %v604_v13 = vadd.f32 %v2527_v9, %v472_v4  ;;  %v1896_v14 = vunpack.c.l.bf16 %v2370_v63  ;;  %v2376_v59 = vld [vmem:[%s2513_s15 + $0x138] sm:$0xff]  }
  0x57   : > { %v731_v15 = vmax.f32 %v603_v6, 0.0  ;;  %v474_v16 = vmul.f32 %v1893_v7, %v2518_v0  ;;  %v605_v17 = vadd.f32 %v2527_v9, %v473_v8  ;;  %v1897_v18 = vunpack.c.h.bf16 %v2370_v63 }
  0x58   : > { %2429 = vst [vmem:[%s2552_s22 + $0xe8] sm:$0xff] %v2166_v11   ;;  %v2171_v20 = vpack.c.bf16 %v730_v12, %v729_v5  ;;  %v732_v21 = vmax.f32 %v604_v13, 0.0  ;;  %v475_v22 = vmul.f32 %v1896_v14, %v2518_v0  ;;  %v1900_v23 = vunpack.c.l.bf16 %v2371_v10  ;;  %v2377_v5 = vld [vmem:[%s2513_s15 + $0x140] sm:$0xff]  }
  0x59   : > { %v606_v24 = vadd.f32 %v2527_v9, %v474_v16  ;;  %v733_v25 = vmax.f32 %v605_v17, 0.0  ;;  %v476_v26 = vmul.f32 %v1897_v18, %v2518_v0  ;;  %v1901_v27 = vunpack.c.h.bf16 %v2371_v10 }
  0x5a   : > { %2430 = vst [vmem:[%s2552_s22 + $0xf0] sm:$0xff] %v2171_v20   ;;  %v2176_v29 = vpack.c.bf16 %v732_v21, %v731_v15  ;;  %v607_v30 = vadd.f32 %v2527_v9, %v475_v22  ;;  %v477_v31 = vmul.f32 %v1900_v23, %v2518_v0  ;;  %v1904_v32 = vunpack.c.l.bf16 %v2372_v19 }
  0x5b   : > { %v734_v33 = vmax.f32 %v606_v24, 0.0  ;;  %v608_v34 = vadd.f32 %v2527_v9, %v476_v26  ;;  %v478_v35 = vmul.f32 %v1901_v27, %v2518_v0  ;;  %v1905_v36 = vunpack.c.h.bf16 %v2372_v19  ;;  %v2378_v19 = vld [vmem:[%s2513_s15 + $0x148] sm:$0xff]  }
  0x5c   : > { %2431 = vst [vmem:[%s2552_s22 + $0xf8] sm:$0xff] %v2176_v29   ;;  %v735_v37 = vmax.f32 %v607_v30, 0.0  ;;  %v609_v38 = vadd.f32 %v2527_v9, %v477_v31  ;;  %v479_v39 = vmul.f32 %v1904_v32, %v2518_v0  ;;  %v1908_v40 = vunpack.c.l.bf16 %v2373_v28 }
  0x5d   : > { %v2181_v42 = vpack.c.bf16 %v734_v33, %v733_v25  ;;  %v736_v43 = vmax.f32 %v608_v34, 0.0  ;;  %v610_v44 = vadd.f32 %v2527_v9, %v478_v35  ;;  %v480_v45 = vmul.f32 %v1905_v36, %v2518_v0 }
  0x5e   : > { %v737_v46 = vmax.f32 %v609_v38, 0.0  ;;  %v611_v47 = vadd.f32 %v2527_v9, %v479_v39  ;;  %v1909_v48 = vunpack.c.h.bf16 %v2373_v28  ;;  %v481_v49 = vmul.f32 %v1908_v40, %v2518_v0  ;;  %v2379_v28 = vld [vmem:[%s2513_s15 + $0x150] sm:$0xff]  }
  0x5f   : > { %2432 = vst [vmem:[%s2552_s22 + $0x100] sm:$0xff] %v2181_v42   ;;  %v2186_v51 = vpack.c.bf16 %v736_v43, %v735_v37  ;;  %v738_v52 = vmax.f32 %v610_v44, 0.0  ;;  %v612_v53 = vadd.f32 %v2527_v9, %v480_v45  ;;  %v1912_v54 = vunpack.c.l.bf16 %v2374_v41  ;;  %v2380_v37 = vld [vmem:[%s2513_s15 + $0x158] sm:$0xff]  }
  0x60   : > { %v739_v55 = vmax.f32 %v611_v47, 0.0  ;;  %v482_v56 = vmul.f32 %v1909_v48, %v2518_v0  ;;  %v613_v57 = vadd.f32 %v2527_v9, %v481_v49  ;;  %v1913_v58 = vunpack.c.h.bf16 %v2374_v41 }
  0x61   : > { %2433 = vst [vmem:[%s2552_s22 + $0x108] sm:$0xff] %v2186_v51   ;;  %v2191_v60 = vpack.c.bf16 %v738_v52, %v737_v46  ;;  %v740_v61 = vmax.f32 %v612_v53, 0.0  ;;  %v483_v62 = vmul.f32 %v1912_v54, %v2518_v0  ;;  %v1916_v63 = vunpack.c.l.bf16 %v2375_v50  ;;  %v2381_v46 = vld [vmem:[%s2513_s15 + $0x160] sm:$0xff]  }
  0x62   : > { %v614_v1 = vadd.f32 %v2527_v9, %v482_v56  ;;  %v741_v2 = vmax.f32 %v613_v57, 0.0  ;;  %v484_v3 = vmul.f32 %v1913_v58, %v2518_v0  ;;  %v1917_v4 = vunpack.c.h.bf16 %v2375_v50 }
  0x63   : > { %2434 = vst [vmem:[%s2552_s22 + $0x110] sm:$0xff] %v2191_v60   ;;  %v2196_v6 = vpack.c.bf16 %v740_v61, %v739_v55  ;;  %v615_v7 = vadd.f32 %v2527_v9, %v483_v62  ;;  %v485_v8 = vmul.f32 %v1916_v63, %v2518_v0  ;;  %v1920_v10 = vunpack.c.l.bf16 %v2376_v59 }
  0x64   : > { %v742_v11 = vmax.f32 %v614_v1, 0.0  ;;  %v616_v12 = vadd.f32 %v2527_v9, %v484_v3  ;;  %v486_v13 = vmul.f32 %v1917_v4, %v2518_v0  ;;  %v1921_v14 = vunpack.c.h.bf16 %v2376_v59  ;;  %v2382_v59 = vld [vmem:[%s2513_s15 + $0x168] sm:$0xff]  }
  0x65   : > { %2435 = vst [vmem:[%s2552_s22 + $0x118] sm:$0xff] %v2196_v6   ;;  %v743_v15 = vmax.f32 %v615_v7, 0.0  ;;  %v617_v16 = vadd.f32 %v2527_v9, %v485_v8  ;;  %v487_v17 = vmul.f32 %v1920_v10, %v2518_v0  ;;  %v1924_v18 = vunpack.c.l.bf16 %v2377_v5 }
  0x66   : > { %v2201_v20 = vpack.c.bf16 %v742_v11, %v741_v2  ;;  %v744_v21 = vmax.f32 %v616_v12, 0.0  ;;  %v618_v22 = vadd.f32 %v2527_v9, %v486_v13  ;;  %v488_v23 = vmul.f32 %v1921_v14, %v2518_v0 }
  0x67   : > { %v745_v24 = vmax.f32 %v617_v16, 0.0  ;;  %v619_v25 = vadd.f32 %v2527_v9, %v487_v17  ;;  %v1925_v26 = vunpack.c.h.bf16 %v2377_v5  ;;  %v489_v27 = vmul.f32 %v1924_v18, %v2518_v0  ;;  %v2383_v5 = vld [vmem:[%s2513_s15 + $0x170] sm:$0xff]  }
  0x68   : > { %2436 = vst [vmem:[%s2552_s22 + $0x120] sm:$0xff] %v2201_v20   ;;  %v2206_v29 = vpack.c.bf16 %v744_v21, %v743_v15  ;;  %v746_v30 = vmax.f32 %v618_v22, 0.0  ;;  %v620_v31 = vadd.f32 %v2527_v9, %v488_v23  ;;  %v1928_v32 = vunpack.c.l.bf16 %v2378_v19  ;;  %v2384_v15 = vld [vmem:[%s2513_s15 + $0x178] sm:$0xff]  }
  0x69   : > { %v747_v33 = vmax.f32 %v619_v25, 0.0  ;;  %v490_v34 = vmul.f32 %v1925_v26, %v2518_v0  ;;  %v621_v35 = vadd.f32 %v2527_v9, %v489_v27  ;;  %v1929_v36 = vunpack.c.h.bf16 %v2378_v19 }
  0x6a   : > { %2437 = vst [vmem:[%s2552_s22 + $0x128] sm:$0xff] %v2206_v29   ;;  %v2211_v38 = vpack.c.bf16 %v746_v30, %v745_v24  ;;  %v748_v39 = vmax.f32 %v620_v31, 0.0  ;;  %v491_v40 = vmul.f32 %v1928_v32, %v2518_v0  ;;  %v1932_v41 = vunpack.c.l.bf16 %v2379_v28  ;;  %v2385_v24 = vld [vmem:[%s2513_s15 + $0x180] sm:$0xff]  }
  0x6b   : > { %v622_v42 = vadd.f32 %v2527_v9, %v490_v34  ;;  %v749_v43 = vmax.f32 %v621_v35, 0.0  ;;  %v492_v44 = vmul.f32 %v1929_v36, %v2518_v0  ;;  %v1933_v45 = vunpack.c.h.bf16 %v2379_v28  ;;  %v2815_v35 = vld [vmem:[%s2930_s1] ss:$0 sm:$0xff] }
  0x6c   : > { %2438 = vst [vmem:[%s2552_s22 + $0x130] sm:$0xff] %v2211_v38   ;;  %v2216_v47 = vpack.c.bf16 %v748_v39, %v747_v33  ;;  %v623_v48 = vadd.f32 %v2527_v9, %v491_v40  ;;  %v493_v49 = vmul.f32 %v1932_v41, %v2518_v0  ;;  %v1936_v50 = vunpack.c.l.bf16 %v2380_v37  ;;  %v2386_v38 = vld [vmem:[%s2513_s15 + $0x188] sm:$0xff]  }
  0x6d   : > { %v750_v51 = vmax.f32 %v622_v42, 0.0  ;;  %v624_v52 = vadd.f32 %v2527_v9, %v492_v44  ;;  %v494_v53 = vmul.f32 %v1933_v45, %v2518_v0  ;;  %v1937_v54 = vunpack.c.h.bf16 %v2380_v37 }
  0x6e   : > { %2439 = vst [vmem:[%s2552_s22 + $0x138] sm:$0xff] %v2216_v47   ;;  %v751_v55 = vmax.f32 %v623_v48, 0.0  ;;  %v625_v56 = vadd.f32 %v2527_v9, %v493_v49  ;;  %v495_v57 = vmul.f32 %v1936_v50, %v2518_v0  ;;  %v1940_v58 = vunpack.c.l.bf16 %v2381_v46  ;;  %v2387_v47 = vld [vmem:[%s2513_s15 + $0x190] sm:$0xff]  }
  0x6f   : > { %v2221_v60 = vpack.c.bf16 %v750_v51, %v749_v43  ;;  %v752_v61 = vmax.f32 %v624_v52, 0.0  ;;  %v626_v62 = vadd.f32 %v2527_v9, %v494_v53  ;;  %v496_v63 = vmul.f32 %v1937_v54, %v2518_v0  ;;  %v2824_v43 = vld [vmem:[%s2930_s1 + $0x1] ss:$0 sm:$0xff] }
  0x70   : > { %v753_v1 = vmax.f32 %v625_v56, 0.0  ;;  %v627_v2 = vadd.f32 %v2527_v9, %v495_v57  ;;  %v1941_v3 = vunpack.c.h.bf16 %v2381_v46  ;;  %v497_v4 = vmul.f32 %v1940_v58, %v2518_v0 }
  0x71   : > { %2440 = vst [vmem:[%s2552_s22 + $0x140] sm:$0xff] %v2221_v60   ;;  %v2226_v6 = vpack.c.bf16 %v752_v61, %v751_v55  ;;  %v754_v7 = vmax.f32 %v626_v62, 0.0  ;;  %v628_v8 = vadd.f32 %v2527_v9, %v496_v63  ;;  %v1944_v10 = vunpack.c.l.bf16 %v2382_v59  ;;  %v2388_v55 = vld [vmem:[%s2513_s15 + $0x198] sm:$0xff]  }
  0x72   : > { %v755_v11 = vmax.f32 %v627_v2, 0.0  ;;  %v498_v12 = vmul.f32 %v1941_v3, %v2518_v0  ;;  %v629_v13 = vadd.f32 %v2527_v9, %v497_v4  ;;  %v1945_v14 = vunpack.c.h.bf16 %v2382_v59 }
  0x73   : > { %2441 = vst [vmem:[%s2552_s22 + $0x148] sm:$0xff] %v2226_v6   ;;  %v2231_v16 = vpack.c.bf16 %v754_v7, %v753_v1  ;;  %v756_v17 = vmax.f32 %v628_v8, 0.0  ;;  %v499_v18 = vmul.f32 %v1944_v10, %v2518_v0  ;;  %v1948_v19 = vunpack.c.l.bf16 %v2383_v5  ;;  %v2389_v1 = vld [vmem:[%s2513_s15 + $0x1a0] sm:$0xff]  }
  0x74   : > { %v630_v20 = vadd.f32 %v2527_v9, %v498_v12  ;;  %v757_v21 = vmax.f32 %v629_v13, 0.0  ;;  %v500_v22 = vmul.f32 %v1945_v14, %v2518_v0  ;;  %v1949_v23 = vunpack.c.h.bf16 %v2383_v5 }
  0x75   : > { %2442 = vst [vmem:[%s2552_s22 + $0x150] sm:$0xff] %v2231_v16   ;;  %v2236_v25 = vpack.c.bf16 %v756_v17, %v755_v11  ;;  %v631_v26 = vadd.f32 %v2527_v9, %v499_v18  ;;  %v501_v27 = vmul.f32 %v1948_v19, %v2518_v0  ;;  %v1952_v28 = vunpack.c.l.bf16 %v2384_v15 }
  0x76   : > { %v758_v29 = vmax.f32 %v630_v20, 0.0  ;;  %v632_v30 = vadd.f32 %v2527_v9, %v500_v22  ;;  %v502_v31 = vmul.f32 %v1949_v23, %v2518_v0  ;;  %v1953_v32 = vunpack.c.h.bf16 %v2384_v15  ;;  %v2390_v15 = vld [vmem:[%s2513_s15 + $0x1a8] sm:$0xff]  }
  0x77   : > { %2443 = vst [vmem:[%s2552_s22 + $0x158] sm:$0xff] %v2236_v25   ;;  %v759_v33 = vmax.f32 %v631_v26, 0.0  ;;  %v633_v34 = vadd.f32 %v2527_v9, %v501_v27  ;;  %v503_v36 = vmul.f32 %v2815_v35, %v1952_v28  ;;  %v1956_v37 = vunpack.c.l.bf16 %v2385_v24 }
  0x78   : > { %v2241_v39 = vpack.c.bf16 %v758_v29, %v757_v21  ;;  %v760_v40 = vmax.f32 %v632_v30, 0.0  ;;  %v634_v0 = vadd.f32 %v2527_v9, %v502_v31  ;;  %v504_v41 = vmul.f32 %v2815_v35, %v1953_v32 }
  0x79   : > { %v761_v42 = vmax.f32 %v633_v34, 0.0  ;;  %v635_v44 = vadd.f32 %v2824_v43, %v503_v36  ;;  %v1957_v45 = vunpack.c.h.bf16 %v2385_v24  ;;  %v505_v46 = vmul.f32 %v2815_v35, %v1956_v37  ;;  %v2391_v24 = vld [vmem:[%s2513_s15 + $0x1b0] sm:$0xff]  }
  0x7a   : > { %2444 = vst [vmem:[%s2552_s22 + $0x160] sm:$0xff] %v2241_v39   ;;  %v2246_v48 = vpack.c.bf16 %v760_v40, %v759_v33  ;;  %v762_v49 = vmax.f32 %v634_v0, 0.0  ;;  %v636_v9 = vadd.f32 %v2824_v43, %v504_v41  ;;  %v1960_v50 = vunpack.c.l.bf16 %v2386_v38  ;;  %v2392_v33 = vld [vmem:[%s2513_s15 + $0x1b8] sm:$0xff]  }
  0x7b   : > { %v763_v51 = vmax.f32 %v635_v44, 0.0  ;;  %v506_v52 = vmul.f32 %v2815_v35, %v1957_v45  ;;  %v637_v53 = vadd.f32 %v2824_v43, %v505_v46  ;;  %v1961_v54 = vunpack.c.h.bf16 %v2386_v38 }
  0x7c   : > { %2445 = vst [vmem:[%s2552_s22 + $0x168] sm:$0xff] %v2246_v48   ;;  %v2251_v56 = vpack.c.bf16 %v762_v49, %v761_v42  ;;  %v764_v57 = vmax.f32 %v636_v9, 0.0  ;;  %v507_v58 = vmul.f32 %v2815_v35, %v1960_v50  ;;  %v1964_v59 = vunpack.c.l.bf16 %v2387_v47  ;;  %v2393_v42 = vld [vmem:[%s2513_s15 + $0x1c0] sm:$0xff]  }
  0x7d   : > { %v638_v60 = vadd.f32 %v2824_v43, %v506_v52  ;;  %v765_v61 = vmax.f32 %v637_v53, 0.0  ;;  %v508_v62 = vmul.f32 %v2815_v35, %v1961_v54  ;;  %v1965_v63 = vunpack.c.h.bf16 %v2387_v47 }
  0x7e   : > { %2446 = vst [vmem:[%s2552_s22 + $0x170] sm:$0xff] %v2251_v56   ;;  %v2256_v2 = vpack.c.bf16 %v764_v57, %v763_v51  ;;  %v639_v3 = vadd.f32 %v2824_v43, %v507_v58  ;;  %v509_v4 = vmul.f32 %v2815_v35, %v1964_v59  ;;  %v1968_v5 = vunpack.c.l.bf16 %v2388_v55 }
  0x7f   : > { %v766_v6 = vmax.f32 %v638_v60, 0.0  ;;  %v640_v7 = vadd.f32 %v2824_v43, %v508_v62  ;;  %v510_v8 = vmul.f32 %v2815_v35, %v1965_v63  ;;  %v1969_v10 = vunpack.c.h.bf16 %v2388_v55  ;;  %v2394_v55 = vld [vmem:[%s2513_s15 + $0x1c8] sm:$0xff]  }
  0x80   : > { %2447 = vst [vmem:[%s2552_s22 + $0x178] sm:$0xff] %v2256_v2   ;;  %v767_v11 = vmax.f32 %v639_v3, 0.0  ;;  %v641_v12 = vadd.f32 %v2824_v43, %v509_v4  ;;  %v511_v13 = vmul.f32 %v2815_v35, %v1968_v5  ;;  %v1972_v14 = vunpack.c.l.bf16 %v2389_v1 }
  0x81   : > { %v2261_v16 = vpack.c.bf16 %v766_v6, %v765_v61  ;;  %v768_v17 = vmax.f32 %v640_v7, 0.0  ;;  %v642_v18 = vadd.f32 %v2824_v43, %v510_v8  ;;  %v512_v19 = vmul.f32 %v2815_v35, %v1969_v10 }
  0x82   : > { %v769_v20 = vmax.f32 %v641_v12, 0.0  ;;  %v643_v21 = vadd.f32 %v2824_v43, %v511_v13  ;;  %v1973_v22 = vunpack.c.h.bf16 %v2389_v1  ;;  %v513_v23 = vmul.f32 %v2815_v35, %v1972_v14  ;;  %v2395_v1 = vld [vmem:[%s2513_s15 + $0x1d0] sm:$0xff]  }
  0x83   : > { %2448 = vst [vmem:[%s2552_s22 + $0x180] sm:$0xff] %v2261_v16   ;;  %v2266_v25 = vpack.c.bf16 %v768_v17, %v767_v11  ;;  %v770_v26 = vmax.f32 %v642_v18, 0.0  ;;  %v644_v27 = vadd.f32 %v2824_v43, %v512_v19  ;;  %v1976_v28 = vunpack.c.l.bf16 %v2390_v15  ;;  %v2396_v11 = vld [vmem:[%s2513_s15 + $0x1d8] sm:$0xff]  }
  0x84   : > { %v771_v29 = vmax.f32 %v643_v21, 0.0  ;;  %v514_v30 = vmul.f32 %v2815_v35, %v1973_v22  ;;  %v645_v31 = vadd.f32 %v2824_v43, %v513_v23  ;;  %v1977_v32 = vunpack.c.h.bf16 %v2390_v15 }
  0x85   : > { %2449 = vst [vmem:[%s2552_s22 + $0x188] sm:$0xff] %v2266_v25   ;;  %v2271_v34 = vpack.c.bf16 %v770_v26, %v769_v20  ;;  %v772_v36 = vmax.f32 %v644_v27, 0.0  ;;  %v515_v37 = vmul.f32 %v2815_v35, %v1976_v28  ;;  %v1980_v38 = vunpack.c.l.bf16 %v2391_v24  ;;  %v2397_v20 = vld [vmem:[%s2513_s15 + $0x1e0] sm:$0xff]  }
  0x86   : > { %v646_v39 = vadd.f32 %v2824_v43, %v514_v30  ;;  %v773_v40 = vmax.f32 %v645_v31, 0.0  ;;  %v516_v0 = vmul.f32 %v2815_v35, %v1977_v32  ;;  %v1981_v41 = vunpack.c.h.bf16 %v2391_v24 }
  0x87   : > { %2450 = vst [vmem:[%s2552_s22 + $0x190] sm:$0xff] %v2271_v34   ;;  %v2276_v44 = vpack.c.bf16 %v772_v36, %v771_v29  ;;  %v647_v45 = vadd.f32 %v2824_v43, %v515_v37  ;;  %v517_v46 = vmul.f32 %v2815_v35, %v1980_v38  ;;  %v1984_v47 = vunpack.c.l.bf16 %v2392_v33 }
  0x88   : > { %v774_v48 = vmax.f32 %v646_v39, 0.0  ;;  %v648_v49 = vadd.f32 %v2824_v43, %v516_v0  ;;  %v518_v9 = vmul.f32 %v2815_v35, %v1981_v41  ;;  %v1985_v50 = vunpack.c.h.bf16 %v2392_v33  ;;  %v2398_v33 = vld [vmem:[%s2513_s15 + $0x1e8] sm:$0xff]  }
  0x89   : > { %2451 = vst [vmem:[%s2552_s22 + $0x198] sm:$0xff] %v2276_v44   ;;  %v775_v51 = vmax.f32 %v647_v45, 0.0  ;;  %v649_v52 = vadd.f32 %v2824_v43, %v517_v46  ;;  %v519_v53 = vmul.f32 %v2815_v35, %v1984_v47  ;;  %v1988_v54 = vunpack.c.l.bf16 %v2393_v42 }
  0x8a   : > { %v2281_v56 = vpack.c.bf16 %v774_v48, %v773_v40  ;;  %v776_v57 = vmax.f32 %v648_v49, 0.0  ;;  %v650_v58 = vadd.f32 %v2824_v43, %v518_v9  ;;  %v520_v59 = vmul.f32 %v2815_v35, %v1985_v50 }
  0x8b   : > { %v777_v60 = vmax.f32 %v649_v52, 0.0  ;;  %v651_v61 = vadd.f32 %v2824_v43, %v519_v53  ;;  %v1989_v62 = vunpack.c.h.bf16 %v2393_v42  ;;  %v521_v63 = vmul.f32 %v2815_v35, %v1988_v54  ;;  %v2399_v42 = vld [vmem:[%s2513_s15 + $0x1f0] sm:$0xff]  }
  0x8c   : > { %2452 = vst [vmem:[%s2552_s22 + $0x1a0] sm:$0xff] %v2281_v56   ;;  %v2286_v2 = vpack.c.bf16 %v776_v57, %v775_v51  ;;  %v778_v3 = vmax.f32 %v650_v58, 0.0  ;;  %v652_v4 = vadd.f32 %v2824_v43, %v520_v59  ;;  %v1992_v5 = vunpack.c.l.bf16 %v2394_v55  ;;  %v2400_v51 = vld [vmem:[%s2513_s15 + $0x1f8] sm:$0xff]  }
  0x8d   : > { %v779_v6 = vmax.f32 %v651_v61, 0.0  ;;  %v522_v7 = vmul.f32 %v2815_v35, %v1989_v62  ;;  %v653_v8 = vadd.f32 %v2824_v43, %v521_v63  ;;  %v1993_v10 = vunpack.c.h.bf16 %v2394_v55 }
  0x8e   : > { %2453 = vst [vmem:[%s2552_s22 + $0x1a8] sm:$0xff] %v2286_v2   ;;  %v2291_v12 = vpack.c.bf16 %v778_v3, %v777_v60  ;;  %v780_v13 = vmax.f32 %v652_v4, 0.0  ;;  %v523_v14 = vmul.f32 %v2815_v35, %v1992_v5  ;;  %v1996_v15 = vunpack.c.l.bf16 %v2395_v1 }
  0x8f   : > { %v654_v16 = vadd.f32 %v2824_v43, %v522_v7  ;;  %v781_v17 = vmax.f32 %v653_v8, 0.0  ;;  %v524_v18 = vmul.f32 %v2815_v35, %v1993_v10  ;;  %v1997_v19 = vunpack.c.h.bf16 %v2395_v1 }
  0x90   : > { %2454 = vst [vmem:[%s2552_s22 + $0x1b0] sm:$0xff] %v2291_v12   ;;  %v2296_v21 = vpack.c.bf16 %v780_v13, %v779_v6  ;;  %v655_v22 = vadd.f32 %v2824_v43, %v523_v14  ;;  %v525_v23 = vmul.f32 %v2815_v35, %v1996_v15  ;;  %v2000_v24 = vunpack.c.l.bf16 %v2396_v11 }
  0x91   : > { %v782_v25 = vmax.f32 %v654_v16, 0.0  ;;  %v656_v26 = vadd.f32 %v2824_v43, %v524_v18  ;;  %v526_v27 = vmul.f32 %v2815_v35, %v1997_v19  ;;  %v2001_v28 = vunpack.c.h.bf16 %v2396_v11 }
  0x92   : > { %2455 = vst [vmem:[%s2552_s22 + $0x1b8] sm:$0xff] %v2296_v21   ;;  %v783_v29 = vmax.f32 %v655_v22, 0.0  ;;  %v657_v30 = vadd.f32 %v2824_v43, %v525_v23  ;;  %v527_v31 = vmul.f32 %v2815_v35, %v2000_v24  ;;  %v2004_v32 = vunpack.c.l.bf16 %v2397_v20 }
  0x93   : > { %v2301_v34 = vpack.c.bf16 %v782_v25, %v781_v17  ;;  %v784_v36 = vmax.f32 %v656_v26, 0.0  ;;  %v658_v37 = vadd.f32 %v2824_v43, %v526_v27  ;;  %v528_v38 = vmul.f32 %v2815_v35, %v2001_v28 }
  0x94   : > { %v785_v39 = vmax.f32 %v657_v30, 0.0  ;;  %v659_v40 = vadd.f32 %v2824_v43, %v527_v31  ;;  %v2005_v0 = vunpack.c.h.bf16 %v2397_v20  ;;  %v529_v41 = vmul.f32 %v2815_v35, %v2004_v32 }
  0x95   : > { %2456 = vst [vmem:[%s2552_s22 + $0x1c0] sm:$0xff] %v2301_v34   ;;  %v2306_v44 = vpack.c.bf16 %v784_v36, %v783_v29  ;;  %v786_v45 = vmax.f32 %v658_v37, 0.0  ;;  %v660_v46 = vadd.f32 %v2824_v43, %v528_v38  ;;  %v2008_v47 = vunpack.c.l.bf16 %v2398_v33 }
  0x96   : > { %v787_v48 = vmax.f32 %v659_v40, 0.0  ;;  %v530_v49 = vmul.f32 %v2815_v35, %v2005_v0  ;;  %v661_v9 = vadd.f32 %v2824_v43, %v529_v41  ;;  %v2009_v50 = vunpack.c.h.bf16 %v2398_v33 }
  0x97   : > { %2457 = vst [vmem:[%s2552_s22 + $0x1c8] sm:$0xff] %v2306_v44   ;;  %v2311_v52 = vpack.c.bf16 %v786_v45, %v785_v39  ;;  %v788_v53 = vmax.f32 %v660_v46, 0.0  ;;  %v531_v54 = vmul.f32 %v2815_v35, %v2008_v47  ;;  %v2012_v55 = vunpack.c.l.bf16 %v2399_v42 }
  0x98   : > { %v662_v56 = vadd.f32 %v2824_v43, %v530_v49  ;;  %v789_v57 = vmax.f32 %v661_v9, 0.0  ;;  %v532_v58 = vmul.f32 %v2815_v35, %v2009_v50  ;;  %v2013_v59 = vunpack.c.h.bf16 %v2399_v42 }
  0x99   : > { %2458 = vst [vmem:[%s2552_s22 + $0x1d0] sm:$0xff] %v2311_v52   ;;  %v2316_v60 = vpack.c.bf16 %v788_v53, %v787_v48  ;;  %v663_v61 = vadd.f32 %v2824_v43, %v531_v54  ;;  %v533_v62 = vmul.f32 %v2815_v35, %v2012_v55  ;;  %v2016_v63 = vunpack.c.l.bf16 %v2400_v51 }
  0x9a   : > { %v790_v1 = vmax.f32 %v662_v56, 0.0  ;;  %v664_v2 = vadd.f32 %v2824_v43, %v532_v58  ;;  %v534_v3 = vmul.f32 %v2815_v35, %v2013_v59  ;;  %v2017_v4 = vunpack.c.h.bf16 %v2400_v51 }
  0x9b   : > { %2459 = vst [vmem:[%s2552_s22 + $0x1d8] sm:$0xff] %v2316_v60   ;;  %v791_v5 = vmax.f32 %v663_v61, 0.0  ;;  %v665_v6 = vadd.f32 %v2824_v43, %v533_v62  ;;  %v535_v7 = vmul.f32 %v2815_v35, %v2016_v63 }
  0x9c   : > { %v2321_v8 = vpack.c.bf16 %v790_v1, %v789_v57  ;;  %v792_v10 = vmax.f32 %v664_v2, 0.0  ;;  %v666_v11 = vadd.f32 %v2824_v43, %v534_v3  ;;  %v536_v12 = vmul.f32 %v2815_v35, %v2017_v4 }
  0x9d   : > { %v793_v13 = vmax.f32 %v665_v6, 0.0  ;;  %v667_v14 = vadd.f32 %v2824_v43, %v535_v7 }
  0x9e   : > { %2460 = vst [vmem:[%s2552_s22 + $0x1e0] sm:$0xff] %v2321_v8   ;;  %v2326_v15 = vpack.c.bf16 %v792_v10, %v791_v5  ;;  %v794_v16 = vmax.f32 %v666_v11, 0.0  ;;  %v668_v17 = vadd.f32 %v2824_v43, %v536_v12 }
  0x9f   : > { %v795_v18 = vmax.f32 %v667_v14, 0.0 }
  0xa0   : > { %2461 = vst [vmem:[%s2552_s22 + $0x1e8] sm:$0xff] %v2326_v15   ;;  %v2331_v19 = vpack.c.bf16 %v794_v16, %v793_v13  ;;  %v796_v20 = vmax.f32 %v668_v17, 0.0 }
  0xa2   : > { %2462 = vst [vmem:[%s2552_s22 + $0x1f0] sm:$0xff] %v2331_v19   ;;  %v2336_v21 = vpack.c.bf16 %v796_v20, %v795_v18 }
  0xa4   : > { %2463 = vst [vmem:[%s2552_s22 + $0x1f8] sm:$0xff] %v2336_v21  }
  0xa5 PF: > { %s12_s9 = sadd.s32 1, %s2480_s9  }
  0xa6   : > { %p9_p4 = scmp.ge.s32.totalorder %s12_s9, 4  }
  0xa8   :  { %11 = sbr.rel (!%p9_p4) target bundleno = 1 (0x1), region = 58 }

</bundles_post_ra>
